<compile_context>
chip_gen: v7x
topology: tpu7x:2x2x1
jax: 0.10.0
libtpu: 0.0.40
codegen_flags: <defaults>
</compile_context>

<pallas_src>
import functools

import jax
import jax.numpy as jnp
from jax.experimental import pallas as pl
from jax.experimental.pallas import tpu as pltpu


SUBLANE = 8    # f32 sublane tile
LANE = 128     # lane tile


def _round_up(x, m):
    return (x + m - 1) // m * m


# ----------------------------------------------------------------------------
# Fused kernel: 3-layer LSTM over the whole sequence + Linear head.
# PyTorch gate order in the stacked 4*Hp dimension: [i, f, g, o], each gate
# zero-padded to Hp lanes so every gate slice is 128-lane aligned.
# ----------------------------------------------------------------------------
def _fused_fantasy_lstm_kernel(num_layers, seq_len, batch_p, hidden_p, *refs):
    """Ref layout (all VMEM, no scratch):
      refs[0]                      x_ref  (T*Bp, D_in)  bf16, time-major flat
      refs[1+3l .. 3+3l]           (w_ih, w_hh, bias) for layer l:
                                   w_ih (D_prev, 4Hp) bf16, w_hh (Hp, 4Hp) bf16,
                                   bias (1, 4Hp) f32
      refs[-3], refs[-2] (inputs)  fc_w (Hp, O) f32, fc_b (1, O) f32
      refs[-1]                     out_ref (Bp, O) f32
    """
    T, Bp, Hp = seq_len, batch_p, hidden_p
    n_in = 1 + 3 * num_layers + 2

    x_ref = refs[0]
    layer_refs = [tuple(refs[1 + 3 * l: 4 + 3 * l]) for l in range(num_layers)]
    fcw_ref = refs[n_in - 2]
    fcb_ref = refs[n_in - 1]
    out_ref = refs[n_in]

    src = x_ref[...]                                   # bf16 (T*Bp, D_prev)
    h = None
    for layer, (wih_ref, whh_ref, b_ref) in enumerate(layer_refs):
        # Hoisted input projection: one (T*Bp, D) @ (D, 4Hp) bf16 MXU matmul
        # with f32 accumulation; result stays a plain value (no VMEM scratch).
        gx = (jnp.dot(src, wih_ref[...], preferred_element_type=jnp.float32)
              + b_ref[...])

        whh = whh_ref[...]                             # bf16 (Hp, 4Hp)
        h = jnp.zeros((Bp, Hp), jnp.float32)
        c = jnp.zeros((Bp, Hp), jnp.float32)
        hs = []
        # T is small & static -> fully unrolled; only h @ W_hh is serial.
        # TODO(synk): switch to lax.fori_loop carrying (h, c) if T grows large.
        for t in range(T):
            # Bp is a multiple of 8 -> sublane-aligned slice; Hp = 128 -> the
            # four gate slices below are lane-tile aligned.
            gates = gx[t * Bp:(t + 1) * Bp, :] + jnp.dot(
                h.astype(jnp.bfloat16), whh, preferred_element_type=jnp.float32)
            i_g = jax.nn.sigmoid(gates[:, 0 * Hp:1 * Hp])
            f_g = jax.nn.sigmoid(gates[:, 1 * Hp:2 * Hp])
            g_g = jnp.tanh(gates[:, 2 * Hp:3 * Hp])
            o_g = jax.nn.sigmoid(gates[:, 3 * Hp:4 * Hp])
            c = f_g * c + i_g * g_g
            h = o_g * jnp.tanh(c)
            if layer + 1 < num_layers:
                hs.append(h)
        if layer + 1 < num_layers:
            # Next layer's input sequence, kept as a value (tile-aligned concat).
            src = jnp.concatenate(hs, axis=0).astype(jnp.bfloat16)

    # FC head on the top layer's final hidden state (== hn[-1]).
    out_ref[...] = (
        jnp.dot(h, fcw_ref[...], preferred_element_type=jnp.float32) + fcb_ref[...]
    )


def _pad_gate_cols(w, H, Hp):
    """(rows, 4H) -> (rows, 4Hp): zero-pad each of the [i,f,g,o] blocks to Hp."""
    rows = w.shape[0]
    w4 = jnp.pad(w.reshape(rows, 4, H), ((0, 0), (0, 0), (0, Hp - H)))
    return w4.reshape(rows, 4 * Hp)


def fantasy_lstm_forward(x_btd, params):
    """x_btd: (B, T, input_size), batch_first like PyTorch. Returns (B, output_size)."""
    B, T, D_in = x_btd.shape
    H = params["layers"][0][1].shape[0]
    O = params["fc_w"].shape[1]
    num_layers = len(params["layers"])

    Bp = _round_up(B, SUBLANE)   # full sublane tile -> aligned per-step slices
    Hp = _round_up(H, LANE)      # full lane tile    -> aligned gate slices

    # Pad batch with zero rows, go time-major and flatten so the hoisted input
    # projection is one big matmul per layer. bf16 operands for the MXU.
    x_p = jnp.pad(x_btd, ((0, Bp - B), (0, 0), (0, 0)))
    x_flat = jnp.transpose(x_p, (1, 0, 2)).reshape(T * Bp, D_in).astype(jnp.bfloat16)

    args = [x_flat]
    for layer, (w_ih, w_hh, bias) in enumerate(params["layers"]):
        d_in = w_ih.shape[0]
        w_ih_p = _pad_gate_cols(w_ih, H, Hp)
        if layer > 0:                      # input of layers > 0 is padded h (Hp)
            w_ih_p = jnp.pad(w_ih_p, ((0, Hp - d_in), (0, 0)))
        w_hh_p = jnp.pad(_pad_gate_cols(w_hh, H, Hp), ((0, Hp - H), (0, 0)))
        b_p = _pad_gate_cols(bias, H, Hp)
        args += [w_ih_p.astype(jnp.bfloat16),
                 w_hh_p.astype(jnp.bfloat16),
                 b_p.astype(jnp.float32)]
    fc_w_p = jnp.pad(params["fc_w"], ((0, Hp - H), (0, 0))).astype(jnp.float32)
    args += [fc_w_p, params["fc_b"].astype(jnp.float32)]

    kernel = functools.partial(_fused_fantasy_lstm_kernel, num_layers, T, Bp, Hp)

    out_p = pl.pallas_call(
        kernel,
        out_shape=jax.ShapeDtypeStruct((Bp, O), jnp.float32),
        in_specs=[pl.BlockSpec(memory_space=pltpu.MemorySpace.VMEM) for _ in args],
        out_specs=pl.BlockSpec(memory_space=pltpu.MemorySpace.VMEM),
    )(*args)
    return out_p[:B]


def init_params(key, input_size, hidden_size, output_size, num_layers):
    """PyTorch-style uniform(-1/sqrt(H), 1/sqrt(H)) init, deterministic.

    Weights stored pre-transposed: w_ih (d_in, 4H), w_hh (H, 4H); gate order [i,f,g,o].
    """
    k = 1.0 / jnp.sqrt(jnp.float32(hidden_size))
    layers = []
    for layer in range(num_layers):
        d_in = input_size if layer == 0 else hidden_size
        key, k1, k2, k3, k4 = jax.random.split(key, 5)
        w_ih = jax.random.uniform(k1, (d_in, 4 * hidden_size), jnp.float32, -k, k)
        w_hh = jax.random.uniform(k2, (hidden_size, 4 * hidden_size), jnp.float32, -k, k)
        b_ih = jax.random.uniform(k3, (4 * hidden_size,), jnp.float32, -k, k)
        b_hh = jax.random.uniform(k4, (4 * hidden_size,), jnp.float32, -k, k)
        layers.append((w_ih, w_hh, (b_ih + b_hh)[None, :]))
    key, k5, k6 = jax.random.split(key, 3)
    fc_w = jax.random.uniform(k5, (hidden_size, output_size), jnp.float32, -k, k)
    fc_b = jax.random.uniform(k6, (1, output_size), jnp.float32, -k, k)
    return {"layers": layers, "fc_w": fc_w, "fc_b": fc_b}


# ----------------------------------------------------------------------------
# Pure-JAX f32 reference (mirrors PyTorch LSTM semantics, for correctness check)
# ----------------------------------------------------------------------------
def reference_forward(x_btd, params):
    x = jnp.transpose(x_btd, (1, 0, 2))  # (T, B, D)
    H = params["layers"][0][1].shape[0]
    for (w_ih, w_hh, bias) in params["layers"]:
        B = x.shape[1]
        h0 = jnp.zeros((B, H), jnp.float32)
        c0 = jnp.zeros((B, H), jnp.float32)

        def step(carry, x_t):
            h, c = carry
            gates = x_t @ w_ih + h @ w_hh + bias
            i_g = jax.nn.sigmoid(gates[:, 0 * H:1 * H])
            f_g = jax.nn.sigmoid(gates[:, 1 * H:2 * H])
            g_g = jnp.tanh(gates[:, 2 * H:3 * H])
            o_g = jax.nn.sigmoid(gates[:, 3 * H:4 * H])
            c_n = f_g * c + i_g * g_g
            h_n = o_g * jnp.tanh(c_n)
            return (h_n, c_n), h_n

        (_, _), hs = jax.lax.scan(step, (h0, c0), x)
        x = hs
    return x[-1] @ params["fc_w"] + params["fc_b"]


if __name__ == "__main__":
    # Small shapes consistent with the module's forward:
    # batch=2, seq=8, input_size=4 (stand-in for len(data.columns)-3),
    # hidden_size=64, num_layers=3, output_size=1.
    B, T, INPUT_SIZE = 2, 8, 4
    HIDDEN_SIZE, NUM_LAYERS, OUTPUT_SIZE = 64, 3, 1

    key = jax.random.PRNGKey(0)
    key, xk = jax.random.split(key)
    x = jax.random.normal(xk, (B, T, INPUT_SIZE), jnp.float32)

    params = init_params(key, INPUT_SIZE, HIDDEN_SIZE, OUTPUT_SIZE, NUM_LAYERS)

    out = jax.block_until_ready(fantasy_lstm_forward(x, params))
    ref = jax.block_until_ready(reference_forward(x, params))

    assert out.shape == (B, OUTPUT_SIZE), out.shape
    # bf16 MXU operands (with f32 accumulation) -> tolerance relaxed vs f32 ref.
    assert jnp.allclose(out, ref, atol=5e-2, rtol=5e-2), (out, ref)
    print("KERNEL_OK")
</pallas_src>

<mosaic_0001>
module attributes {stable_mosaic.version = 11 : i64} {
  func.func @_fused_fantasy_lstm_kernel(%arg0: memref<64x4xbf16, #tpu.memory_space<vmem>>, %arg1: memref<4x512xbf16, #tpu.memory_space<vmem>>, %arg2: memref<128x512xbf16, #tpu.memory_space<vmem>>, %arg3: memref<1x512xf32, #tpu.memory_space<vmem>>, %arg4: memref<128x512xbf16, #tpu.memory_space<vmem>>, %arg5: memref<128x512xbf16, #tpu.memory_space<vmem>>, %arg6: memref<1x512xf32, #tpu.memory_space<vmem>>, %arg7: memref<128x512xbf16, #tpu.memory_space<vmem>>, %arg8: memref<128x512xbf16, #tpu.memory_space<vmem>>, %arg9: memref<1x512xf32, #tpu.memory_space<vmem>>, %arg10: memref<128x1xf32, #tpu.memory_space<vmem>>, %arg11: memref<1x1xf32, #tpu.memory_space<vmem>>, %arg12: memref<8x1xf32, #tpu.memory_space<vmem>>) attributes {dimension_semantics = [], scalar_prefetch = 0 : i64, scratch_operands = 0 : i64, tpu.core_type = #tpu.core_type<tc>} {
    %c0 = arith.constant 0 : index
    %c0_0 = arith.constant 0 : index
    %0 = vector.load %arg0[%c0, %c0_0] : memref<64x4xbf16, #tpu.memory_space<vmem>>, vector<64x4xbf16>
    %c0_1 = arith.constant 0 : index
    %c0_2 = arith.constant 0 : index
    %1 = vector.load %arg1[%c0_1, %c0_2] : memref<4x512xbf16, #tpu.memory_space<vmem>>, vector<4x512xbf16>
    %cst = arith.constant dense<0.000000e+00> : vector<64x512xf32>
    %2 = tpu.matmul %0, %1, %cst {dimension_numbers = #tpu.dot_dimension_numbers<[1], [0], [0], [1], [0, 0, 1, 1], [], []>} : vector<64x4xbf16>, vector<4x512xbf16>, vector<64x512xf32> -> vector<64x512xf32>
    %c0_3 = arith.constant 0 : index
    %c0_4 = arith.constant 0 : index
    %3 = vector.load %arg3[%c0_3, %c0_4] : memref<1x512xf32, #tpu.memory_space<vmem>>, vector<1x512xf32>
    %4 = vector.broadcast %3 : vector<1x512xf32> to vector<64x512xf32>
    %5 = arith.addf %2, %4 : vector<64x512xf32>
    %c0_5 = arith.constant 0 : index
    %c0_6 = arith.constant 0 : index
    %6 = vector.load %arg2[%c0_5, %c0_6] : memref<128x512xbf16, #tpu.memory_space<vmem>>, vector<128x512xbf16>
    %cst_7 = arith.constant 0.000000e+00 : f32
    %7 = vector.broadcast %cst_7 : f32 to vector<8x128xf32>
    %cst_8 = arith.constant 0.000000e+00 : f32
    %8 = vector.broadcast %cst_8 : f32 to vector<8x128xf32>
    %9 = vector.extract_strided_slice %5 {offsets = [0, 0], sizes = [8, 512], strides = [1, 1]} : vector<64x512xf32> to vector<8x512xf32>
    %10 = arith.truncf %7 : vector<8x128xf32> to vector<8x128xbf16>
    %cst_9 = arith.constant dense<0.000000e+00> : vector<8x512xf32>
    %11 = tpu.matmul %10, %6, %cst_9 {dimension_numbers = #tpu.dot_dimension_numbers<[1], [0], [0], [1], [0, 0, 1, 1], [], []>} : vector<8x128xbf16>, vector<128x512xbf16>, vector<8x512xf32> -> vector<8x512xf32>
    %12 = arith.addf %9, %11 : vector<8x512xf32>
    %13 = vector.extract_strided_slice %12 {offsets = [0, 0], sizes = [8, 128], strides = [1, 1]} : vector<8x512xf32> to vector<8x128xf32>
    %14 = arith.negf %13 : vector<8x128xf32>
    %15 = math.exp %14 : vector<8x128xf32>
    %cst_10 = arith.constant 1.000000e+00 : f32
    %16 = vector.broadcast %cst_10 : f32 to vector<8x128xf32>
    %17 = arith.addf %16, %15 : vector<8x128xf32>
    %18 = arith.divf %16, %17 : vector<8x128xf32>
    %19 = vector.extract_strided_slice %12 {offsets = [0, 128], sizes = [8, 128], strides = [1, 1]} : vector<8x512xf32> to vector<8x128xf32>
    %20 = arith.negf %19 : vector<8x128xf32>
    %21 = math.exp %20 : vector<8x128xf32>
    %cst_11 = arith.constant 1.000000e+00 : f32
    %22 = vector.broadcast %cst_11 : f32 to vector<8x128xf32>
    %23 = arith.addf %22, %21 : vector<8x128xf32>
    %24 = arith.divf %22, %23 : vector<8x128xf32>
    %25 = vector.extract_strided_slice %12 {offsets = [0, 256], sizes = [8, 128], strides = [1, 1]} : vector<8x512xf32> to vector<8x128xf32>
    %26 = math.tanh %25 : vector<8x128xf32>
    %27 = vector.extract_strided_slice %12 {offsets = [0, 384], sizes = [8, 128], strides = [1, 1]} : vector<8x512xf32> to vector<8x128xf32>
    %28 = arith.negf %27 : vector<8x128xf32>
    %29 = math.exp %28 : vector<8x128xf32>
    %cst_12 = arith.constant 1.000000e+00 : f32
    %30 = vector.broadcast %cst_12 : f32 to vector<8x128xf32>
    %31 = arith.addf %30, %29 : vector<8x128xf32>
    %32 = arith.divf %30, %31 : vector<8x128xf32>
    %33 = arith.mulf %24, %8 : vector<8x128xf32>
    %34 = arith.mulf %18, %26 : vector<8x128xf32>
    %35 = arith.addf %33, %34 : vector<8x128xf32>
    %36 = math.tanh %35 : vector<8x128xf32>
    %37 = arith.mulf %32, %36 : vector<8x128xf32>
    %38 = vector.extract_strided_slice %5 {offsets = [8, 0], sizes = [8, 512], strides = [1, 1]} : vector<64x512xf32> to vector<8x512xf32>
    %39 = arith.truncf %37 : vector<8x128xf32> to vector<8x128xbf16>
    %cst_13 = arith.constant dense<0.000000e+00> : vector<8x512xf32>
    %40 = tpu.matmul %39, %6, %cst_13 {dimension_numbers = #tpu.dot_dimension_numbers<[1], [0], [0], [1], [0, 0, 1, 1], [], []>} : vector<8x128xbf16>, vector<128x512xbf16>, vector<8x512xf32> -> vector<8x512xf32>
    %41 = arith.addf %38, %40 : vector<8x512xf32>
    %42 = vector.extract_strided_slice %41 {offsets = [0, 0], sizes = [8, 128], strides = [1, 1]} : vector<8x512xf32> to vector<8x128xf32>
    %43 = arith.negf %42 : vector<8x128xf32>
    %44 = math.exp %43 : vector<8x128xf32>
    %cst_14 = arith.constant 1.000000e+00 : f32
    %45 = vector.broadcast %cst_14 : f32 to vector<8x128xf32>
    %46 = arith.addf %45, %44 : vector<8x128xf32>
    %47 = arith.divf %45, %46 : vector<8x128xf32>
    %48 = vector.extract_strided_slice %41 {offsets = [0, 128], sizes = [8, 128], strides = [1, 1]} : vector<8x512xf32> to vector<8x128xf32>
    %49 = arith.negf %48 : vector<8x128xf32>
    %50 = math.exp %49 : vector<8x128xf32>
    %cst_15 = arith.constant 1.000000e+00 : f32
    %51 = vector.broadcast %cst_15 : f32 to vector<8x128xf32>
    %52 = arith.addf %51, %50 : vector<8x128xf32>
    %53 = arith.divf %51, %52 : vector<8x128xf32>
    %54 = vector.extract_strided_slice %41 {offsets = [0, 256], sizes = [8, 128], strides = [1, 1]} : vector<8x512xf32> to vector<8x128xf32>
    %55 = math.tanh %54 : vector<8x128xf32>
    %56 = vector.extract_strided_slice %41 {offsets = [0, 384], sizes = [8, 128], strides = [1, 1]} : vector<8x512xf32> to vector<8x128xf32>
    %57 = arith.negf %56 : vector<8x128xf32>
    %58 = math.exp %57 : vector<8x128xf32>
    %cst_16 = arith.constant 1.000000e+00 : f32
    %59 = vector.broadcast %cst_16 : f32 to vector<8x128xf32>
    %60 = arith.addf %59, %58 : vector<8x128xf32>
    %61 = arith.divf %59, %60 : vector<8x128xf32>
    %62 = arith.mulf %53, %35 : vector<8x128xf32>
    %63 = arith.mulf %47, %55 : vector<8x128xf32>
    %64 = arith.addf %62, %63 : vector<8x128xf32>
    %65 = math.tanh %64 : vector<8x128xf32>
    %66 = arith.mulf %61, %65 : vector<8x128xf32>
    %67 = vector.extract_strided_slice %5 {offsets = [16, 0], sizes = [8, 512], strides = [1, 1]} : vector<64x512xf32> to vector<8x512xf32>
    %68 = arith.truncf %66 : vector<8x128xf32> to vector<8x128xbf16>
    %cst_17 = arith.constant dense<0.000000e+00> : vector<8x512xf32>
    %69 = tpu.matmul %68, %6, %cst_17 {dimension_numbers = #tpu.dot_dimension_numbers<[1], [0], [0], [1], [0, 0, 1, 1], [], []>} : vector<8x128xbf16>, vector<128x512xbf16>, vector<8x512xf32> -> vector<8x512xf32>
    %70 = arith.addf %67, %69 : vector<8x512xf32>
    %71 = vector.extract_strided_slice %70 {offsets = [0, 0], sizes = [8, 128], strides = [1, 1]} : vector<8x512xf32> to vector<8x128xf32>
    %72 = arith.negf %71 : vector<8x128xf32>
    %73 = math.exp %72 : vector<8x128xf32>
    %cst_18 = arith.constant 1.000000e+00 : f32
    %74 = vector.broadcast %cst_18 : f32 to vector<8x128xf32>
    %75 = arith.addf %74, %73 : vector<8x128xf32>
    %76 = arith.divf %74, %75 : vector<8x128xf32>
    %77 = vector.extract_strided_slice %70 {offsets = [0, 128], sizes = [8, 128], strides = [1, 1]} : vector<8x512xf32> to vector<8x128xf32>
    %78 = arith.negf %77 : vector<8x128xf32>
    %79 = math.exp %78 : vector<8x128xf32>
    %cst_19 = arith.constant 1.000000e+00 : f32
    %80 = vector.broadcast %cst_19 : f32 to vector<8x128xf32>
    %81 = arith.addf %80, %79 : vector<8x128xf32>
    %82 = arith.divf %80, %81 : vector<8x128xf32>
    %83 = vector.extract_strided_slice %70 {offsets = [0, 256], sizes = [8, 128], strides = [1, 1]} : vector<8x512xf32> to vector<8x128xf32>
    %84 = math.tanh %83 : vector<8x128xf32>
    %85 = vector.extract_strided_slice %70 {offsets = [0, 384], sizes = [8, 128], strides = [1, 1]} : vector<8x512xf32> to vector<8x128xf32>
    %86 = arith.negf %85 : vector<8x128xf32>
    %87 = math.exp %86 : vector<8x128xf32>
    %cst_20 = arith.constant 1.000000e+00 : f32
    %88 = vector.broadcast %cst_20 : f32 to vector<8x128xf32>
    %89 = arith.addf %88, %87 : vector<8x128xf32>
    %90 = arith.divf %88, %89 : vector<8x128xf32>
    %91 = arith.mulf %82, %64 : vector<8x128xf32>
    %92 = arith.mulf %76, %84 : vector<8x128xf32>
    %93 = arith.addf %91, %92 : vector<8x128xf32>
    %94 = math.tanh %93 : vector<8x128xf32>
    %95 = arith.mulf %90, %94 : vector<8x128xf32>
    %96 = vector.extract_strided_slice %5 {offsets = [24, 0], sizes = [8, 512], strides = [1, 1]} : vector<64x512xf32> to vector<8x512xf32>
    %97 = arith.truncf %95 : vector<8x128xf32> to vector<8x128xbf16>
    %cst_21 = arith.constant dense<0.000000e+00> : vector<8x512xf32>
    %98 = tpu.matmul %97, %6, %cst_21 {dimension_numbers = #tpu.dot_dimension_numbers<[1], [0], [0], [1], [0, 0, 1, 1], [], []>} : vector<8x128xbf16>, vector<128x512xbf16>, vector<8x512xf32> -> vector<8x512xf32>
    %99 = arith.addf %96, %98 : vector<8x512xf32>
    %100 = vector.extract_strided_slice %99 {offsets = [0, 0], sizes = [8, 128], strides = [1, 1]} : vector<8x512xf32> to vector<8x128xf32>
    %101 = arith.negf %100 : vector<8x128xf32>
    %102 = math.exp %101 : vector<8x128xf32>
    %cst_22 = arith.constant 1.000000e+00 : f32
    %103 = vector.broadcast %cst_22 : f32 to vector<8x128xf32>
    %104 = arith.addf %103, %102 : vector<8x128xf32>
    %105 = arith.divf %103, %104 : vector<8x128xf32>
    %106 = vector.extract_strided_slice %99 {offsets = [0, 128], sizes = [8, 128], strides = [1, 1]} : vector<8x512xf32> to vector<8x128xf32>
    %107 = arith.negf %106 : vector<8x128xf32>
    %108 = math.exp %107 : vector<8x128xf32>
    %cst_23 = arith.constant 1.000000e+00 : f32
    %109 = vector.broadcast %cst_23 : f32 to vector<8x128xf32>
    %110 = arith.addf %109, %108 : vector<8x128xf32>
    %111 = arith.divf %109, %110 : vector<8x128xf32>
    %112 = vector.extract_strided_slice %99 {offsets = [0, 256], sizes = [8, 128], strides = [1, 1]} : vector<8x512xf32> to vector<8x128xf32>
    %113 = math.tanh %112 : vector<8x128xf32>
    %114 = vector.extract_strided_slice %99 {offsets = [0, 384], sizes = [8, 128], strides = [1, 1]} : vector<8x512xf32> to vector<8x128xf32>
    %115 = arith.negf %114 : vector<8x128xf32>
    %116 = math.exp %115 : vector<8x128xf32>
    %cst_24 = arith.constant 1.000000e+00 : f32
    %117 = vector.broadcast %cst_24 : f32 to vector<8x128xf32>
    %118 = arith.addf %117, %116 : vector<8x128xf32>
    %119 = arith.divf %117, %118 : vector<8x128xf32>
    %120 = arith.mulf %111, %93 : vector<8x128xf32>
    %121 = arith.mulf %105, %113 : vector<8x128xf32>
    %122 = arith.addf %120, %121 : vector<8x128xf32>
    %123 = math.tanh %122 : vector<8x128xf32>
    %124 = arith.mulf %119, %123 : vector<8x128xf32>
    %125 = vector.extract_strided_slice %5 {offsets = [32, 0], sizes = [8, 512], strides = [1, 1]} : vector<64x512xf32> to vector<8x512xf32>
    %126 = arith.truncf %124 : vector<8x128xf32> to vector<8x128xbf16>
    %cst_25 = arith.constant dense<0.000000e+00> : vector<8x512xf32>
    %127 = tpu.matmul %126, %6, %cst_25 {dimension_numbers = #tpu.dot_dimension_numbers<[1], [0], [0], [1], [0, 0, 1, 1], [], []>} : vector<8x128xbf16>, vector<128x512xbf16>, vector<8x512xf32> -> vector<8x512xf32>
    %128 = arith.addf %125, %127 : vector<8x512xf32>
    %129 = vector.extract_strided_slice %128 {offsets = [0, 0], sizes = [8, 128], strides = [1, 1]} : vector<8x512xf32> to vector<8x128xf32>
    %130 = arith.negf %129 : vector<8x128xf32>
    %131 = math.exp %130 : vector<8x128xf32>
    %cst_26 = arith.constant 1.000000e+00 : f32
    %132 = vector.broadcast %cst_26 : f32 to vector<8x128xf32>
    %133 = arith.addf %132, %131 : vector<8x128xf32>
    %134 = arith.divf %132, %133 : vector<8x128xf32>
    %135 = vector.extract_strided_slice %128 {offsets = [0, 128], sizes = [8, 128], strides = [1, 1]} : vector<8x512xf32> to vector<8x128xf32>
    %136 = arith.negf %135 : vector<8x128xf32>
    %137 = math.exp %136 : vector<8x128xf32>
    %cst_27 = arith.constant 1.000000e+00 : f32
    %138 = vector.broadcast %cst_27 : f32 to vector<8x128xf32>
    %139 = arith.addf %138, %137 : vector<8x128xf32>
    %140 = arith.divf %138, %139 : vector<8x128xf32>
    %141 = vector.extract_strided_slice %128 {offsets = [0, 256], sizes = [8, 128], strides = [1, 1]} : vector<8x512xf32> to vector<8x128xf32>
    %142 = math.tanh %141 : vector<8x128xf32>
    %143 = vector.extract_strided_slice %128 {offsets = [0, 384], sizes = [8, 128], strides = [1, 1]} : vector<8x512xf32> to vector<8x128xf32>
    %144 = arith.negf %143 : vector<8x128xf32>
    %145 = math.exp %144 : vector<8x128xf32>
    %cst_28 = arith.constant 1.000000e+00 : f32
    %146 = vector.broadcast %cst_28 : f32 to vector<8x128xf32>
    %147 = arith.addf %146, %145 : vector<8x128xf32>
    %148 = arith.divf %146, %147 : vector<8x128xf32>
    %149 = arith.mulf %140, %122 : vector<8x128xf32>
    %150 = arith.mulf %134, %142 : vector<8x128xf32>
    %151 = arith.addf %149, %150 : vector<8x128xf32>
    %152 = math.tanh %151 : vector<8x128xf32>
    %153 = arith.mulf %148, %152 : vector<8x128xf32>
    %154 = vector.extract_strided_slice %5 {offsets = [40, 0], sizes = [8, 512], strides = [1, 1]} : vector<64x512xf32> to vector<8x512xf32>
    %155 = arith.truncf %153 : vector<8x128xf32> to vector<8x128xbf16>
    %cst_29 = arith.constant dense<0.000000e+00> : vector<8x512xf32>
    %156 = tpu.matmul %155, %6, %cst_29 {dimension_numbers = #tpu.dot_dimension_numbers<[1], [0], [0], [1], [0, 0, 1, 1], [], []>} : vector<8x128xbf16>, vector<128x512xbf16>, vector<8x512xf32> -> vector<8x512xf32>
    %157 = arith.addf %154, %156 : vector<8x512xf32>
    %158 = vector.extract_strided_slice %157 {offsets = [0, 0], sizes = [8, 128], strides = [1, 1]} : vector<8x512xf32> to vector<8x128xf32>
    %159 = arith.negf %158 : vector<8x128xf32>
    %160 = math.exp %159 : vector<8x128xf32>
    %cst_30 = arith.constant 1.000000e+00 : f32
    %161 = vector.broadcast %cst_30 : f32 to vector<8x128xf32>
    %162 = arith.addf %161, %160 : vector<8x128xf32>
    %163 = arith.divf %161, %162 : vector<8x128xf32>
    %164 = vector.extract_strided_slice %157 {offsets = [0, 128], sizes = [8, 128], strides = [1, 1]} : vector<8x512xf32> to vector<8x128xf32>
    %165 = arith.negf %164 : vector<8x128xf32>
    %166 = math.exp %165 : vector<8x128xf32>
    %cst_31 = arith.constant 1.000000e+00 : f32
    %167 = vector.broadcast %cst_31 : f32 to vector<8x128xf32>
    %168 = arith.addf %167, %166 : vector<8x128xf32>
    %169 = arith.divf %167, %168 : vector<8x128xf32>
    %170 = vector.extract_strided_slice %157 {offsets = [0, 256], sizes = [8, 128], strides = [1, 1]} : vector<8x512xf32> to vector<8x128xf32>
    %171 = math.tanh %170 : vector<8x128xf32>
    %172 = vector.extract_strided_slice %157 {offsets = [0, 384], sizes = [8, 128], strides = [1, 1]} : vector<8x512xf32> to vector<8x128xf32>
    %173 = arith.negf %172 : vector<8x128xf32>
    %174 = math.exp %173 : vector<8x128xf32>
    %cst_32 = arith.constant 1.000000e+00 : f32
    %175 = vector.broadcast %cst_32 : f32 to vector<8x128xf32>
    %176 = arith.addf %175, %174 : vector<8x128xf32>
    %177 = arith.divf %175, %176 : vector<8x128xf32>
    %178 = arith.mulf %169, %151 : vector<8x128xf32>
    %179 = arith.mulf %163, %171 : vector<8x128xf32>
    %180 = arith.addf %178, %179 : vector<8x128xf32>
    %181 = math.tanh %180 : vector<8x128xf32>
    %182 = arith.mulf %177, %181 : vector<8x128xf32>
    %183 = vector.extract_strided_slice %5 {offsets = [48, 0], sizes = [8, 512], strides = [1, 1]} : vector<64x512xf32> to vector<8x512xf32>
    %184 = arith.truncf %182 : vector<8x128xf32> to vector<8x128xbf16>
    %cst_33 = arith.constant dense<0.000000e+00> : vector<8x512xf32>
    %185 = tpu.matmul %184, %6, %cst_33 {dimension_numbers = #tpu.dot_dimension_numbers<[1], [0], [0], [1], [0, 0, 1, 1], [], []>} : vector<8x128xbf16>, vector<128x512xbf16>, vector<8x512xf32> -> vector<8x512xf32>
    %186 = arith.addf %183, %185 : vector<8x512xf32>
    %187 = vector.extract_strided_slice %186 {offsets = [0, 0], sizes = [8, 128], strides = [1, 1]} : vector<8x512xf32> to vector<8x128xf32>
    %188 = arith.negf %187 : vector<8x128xf32>
    %189 = math.exp %188 : vector<8x128xf32>
    %cst_34 = arith.constant 1.000000e+00 : f32
    %190 = vector.broadcast %cst_34 : f32 to vector<8x128xf32>
    %191 = arith.addf %190, %189 : vector<8x128xf32>
    %192 = arith.divf %190, %191 : vector<8x128xf32>
    %193 = vector.extract_strided_slice %186 {offsets = [0, 128], sizes = [8, 128], strides = [1, 1]} : vector<8x512xf32> to vector<8x128xf32>
    %194 = arith.negf %193 : vector<8x128xf32>
    %195 = math.exp %194 : vector<8x128xf32>
    %cst_35 = arith.constant 1.000000e+00 : f32
    %196 = vector.broadcast %cst_35 : f32 to vector<8x128xf32>
    %197 = arith.addf %196, %195 : vector<8x128xf32>
    %198 = arith.divf %196, %197 : vector<8x128xf32>
    %199 = vector.extract_strided_slice %186 {offsets = [0, 256], sizes = [8, 128], strides = [1, 1]} : vector<8x512xf32> to vector<8x128xf32>
    %200 = math.tanh %199 : vector<8x128xf32>
    %201 = vector.extract_strided_slice %186 {offsets = [0, 384], sizes = [8, 128], strides = [1, 1]} : vector<8x512xf32> to vector<8x128xf32>
    %202 = arith.negf %201 : vector<8x128xf32>
    %203 = math.exp %202 : vector<8x128xf32>
    %cst_36 = arith.constant 1.000000e+00 : f32
    %204 = vector.broadcast %cst_36 : f32 to vector<8x128xf32>
    %205 = arith.addf %204, %203 : vector<8x128xf32>
    %206 = arith.divf %204, %205 : vector<8x128xf32>
    %207 = arith.mulf %198, %180 : vector<8x128xf32>
    %208 = arith.mulf %192, %200 : vector<8x128xf32>
    %209 = arith.addf %207, %208 : vector<8x128xf32>
    %210 = math.tanh %209 : vector<8x128xf32>
    %211 = arith.mulf %206, %210 : vector<8x128xf32>
    %212 = vector.extract_strided_slice %5 {offsets = [56, 0], sizes = [8, 512], strides = [1, 1]} : vector<64x512xf32> to vector<8x512xf32>
    %213 = arith.truncf %211 : vector<8x128xf32> to vector<8x128xbf16>
    %cst_37 = arith.constant dense<0.000000e+00> : vector<8x512xf32>
    %214 = tpu.matmul %213, %6, %cst_37 {dimension_numbers = #tpu.dot_dimension_numbers<[1], [0], [0], [1], [0, 0, 1, 1], [], []>} : vector<8x128xbf16>, vector<128x512xbf16>, vector<8x512xf32> -> vector<8x512xf32>
    %215 = arith.addf %212, %214 : vector<8x512xf32>
    %216 = vector.extract_strided_slice %215 {offsets = [0, 0], sizes = [8, 128], strides = [1, 1]} : vector<8x512xf32> to vector<8x128xf32>
    %217 = arith.negf %216 : vector<8x128xf32>
    %218 = math.exp %217 : vector<8x128xf32>
    %cst_38 = arith.constant 1.000000e+00 : f32
    %219 = vector.broadcast %cst_38 : f32 to vector<8x128xf32>
    %220 = arith.addf %219, %218 : vector<8x128xf32>
    %221 = arith.divf %219, %220 : vector<8x128xf32>
    %222 = vector.extract_strided_slice %215 {offsets = [0, 128], sizes = [8, 128], strides = [1, 1]} : vector<8x512xf32> to vector<8x128xf32>
    %223 = arith.negf %222 : vector<8x128xf32>
    %224 = math.exp %223 : vector<8x128xf32>
    %cst_39 = arith.constant 1.000000e+00 : f32
    %225 = vector.broadcast %cst_39 : f32 to vector<8x128xf32>
    %226 = arith.addf %225, %224 : vector<8x128xf32>
    %227 = arith.divf %225, %226 : vector<8x128xf32>
    %228 = vector.extract_strided_slice %215 {offsets = [0, 256], sizes = [8, 128], strides = [1, 1]} : vector<8x512xf32> to vector<8x128xf32>
    %229 = math.tanh %228 : vector<8x128xf32>
    %230 = vector.extract_strided_slice %215 {offsets = [0, 384], sizes = [8, 128], strides = [1, 1]} : vector<8x512xf32> to vector<8x128xf32>
    %231 = arith.negf %230 : vector<8x128xf32>
    %232 = math.exp %231 : vector<8x128xf32>
    %cst_40 = arith.constant 1.000000e+00 : f32
    %233 = vector.broadcast %cst_40 : f32 to vector<8x128xf32>
    %234 = arith.addf %233, %232 : vector<8x128xf32>
    %235 = arith.divf %233, %234 : vector<8x128xf32>
    %236 = arith.mulf %227, %209 : vector<8x128xf32>
    %237 = arith.mulf %221, %229 : vector<8x128xf32>
    %238 = arith.addf %236, %237 : vector<8x128xf32>
    %239 = math.tanh %238 : vector<8x128xf32>
    %240 = arith.mulf %235, %239 : vector<8x128xf32>
    %241 = tpu.concatenate %37, %66, %95, %124, %153, %182, %211, %240 in 0 : vector<8x128xf32>, vector<8x128xf32>, vector<8x128xf32>, vector<8x128xf32>, vector<8x128xf32>, vector<8x128xf32>, vector<8x128xf32>, vector<8x128xf32> -> vector<64x128xf32>
    %242 = arith.truncf %241 : vector<64x128xf32> to vector<64x128xbf16>
    %c0_41 = arith.constant 0 : index
    %c0_42 = arith.constant 0 : index
    %243 = vector.load %arg4[%c0_41, %c0_42] : memref<128x512xbf16, #tpu.memory_space<vmem>>, vector<128x512xbf16>
    %cst_43 = arith.constant dense<0.000000e+00> : vector<64x512xf32>
    %244 = tpu.matmul %242, %243, %cst_43 {dimension_numbers = #tpu.dot_dimension_numbers<[1], [0], [0], [1], [0, 0, 1, 1], [], []>} : vector<64x128xbf16>, vector<128x512xbf16>, vector<64x512xf32> -> vector<64x512xf32>
    %c0_44 = arith.constant 0 : index
    %c0_45 = arith.constant 0 : index
    %245 = vector.load %arg6[%c0_44, %c0_45] : memref<1x512xf32, #tpu.memory_space<vmem>>, vector<1x512xf32>
    %246 = vector.broadcast %245 : vector<1x512xf32> to vector<64x512xf32>
    %247 = arith.addf %244, %246 : vector<64x512xf32>
    %c0_46 = arith.constant 0 : index
    %c0_47 = arith.constant 0 : index
    %248 = vector.load %arg5[%c0_46, %c0_47] : memref<128x512xbf16, #tpu.memory_space<vmem>>, vector<128x512xbf16>
    %cst_48 = arith.constant 0.000000e+00 : f32
    %249 = vector.broadcast %cst_48 : f32 to vector<8x128xf32>
    %cst_49 = arith.constant 0.000000e+00 : f32
    %250 = vector.broadcast %cst_49 : f32 to vector<8x128xf32>
    %251 = vector.extract_strided_slice %247 {offsets = [0, 0], sizes = [8, 512], strides = [1, 1]} : vector<64x512xf32> to vector<8x512xf32>
    %252 = arith.truncf %249 : vector<8x128xf32> to vector<8x128xbf16>
    %cst_50 = arith.constant dense<0.000000e+00> : vector<8x512xf32>
    %253 = tpu.matmul %252, %248, %cst_50 {dimension_numbers = #tpu.dot_dimension_numbers<[1], [0], [0], [1], [0, 0, 1, 1], [], []>} : vector<8x128xbf16>, vector<128x512xbf16>, vector<8x512xf32> -> vector<8x512xf32>
    %254 = arith.addf %251, %253 : vector<8x512xf32>
    %255 = vector.extract_strided_slice %254 {offsets = [0, 0], sizes = [8, 128], strides = [1, 1]} : vector<8x512xf32> to vector<8x128xf32>
    %256 = arith.negf %255 : vector<8x128xf32>
    %257 = math.exp %256 : vector<8x128xf32>
    %cst_51 = arith.constant 1.000000e+00 : f32
    %258 = vector.broadcast %cst_51 : f32 to vector<8x128xf32>
    %259 = arith.addf %258, %257 : vector<8x128xf32>
    %260 = arith.divf %258, %259 : vector<8x128xf32>
    %261 = vector.extract_strided_slice %254 {offsets = [0, 128], sizes = [8, 128], strides = [1, 1]} : vector<8x512xf32> to vector<8x128xf32>
    %262 = arith.negf %261 : vector<8x128xf32>
    %263 = math.exp %262 : vector<8x128xf32>
    %cst_52 = arith.constant 1.000000e+00 : f32
    %264 = vector.broadcast %cst_52 : f32 to vector<8x128xf32>
    %265 = arith.addf %264, %263 : vector<8x128xf32>
    %266 = arith.divf %264, %265 : vector<8x128xf32>
    %267 = vector.extract_strided_slice %254 {offsets = [0, 256], sizes = [8, 128], strides = [1, 1]} : vector<8x512xf32> to vector<8x128xf32>
    %268 = math.tanh %267 : vector<8x128xf32>
    %269 = vector.extract_strided_slice %254 {offsets = [0, 384], sizes = [8, 128], strides = [1, 1]} : vector<8x512xf32> to vector<8x128xf32>
    %270 = arith.negf %269 : vector<8x128xf32>
    %271 = math.exp %270 : vector<8x128xf32>
    %cst_53 = arith.constant 1.000000e+00 : f32
    %272 = vector.broadcast %cst_53 : f32 to vector<8x128xf32>
    %273 = arith.addf %272, %271 : vector<8x128xf32>
    %274 = arith.divf %272, %273 : vector<8x128xf32>
    %275 = arith.mulf %266, %250 : vector<8x128xf32>
    %276 = arith.mulf %260, %268 : vector<8x128xf32>
    %277 = arith.addf %275, %276 : vector<8x128xf32>
    %278 = math.tanh %277 : vector<8x128xf32>
    %279 = arith.mulf %274, %278 : vector<8x128xf32>
    %280 = vector.extract_strided_slice %247 {offsets = [8, 0], sizes = [8, 512], strides = [1, 1]} : vector<64x512xf32> to vector<8x512xf32>
    %281 = arith.truncf %279 : vector<8x128xf32> to vector<8x128xbf16>
    %cst_54 = arith.constant dense<0.000000e+00> : vector<8x512xf32>
    %282 = tpu.matmul %281, %248, %cst_54 {dimension_numbers = #tpu.dot_dimension_numbers<[1], [0], [0], [1], [0, 0, 1, 1], [], []>} : vector<8x128xbf16>, vector<128x512xbf16>, vector<8x512xf32> -> vector<8x512xf32>
    %283 = arith.addf %280, %282 : vector<8x512xf32>
    %284 = vector.extract_strided_slice %283 {offsets = [0, 0], sizes = [8, 128], strides = [1, 1]} : vector<8x512xf32> to vector<8x128xf32>
    %285 = arith.negf %284 : vector<8x128xf32>
    %286 = math.exp %285 : vector<8x128xf32>
    %cst_55 = arith.constant 1.000000e+00 : f32
    %287 = vector.broadcast %cst_55 : f32 to vector<8x128xf32>
    %288 = arith.addf %287, %286 : vector<8x128xf32>
    %289 = arith.divf %287, %288 : vector<8x128xf32>
    %290 = vector.extract_strided_slice %283 {offsets = [0, 128], sizes = [8, 128], strides = [1, 1]} : vector<8x512xf32> to vector<8x128xf32>
    %291 = arith.negf %290 : vector<8x128xf32>
    %292 = math.exp %291 : vector<8x128xf32>
    %cst_56 = arith.constant 1.000000e+00 : f32
    %293 = vector.broadcast %cst_56 : f32 to vector<8x128xf32>
    %294 = arith.addf %293, %292 : vector<8x128xf32>
    %295 = arith.divf %293, %294 : vector<8x128xf32>
    %296 = vector.extract_strided_slice %283 {offsets = [0, 256], sizes = [8, 128], strides = [1, 1]} : vector<8x512xf32> to vector<8x128xf32>
    %297 = math.tanh %296 : vector<8x128xf32>
    %298 = vector.extract_strided_slice %283 {offsets = [0, 384], sizes = [8, 128], strides = [1, 1]} : vector<8x512xf32> to vector<8x128xf32>
    %299 = arith.negf %298 : vector<8x128xf32>
    %300 = math.exp %299 : vector<8x128xf32>
    %cst_57 = arith.constant 1.000000e+00 : f32
    %301 = vector.broadcast %cst_57 : f32 to vector<8x128xf32>
    %302 = arith.addf %301, %300 : vector<8x128xf32>
    %303 = arith.divf %301, %302 : vector<8x128xf32>
    %304 = arith.mulf %295, %277 : vector<8x128xf32>
    %305 = arith.mulf %289, %297 : vector<8x128xf32>
    %306 = arith.addf %304, %305 : vector<8x128xf32>
    %307 = math.tanh %306 : vector<8x128xf32>
    %308 = arith.mulf %303, %307 : vector<8x128xf32>
    %309 = vector.extract_strided_slice %247 {offsets = [16, 0], sizes = [8, 512], strides = [1, 1]} : vector<64x512xf32> to vector<8x512xf32>
    %310 = arith.truncf %308 : vector<8x128xf32> to vector<8x128xbf16>
    %cst_58 = arith.constant dense<0.000000e+00> : vector<8x512xf32>
    %311 = tpu.matmul %310, %248, %cst_58 {dimension_numbers = #tpu.dot_dimension_numbers<[1], [0], [0], [1], [0, 0, 1, 1], [], []>} : vector<8x128xbf16>, vector<128x512xbf16>, vector<8x512xf32> -> vector<8x512xf32>
    %312 = arith.addf %309, %311 : vector<8x512xf32>
    %313 = vector.extract_strided_slice %312 {offsets = [0, 0], sizes = [8, 128], strides = [1, 1]} : vector<8x512xf32> to vector<8x128xf32>
    %314 = arith.negf %313 : vector<8x128xf32>
    %315 = math.exp %314 : vector<8x128xf32>
    %cst_59 = arith.constant 1.000000e+00 : f32
    %316 = vector.broadcast %cst_59 : f32 to vector<8x128xf32>
    %317 = arith.addf %316, %315 : vector<8x128xf32>
    %318 = arith.divf %316, %317 : vector<8x128xf32>
    %319 = vector.extract_strided_slice %312 {offsets = [0, 128], sizes = [8, 128], strides = [1, 1]} : vector<8x512xf32> to vector<8x128xf32>
    %320 = arith.negf %319 : vector<8x128xf32>
    %321 = math.exp %320 : vector<8x128xf32>
    %cst_60 = arith.constant 1.000000e+00 : f32
    %322 = vector.broadcast %cst_60 : f32 to vector<8x128xf32>
    %323 = arith.addf %322, %321 : vector<8x128xf32>
    %324 = arith.divf %322, %323 : vector<8x128xf32>
    %325 = vector.extract_strided_slice %312 {offsets = [0, 256], sizes = [8, 128], strides = [1, 1]} : vector<8x512xf32> to vector<8x128xf32>
    %326 = math.tanh %325 : vector<8x128xf32>
    %327 = vector.extract_strided_slice %312 {offsets = [0, 384], sizes = [8, 128], strides = [1, 1]} : vector<8x512xf32> to vector<8x128xf32>
    %328 = arith.negf %327 : vector<8x128xf32>
    %329 = math.exp %328 : vector<8x128xf32>
    %cst_61 = arith.constant 1.000000e+00 : f32
    %330 = vector.broadcast %cst_61 : f32 to vector<8x128xf32>
    %331 = arith.addf %330, %329 : vector<8x128xf32>
    %332 = arith.divf %330, %331 : vector<8x128xf32>
    %333 = arith.mulf %324, %306 : vector<8x128xf32>
    %334 = arith.mulf %318, %326 : vector<8x128xf32>
    %335 = arith.addf %333, %334 : vector<8x128xf32>
    %336 = math.tanh %335 : vector<8x128xf32>
    %337 = arith.mulf %332, %336 : vector<8x128xf32>
    %338 = vector.extract_strided_slice %247 {offsets = [24, 0], sizes = [8, 512], strides = [1, 1]} : vector<64x512xf32> to vector<8x512xf32>
    %339 = arith.truncf %337 : vector<8x128xf32> to vector<8x128xbf16>
    %cst_62 = arith.constant dense<0.000000e+00> : vector<8x512xf32>
    %340 = tpu.matmul %339, %248, %cst_62 {dimension_numbers = #tpu.dot_dimension_numbers<[1], [0], [0], [1], [0, 0, 1, 1], [], []>} : vector<8x128xbf16>, vector<128x512xbf16>, vector<8x512xf32> -> vector<8x512xf32>
    %341 = arith.addf %338, %340 : vector<8x512xf32>
    %342 = vector.extract_strided_slice %341 {offsets = [0, 0], sizes = [8, 128], strides = [1, 1]} : vector<8x512xf32> to vector<8x128xf32>
    %343 = arith.negf %342 : vector<8x128xf32>
    %344 = math.exp %343 : vector<8x128xf32>
    %cst_63 = arith.constant 1.000000e+00 : f32
    %345 = vector.broadcast %cst_63 : f32 to vector<8x128xf32>
    %346 = arith.addf %345, %344 : vector<8x128xf32>
    %347 = arith.divf %345, %346 : vector<8x128xf32>
    %348 = vector.extract_strided_slice %341 {offsets = [0, 128], sizes = [8, 128], strides = [1, 1]} : vector<8x512xf32> to vector<8x128xf32>
    %349 = arith.negf %348 : vector<8x128xf32>
    %350 = math.exp %349 : vector<8x128xf32>
    %cst_64 = arith.constant 1.000000e+00 : f32
    %351 = vector.broadcast %cst_64 : f32 to vector<8x128xf32>
    %352 = arith.addf %351, %350 : vector<8x128xf32>
    %353 = arith.divf %351, %352 : vector<8x128xf32>
    %354 = vector.extract_strided_slice %341 {offsets = [0, 256], sizes = [8, 128], strides = [1, 1]} : vector<8x512xf32> to vector<8x128xf32>
    %355 = math.tanh %354 : vector<8x128xf32>
    %356 = vector.extract_strided_slice %341 {offsets = [0, 384], sizes = [8, 128], strides = [1, 1]} : vector<8x512xf32> to vector<8x128xf32>
    %357 = arith.negf %356 : vector<8x128xf32>
    %358 = math.exp %357 : vector<8x128xf32>
    %cst_65 = arith.constant 1.000000e+00 : f32
    %359 = vector.broadcast %cst_65 : f32 to vector<8x128xf32>
    %360 = arith.addf %359, %358 : vector<8x128xf32>
    %361 = arith.divf %359, %360 : vector<8x128xf32>
    %362 = arith.mulf %353, %335 : vector<8x128xf32>
    %363 = arith.mulf %347, %355 : vector<8x128xf32>
    %364 = arith.addf %362, %363 : vector<8x128xf32>
    %365 = math.tanh %364 : vector<8x128xf32>
    %366 = arith.mulf %361, %365 : vector<8x128xf32>
    %367 = vector.extract_strided_slice %247 {offsets = [32, 0], sizes = [8, 512], strides = [1, 1]} : vector<64x512xf32> to vector<8x512xf32>
    %368 = arith.truncf %366 : vector<8x128xf32> to vector<8x128xbf16>
    %cst_66 = arith.constant dense<0.000000e+00> : vector<8x512xf32>
    %369 = tpu.matmul %368, %248, %cst_66 {dimension_numbers = #tpu.dot_dimension_numbers<[1], [0], [0], [1], [0, 0, 1, 1], [], []>} : vector<8x128xbf16>, vector<128x512xbf16>, vector<8x512xf32> -> vector<8x512xf32>
    %370 = arith.addf %367, %369 : vector<8x512xf32>
    %371 = vector.extract_strided_slice %370 {offsets = [0, 0], sizes = [8, 128], strides = [1, 1]} : vector<8x512xf32> to vector<8x128xf32>
    %372 = arith.negf %371 : vector<8x128xf32>
    %373 = math.exp %372 : vector<8x128xf32>
    %cst_67 = arith.constant 1.000000e+00 : f32
    %374 = vector.broadcast %cst_67 : f32 to vector<8x128xf32>
    %375 = arith.addf %374, %373 : vector<8x128xf32>
    %376 = arith.divf %374, %375 : vector<8x128xf32>
    %377 = vector.extract_strided_slice %370 {offsets = [0, 128], sizes = [8, 128], strides = [1, 1]} : vector<8x512xf32> to vector<8x128xf32>
    %378 = arith.negf %377 : vector<8x128xf32>
    %379 = math.exp %378 : vector<8x128xf32>
    %cst_68 = arith.constant 1.000000e+00 : f32
    %380 = vector.broadcast %cst_68 : f32 to vector<8x128xf32>
    %381 = arith.addf %380, %379 : vector<8x128xf32>
    %382 = arith.divf %380, %381 : vector<8x128xf32>
    %383 = vector.extract_strided_slice %370 {offsets = [0, 256], sizes = [8, 128], strides = [1, 1]} : vector<8x512xf32> to vector<8x128xf32>
    %384 = math.tanh %383 : vector<8x128xf32>
    %385 = vector.extract_strided_slice %370 {offsets = [0, 384], sizes = [8, 128], strides = [1, 1]} : vector<8x512xf32> to vector<8x128xf32>
    %386 = arith.negf %385 : vector<8x128xf32>
    %387 = math.exp %386 : vector<8x128xf32>
    %cst_69 = arith.constant 1.000000e+00 : f32
    %388 = vector.broadcast %cst_69 : f32 to vector<8x128xf32>
    %389 = arith.addf %388, %387 : vector<8x128xf32>
    %390 = arith.divf %388, %389 : vector<8x128xf32>
    %391 = arith.mulf %382, %364 : vector<8x128xf32>
    %392 = arith.mulf %376, %384 : vector<8x128xf32>
    %393 = arith.addf %391, %392 : vector<8x128xf32>
    %394 = math.tanh %393 : vector<8x128xf32>
    %395 = arith.mulf %390, %394 : vector<8x128xf32>
    %396 = vector.extract_strided_slice %247 {offsets = [40, 0], sizes = [8, 512], strides = [1, 1]} : vector<64x512xf32> to vector<8x512xf32>
    %397 = arith.truncf %395 : vector<8x128xf32> to vector<8x128xbf16>
    %cst_70 = arith.constant dense<0.000000e+00> : vector<8x512xf32>
    %398 = tpu.matmul %397, %248, %cst_70 {dimension_numbers = #tpu.dot_dimension_numbers<[1], [0], [0], [1], [0, 0, 1, 1], [], []>} : vector<8x128xbf16>, vector<128x512xbf16>, vector<8x512xf32> -> vector<8x512xf32>
    %399 = arith.addf %396, %398 : vector<8x512xf32>
    %400 = vector.extract_strided_slice %399 {offsets = [0, 0], sizes = [8, 128], strides = [1, 1]} : vector<8x512xf32> to vector<8x128xf32>
    %401 = arith.negf %400 : vector<8x128xf32>
    %402 = math.exp %401 : vector<8x128xf32>
    %cst_71 = arith.constant 1.000000e+00 : f32
    %403 = vector.broadcast %cst_71 : f32 to vector<8x128xf32>
    %404 = arith.addf %403, %402 : vector<8x128xf32>
    %405 = arith.divf %403, %404 : vector<8x128xf32>
    %406 = vector.extract_strided_slice %399 {offsets = [0, 128], sizes = [8, 128], strides = [1, 1]} : vector<8x512xf32> to vector<8x128xf32>
    %407 = arith.negf %406 : vector<8x128xf32>
    %408 = math.exp %407 : vector<8x128xf32>
    %cst_72 = arith.constant 1.000000e+00 : f32
    %409 = vector.broadcast %cst_72 : f32 to vector<8x128xf32>
    %410 = arith.addf %409, %408 : vector<8x128xf32>
    %411 = arith.divf %409, %410 : vector<8x128xf32>
    %412 = vector.extract_strided_slice %399 {offsets = [0, 256], sizes = [8, 128], strides = [1, 1]} : vector<8x512xf32> to vector<8x128xf32>
    %413 = math.tanh %412 : vector<8x128xf32>
    %414 = vector.extract_strided_slice %399 {offsets = [0, 384], sizes = [8, 128], strides = [1, 1]} : vector<8x512xf32> to vector<8x128xf32>
    %415 = arith.negf %414 : vector<8x128xf32>
    %416 = math.exp %415 : vector<8x128xf32>
    %cst_73 = arith.constant 1.000000e+00 : f32
    %417 = vector.broadcast %cst_73 : f32 to vector<8x128xf32>
    %418 = arith.addf %417, %416 : vector<8x128xf32>
    %419 = arith.divf %417, %418 : vector<8x128xf32>
    %420 = arith.mulf %411, %393 : vector<8x128xf32>
    %421 = arith.mulf %405, %413 : vector<8x128xf32>
    %422 = arith.addf %420, %421 : vector<8x128xf32>
    %423 = math.tanh %422 : vector<8x128xf32>
    %424 = arith.mulf %419, %423 : vector<8x128xf32>
    %425 = vector.extract_strided_slice %247 {offsets = [48, 0], sizes = [8, 512], strides = [1, 1]} : vector<64x512xf32> to vector<8x512xf32>
    %426 = arith.truncf %424 : vector<8x128xf32> to vector<8x128xbf16>
    %cst_74 = arith.constant dense<0.000000e+00> : vector<8x512xf32>
    %427 = tpu.matmul %426, %248, %cst_74 {dimension_numbers = #tpu.dot_dimension_numbers<[1], [0], [0], [1], [0, 0, 1, 1], [], []>} : vector<8x128xbf16>, vector<128x512xbf16>, vector<8x512xf32> -> vector<8x512xf32>
    %428 = arith.addf %425, %427 : vector<8x512xf32>
    %429 = vector.extract_strided_slice %428 {offsets = [0, 0], sizes = [8, 128], strides = [1, 1]} : vector<8x512xf32> to vector<8x128xf32>
    %430 = arith.negf %429 : vector<8x128xf32>
    %431 = math.exp %430 : vector<8x128xf32>
    %cst_75 = arith.constant 1.000000e+00 : f32
    %432 = vector.broadcast %cst_75 : f32 to vector<8x128xf32>
    %433 = arith.addf %432, %431 : vector<8x128xf32>
    %434 = arith.divf %432, %433 : vector<8x128xf32>
    %435 = vector.extract_strided_slice %428 {offsets = [0, 128], sizes = [8, 128], strides = [1, 1]} : vector<8x512xf32> to vector<8x128xf32>
    %436 = arith.negf %435 : vector<8x128xf32>
    %437 = math.exp %436 : vector<8x128xf32>
    %cst_76 = arith.constant 1.000000e+00 : f32
    %438 = vector.broadcast %cst_76 : f32 to vector<8x128xf32>
    %439 = arith.addf %438, %437 : vector<8x128xf32>
    %440 = arith.divf %438, %439 : vector<8x128xf32>
    %441 = vector.extract_strided_slice %428 {offsets = [0, 256], sizes = [8, 128], strides = [1, 1]} : vector<8x512xf32> to vector<8x128xf32>
    %442 = math.tanh %441 : vector<8x128xf32>
    %443 = vector.extract_strided_slice %428 {offsets = [0, 384], sizes = [8, 128], strides = [1, 1]} : vector<8x512xf32> to vector<8x128xf32>
    %444 = arith.negf %443 : vector<8x128xf32>
    %445 = math.exp %444 : vector<8x128xf32>
    %cst_77 = arith.constant 1.000000e+00 : f32
    %446 = vector.broadcast %cst_77 : f32 to vector<8x128xf32>
    %447 = arith.addf %446, %445 : vector<8x128xf32>
    %448 = arith.divf %446, %447 : vector<8x128xf32>
    %449 = arith.mulf %440, %422 : vector<8x128xf32>
    %450 = arith.mulf %434, %442 : vector<8x128xf32>
    %451 = arith.addf %449, %450 : vector<8x128xf32>
    %452 = math.tanh %451 : vector<8x128xf32>
    %453 = arith.mulf %448, %452 : vector<8x128xf32>
    %454 = vector.extract_strided_slice %247 {offsets = [56, 0], sizes = [8, 512], strides = [1, 1]} : vector<64x512xf32> to vector<8x512xf32>
    %455 = arith.truncf %453 : vector<8x128xf32> to vector<8x128xbf16>
    %cst_78 = arith.constant dense<0.000000e+00> : vector<8x512xf32>
    %456 = tpu.matmul %455, %248, %cst_78 {dimension_numbers = #tpu.dot_dimension_numbers<[1], [0], [0], [1], [0, 0, 1, 1], [], []>} : vector<8x128xbf16>, vector<128x512xbf16>, vector<8x512xf32> -> vector<8x512xf32>
    %457 = arith.addf %454, %456 : vector<8x512xf32>
    %458 = vector.extract_strided_slice %457 {offsets = [0, 0], sizes = [8, 128], strides = [1, 1]} : vector<8x512xf32> to vector<8x128xf32>
    %459 = arith.negf %458 : vector<8x128xf32>
    %460 = math.exp %459 : vector<8x128xf32>
    %cst_79 = arith.constant 1.000000e+00 : f32
    %461 = vector.broadcast %cst_79 : f32 to vector<8x128xf32>
    %462 = arith.addf %461, %460 : vector<8x128xf32>
    %463 = arith.divf %461, %462 : vector<8x128xf32>
    %464 = vector.extract_strided_slice %457 {offsets = [0, 128], sizes = [8, 128], strides = [1, 1]} : vector<8x512xf32> to vector<8x128xf32>
    %465 = arith.negf %464 : vector<8x128xf32>
    %466 = math.exp %465 : vector<8x128xf32>
    %cst_80 = arith.constant 1.000000e+00 : f32
    %467 = vector.broadcast %cst_80 : f32 to vector<8x128xf32>
    %468 = arith.addf %467, %466 : vector<8x128xf32>
    %469 = arith.divf %467, %468 : vector<8x128xf32>
    %470 = vector.extract_strided_slice %457 {offsets = [0, 256], sizes = [8, 128], strides = [1, 1]} : vector<8x512xf32> to vector<8x128xf32>
    %471 = math.tanh %470 : vector<8x128xf32>
    %472 = vector.extract_strided_slice %457 {offsets = [0, 384], sizes = [8, 128], strides = [1, 1]} : vector<8x512xf32> to vector<8x128xf32>
    %473 = arith.negf %472 : vector<8x128xf32>
    %474 = math.exp %473 : vector<8x128xf32>
    %cst_81 = arith.constant 1.000000e+00 : f32
    %475 = vector.broadcast %cst_81 : f32 to vector<8x128xf32>
    %476 = arith.addf %475, %474 : vector<8x128xf32>
    %477 = arith.divf %475, %476 : vector<8x128xf32>
    %478 = arith.mulf %469, %451 : vector<8x128xf32>
    %479 = arith.mulf %463, %471 : vector<8x128xf32>
    %480 = arith.addf %478, %479 : vector<8x128xf32>
    %481 = math.tanh %480 : vector<8x128xf32>
    %482 = arith.mulf %477, %481 : vector<8x128xf32>
    %483 = tpu.concatenate %279, %308, %337, %366, %395, %424, %453, %482 in 0 : vector<8x128xf32>, vector<8x128xf32>, vector<8x128xf32>, vector<8x128xf32>, vector<8x128xf32>, vector<8x128xf32>, vector<8x128xf32>, vector<8x128xf32> -> vector<64x128xf32>
    %484 = arith.truncf %483 : vector<64x128xf32> to vector<64x128xbf16>
    %c0_82 = arith.constant 0 : index
    %c0_83 = arith.constant 0 : index
    %485 = vector.load %arg7[%c0_82, %c0_83] : memref<128x512xbf16, #tpu.memory_space<vmem>>, vector<128x512xbf16>
    %cst_84 = arith.constant dense<0.000000e+00> : vector<64x512xf32>
    %486 = tpu.matmul %484, %485, %cst_84 {dimension_numbers = #tpu.dot_dimension_numbers<[1], [0], [0], [1], [0, 0, 1, 1], [], []>} : vector<64x128xbf16>, vector<128x512xbf16>, vector<64x512xf32> -> vector<64x512xf32>
    %c0_85 = arith.constant 0 : index
    %c0_86 = arith.constant 0 : index
    %487 = vector.load %arg9[%c0_85, %c0_86] : memref<1x512xf32, #tpu.memory_space<vmem>>, vector<1x512xf32>
    %488 = vector.broadcast %487 : vector<1x512xf32> to vector<64x512xf32>
    %489 = arith.addf %486, %488 : vector<64x512xf32>
    %c0_87 = arith.constant 0 : index
    %c0_88 = arith.constant 0 : index
    %490 = vector.load %arg8[%c0_87, %c0_88] : memref<128x512xbf16, #tpu.memory_space<vmem>>, vector<128x512xbf16>
    %cst_89 = arith.constant 0.000000e+00 : f32
    %491 = vector.broadcast %cst_89 : f32 to vector<8x128xf32>
    %cst_90 = arith.constant 0.000000e+00 : f32
    %492 = vector.broadcast %cst_90 : f32 to vector<8x128xf32>
    %493 = vector.extract_strided_slice %489 {offsets = [0, 0], sizes = [8, 512], strides = [1, 1]} : vector<64x512xf32> to vector<8x512xf32>
    %494 = arith.truncf %491 : vector<8x128xf32> to vector<8x128xbf16>
    %cst_91 = arith.constant dense<0.000000e+00> : vector<8x512xf32>
    %495 = tpu.matmul %494, %490, %cst_91 {dimension_numbers = #tpu.dot_dimension_numbers<[1], [0], [0], [1], [0, 0, 1, 1], [], []>} : vector<8x128xbf16>, vector<128x512xbf16>, vector<8x512xf32> -> vector<8x512xf32>
    %496 = arith.addf %493, %495 : vector<8x512xf32>
    %497 = vector.extract_strided_slice %496 {offsets = [0, 0], sizes = [8, 128], strides = [1, 1]} : vector<8x512xf32> to vector<8x128xf32>
    %498 = arith.negf %497 : vector<8x128xf32>
    %499 = math.exp %498 : vector<8x128xf32>
    %cst_92 = arith.constant 1.000000e+00 : f32
    %500 = vector.broadcast %cst_92 : f32 to vector<8x128xf32>
    %501 = arith.addf %500, %499 : vector<8x128xf32>
    %502 = arith.divf %500, %501 : vector<8x128xf32>
    %503 = vector.extract_strided_slice %496 {offsets = [0, 128], sizes = [8, 128], strides = [1, 1]} : vector<8x512xf32> to vector<8x128xf32>
    %504 = arith.negf %503 : vector<8x128xf32>
    %505 = math.exp %504 : vector<8x128xf32>
    %cst_93 = arith.constant 1.000000e+00 : f32
    %506 = vector.broadcast %cst_93 : f32 to vector<8x128xf32>
    %507 = arith.addf %506, %505 : vector<8x128xf32>
    %508 = arith.divf %506, %507 : vector<8x128xf32>
    %509 = vector.extract_strided_slice %496 {offsets = [0, 256], sizes = [8, 128], strides = [1, 1]} : vector<8x512xf32> to vector<8x128xf32>
    %510 = math.tanh %509 : vector<8x128xf32>
    %511 = vector.extract_strided_slice %496 {offsets = [0, 384], sizes = [8, 128], strides = [1, 1]} : vector<8x512xf32> to vector<8x128xf32>
    %512 = arith.negf %511 : vector<8x128xf32>
    %513 = math.exp %512 : vector<8x128xf32>
    %cst_94 = arith.constant 1.000000e+00 : f32
    %514 = vector.broadcast %cst_94 : f32 to vector<8x128xf32>
    %515 = arith.addf %514, %513 : vector<8x128xf32>
    %516 = arith.divf %514, %515 : vector<8x128xf32>
    %517 = arith.mulf %508, %492 : vector<8x128xf32>
    %518 = arith.mulf %502, %510 : vector<8x128xf32>
    %519 = arith.addf %517, %518 : vector<8x128xf32>
    %520 = math.tanh %519 : vector<8x128xf32>
    %521 = arith.mulf %516, %520 : vector<8x128xf32>
    %522 = vector.extract_strided_slice %489 {offsets = [8, 0], sizes = [8, 512], strides = [1, 1]} : vector<64x512xf32> to vector<8x512xf32>
    %523 = arith.truncf %521 : vector<8x128xf32> to vector<8x128xbf16>
    %cst_95 = arith.constant dense<0.000000e+00> : vector<8x512xf32>
    %524 = tpu.matmul %523, %490, %cst_95 {dimension_numbers = #tpu.dot_dimension_numbers<[1], [0], [0], [1], [0, 0, 1, 1], [], []>} : vector<8x128xbf16>, vector<128x512xbf16>, vector<8x512xf32> -> vector<8x512xf32>
    %525 = arith.addf %522, %524 : vector<8x512xf32>
    %526 = vector.extract_strided_slice %525 {offsets = [0, 0], sizes = [8, 128], strides = [1, 1]} : vector<8x512xf32> to vector<8x128xf32>
    %527 = arith.negf %526 : vector<8x128xf32>
    %528 = math.exp %527 : vector<8x128xf32>
    %cst_96 = arith.constant 1.000000e+00 : f32
    %529 = vector.broadcast %cst_96 : f32 to vector<8x128xf32>
    %530 = arith.addf %529, %528 : vector<8x128xf32>
    %531 = arith.divf %529, %530 : vector<8x128xf32>
    %532 = vector.extract_strided_slice %525 {offsets = [0, 128], sizes = [8, 128], strides = [1, 1]} : vector<8x512xf32> to vector<8x128xf32>
    %533 = arith.negf %532 : vector<8x128xf32>
    %534 = math.exp %533 : vector<8x128xf32>
    %cst_97 = arith.constant 1.000000e+00 : f32
    %535 = vector.broadcast %cst_97 : f32 to vector<8x128xf32>
    %536 = arith.addf %535, %534 : vector<8x128xf32>
    %537 = arith.divf %535, %536 : vector<8x128xf32>
    %538 = vector.extract_strided_slice %525 {offsets = [0, 256], sizes = [8, 128], strides = [1, 1]} : vector<8x512xf32> to vector<8x128xf32>
    %539 = math.tanh %538 : vector<8x128xf32>
    %540 = vector.extract_strided_slice %525 {offsets = [0, 384], sizes = [8, 128], strides = [1, 1]} : vector<8x512xf32> to vector<8x128xf32>
    %541 = arith.negf %540 : vector<8x128xf32>
    %542 = math.exp %541 : vector<8x128xf32>
    %cst_98 = arith.constant 1.000000e+00 : f32
    %543 = vector.broadcast %cst_98 : f32 to vector<8x128xf32>
    %544 = arith.addf %543, %542 : vector<8x128xf32>
    %545 = arith.divf %543, %544 : vector<8x128xf32>
    %546 = arith.mulf %537, %519 : vector<8x128xf32>
    %547 = arith.mulf %531, %539 : vector<8x128xf32>
    %548 = arith.addf %546, %547 : vector<8x128xf32>
    %549 = math.tanh %548 : vector<8x128xf32>
    %550 = arith.mulf %545, %549 : vector<8x128xf32>
    %551 = vector.extract_strided_slice %489 {offsets = [16, 0], sizes = [8, 512], strides = [1, 1]} : vector<64x512xf32> to vector<8x512xf32>
    %552 = arith.truncf %550 : vector<8x128xf32> to vector<8x128xbf16>
    %cst_99 = arith.constant dense<0.000000e+00> : vector<8x512xf32>
    %553 = tpu.matmul %552, %490, %cst_99 {dimension_numbers = #tpu.dot_dimension_numbers<[1], [0], [0], [1], [0, 0, 1, 1], [], []>} : vector<8x128xbf16>, vector<128x512xbf16>, vector<8x512xf32> -> vector<8x512xf32>
    %554 = arith.addf %551, %553 : vector<8x512xf32>
    %555 = vector.extract_strided_slice %554 {offsets = [0, 0], sizes = [8, 128], strides = [1, 1]} : vector<8x512xf32> to vector<8x128xf32>
    %556 = arith.negf %555 : vector<8x128xf32>
    %557 = math.exp %556 : vector<8x128xf32>
    %cst_100 = arith.constant 1.000000e+00 : f32
    %558 = vector.broadcast %cst_100 : f32 to vector<8x128xf32>
    %559 = arith.addf %558, %557 : vector<8x128xf32>
    %560 = arith.divf %558, %559 : vector<8x128xf32>
    %561 = vector.extract_strided_slice %554 {offsets = [0, 128], sizes = [8, 128], strides = [1, 1]} : vector<8x512xf32> to vector<8x128xf32>
    %562 = arith.negf %561 : vector<8x128xf32>
    %563 = math.exp %562 : vector<8x128xf32>
    %cst_101 = arith.constant 1.000000e+00 : f32
    %564 = vector.broadcast %cst_101 : f32 to vector<8x128xf32>
    %565 = arith.addf %564, %563 : vector<8x128xf32>
    %566 = arith.divf %564, %565 : vector<8x128xf32>
    %567 = vector.extract_strided_slice %554 {offsets = [0, 256], sizes = [8, 128], strides = [1, 1]} : vector<8x512xf32> to vector<8x128xf32>
    %568 = math.tanh %567 : vector<8x128xf32>
    %569 = vector.extract_strided_slice %554 {offsets = [0, 384], sizes = [8, 128], strides = [1, 1]} : vector<8x512xf32> to vector<8x128xf32>
    %570 = arith.negf %569 : vector<8x128xf32>
    %571 = math.exp %570 : vector<8x128xf32>
    %cst_102 = arith.constant 1.000000e+00 : f32
    %572 = vector.broadcast %cst_102 : f32 to vector<8x128xf32>
    %573 = arith.addf %572, %571 : vector<8x128xf32>
    %574 = arith.divf %572, %573 : vector<8x128xf32>
    %575 = arith.mulf %566, %548 : vector<8x128xf32>
    %576 = arith.mulf %560, %568 : vector<8x128xf32>
    %577 = arith.addf %575, %576 : vector<8x128xf32>
    %578 = math.tanh %577 : vector<8x128xf32>
    %579 = arith.mulf %574, %578 : vector<8x128xf32>
    %580 = vector.extract_strided_slice %489 {offsets = [24, 0], sizes = [8, 512], strides = [1, 1]} : vector<64x512xf32> to vector<8x512xf32>
    %581 = arith.truncf %579 : vector<8x128xf32> to vector<8x128xbf16>
    %cst_103 = arith.constant dense<0.000000e+00> : vector<8x512xf32>
    %582 = tpu.matmul %581, %490, %cst_103 {dimension_numbers = #tpu.dot_dimension_numbers<[1], [0], [0], [1], [0, 0, 1, 1], [], []>} : vector<8x128xbf16>, vector<128x512xbf16>, vector<8x512xf32> -> vector<8x512xf32>
    %583 = arith.addf %580, %582 : vector<8x512xf32>
    %584 = vector.extract_strided_slice %583 {offsets = [0, 0], sizes = [8, 128], strides = [1, 1]} : vector<8x512xf32> to vector<8x128xf32>
    %585 = arith.negf %584 : vector<8x128xf32>
    %586 = math.exp %585 : vector<8x128xf32>
    %cst_104 = arith.constant 1.000000e+00 : f32
    %587 = vector.broadcast %cst_104 : f32 to vector<8x128xf32>
    %588 = arith.addf %587, %586 : vector<8x128xf32>
    %589 = arith.divf %587, %588 : vector<8x128xf32>
    %590 = vector.extract_strided_slice %583 {offsets = [0, 128], sizes = [8, 128], strides = [1, 1]} : vector<8x512xf32> to vector<8x128xf32>
    %591 = arith.negf %590 : vector<8x128xf32>
    %592 = math.exp %591 : vector<8x128xf32>
    %cst_105 = arith.constant 1.000000e+00 : f32
    %593 = vector.broadcast %cst_105 : f32 to vector<8x128xf32>
    %594 = arith.addf %593, %592 : vector<8x128xf32>
    %595 = arith.divf %593, %594 : vector<8x128xf32>
    %596 = vector.extract_strided_slice %583 {offsets = [0, 256], sizes = [8, 128], strides = [1, 1]} : vector<8x512xf32> to vector<8x128xf32>
    %597 = math.tanh %596 : vector<8x128xf32>
    %598 = vector.extract_strided_slice %583 {offsets = [0, 384], sizes = [8, 128], strides = [1, 1]} : vector<8x512xf32> to vector<8x128xf32>
    %599 = arith.negf %598 : vector<8x128xf32>
    %600 = math.exp %599 : vector<8x128xf32>
    %cst_106 = arith.constant 1.000000e+00 : f32
    %601 = vector.broadcast %cst_106 : f32 to vector<8x128xf32>
    %602 = arith.addf %601, %600 : vector<8x128xf32>
    %603 = arith.divf %601, %602 : vector<8x128xf32>
    %604 = arith.mulf %595, %577 : vector<8x128xf32>
    %605 = arith.mulf %589, %597 : vector<8x128xf32>
    %606 = arith.addf %604, %605 : vector<8x128xf32>
    %607 = math.tanh %606 : vector<8x128xf32>
    %608 = arith.mulf %603, %607 : vector<8x128xf32>
    %609 = vector.extract_strided_slice %489 {offsets = [32, 0], sizes = [8, 512], strides = [1, 1]} : vector<64x512xf32> to vector<8x512xf32>
    %610 = arith.truncf %608 : vector<8x128xf32> to vector<8x128xbf16>
    %cst_107 = arith.constant dense<0.000000e+00> : vector<8x512xf32>
    %611 = tpu.matmul %610, %490, %cst_107 {dimension_numbers = #tpu.dot_dimension_numbers<[1], [0], [0], [1], [0, 0, 1, 1], [], []>} : vector<8x128xbf16>, vector<128x512xbf16>, vector<8x512xf32> -> vector<8x512xf32>
    %612 = arith.addf %609, %611 : vector<8x512xf32>
    %613 = vector.extract_strided_slice %612 {offsets = [0, 0], sizes = [8, 128], strides = [1, 1]} : vector<8x512xf32> to vector<8x128xf32>
    %614 = arith.negf %613 : vector<8x128xf32>
    %615 = math.exp %614 : vector<8x128xf32>
    %cst_108 = arith.constant 1.000000e+00 : f32
    %616 = vector.broadcast %cst_108 : f32 to vector<8x128xf32>
    %617 = arith.addf %616, %615 : vector<8x128xf32>
    %618 = arith.divf %616, %617 : vector<8x128xf32>
    %619 = vector.extract_strided_slice %612 {offsets = [0, 128], sizes = [8, 128], strides = [1, 1]} : vector<8x512xf32> to vector<8x128xf32>
    %620 = arith.negf %619 : vector<8x128xf32>
    %621 = math.exp %620 : vector<8x128xf32>
    %cst_109 = arith.constant 1.000000e+00 : f32
    %622 = vector.broadcast %cst_109 : f32 to vector<8x128xf32>
    %623 = arith.addf %622, %621 : vector<8x128xf32>
    %624 = arith.divf %622, %623 : vector<8x128xf32>
    %625 = vector.extract_strided_slice %612 {offsets = [0, 256], sizes = [8, 128], strides = [1, 1]} : vector<8x512xf32> to vector<8x128xf32>
    %626 = math.tanh %625 : vector<8x128xf32>
    %627 = vector.extract_strided_slice %612 {offsets = [0, 384], sizes = [8, 128], strides = [1, 1]} : vector<8x512xf32> to vector<8x128xf32>
    %628 = arith.negf %627 : vector<8x128xf32>
    %629 = math.exp %628 : vector<8x128xf32>
    %cst_110 = arith.constant 1.000000e+00 : f32
    %630 = vector.broadcast %cst_110 : f32 to vector<8x128xf32>
    %631 = arith.addf %630, %629 : vector<8x128xf32>
    %632 = arith.divf %630, %631 : vector<8x128xf32>
    %633 = arith.mulf %624, %606 : vector<8x128xf32>
    %634 = arith.mulf %618, %626 : vector<8x128xf32>
    %635 = arith.addf %633, %634 : vector<8x128xf32>
    %636 = math.tanh %635 : vector<8x128xf32>
    %637 = arith.mulf %632, %636 : vector<8x128xf32>
    %638 = vector.extract_strided_slice %489 {offsets = [40, 0], sizes = [8, 512], strides = [1, 1]} : vector<64x512xf32> to vector<8x512xf32>
    %639 = arith.truncf %637 : vector<8x128xf32> to vector<8x128xbf16>
    %cst_111 = arith.constant dense<0.000000e+00> : vector<8x512xf32>
    %640 = tpu.matmul %639, %490, %cst_111 {dimension_numbers = #tpu.dot_dimension_numbers<[1], [0], [0], [1], [0, 0, 1, 1], [], []>} : vector<8x128xbf16>, vector<128x512xbf16>, vector<8x512xf32> -> vector<8x512xf32>
    %641 = arith.addf %638, %640 : vector<8x512xf32>
    %642 = vector.extract_strided_slice %641 {offsets = [0, 0], sizes = [8, 128], strides = [1, 1]} : vector<8x512xf32> to vector<8x128xf32>
    %643 = arith.negf %642 : vector<8x128xf32>
    %644 = math.exp %643 : vector<8x128xf32>
    %cst_112 = arith.constant 1.000000e+00 : f32
    %645 = vector.broadcast %cst_112 : f32 to vector<8x128xf32>
    %646 = arith.addf %645, %644 : vector<8x128xf32>
    %647 = arith.divf %645, %646 : vector<8x128xf32>
    %648 = vector.extract_strided_slice %641 {offsets = [0, 128], sizes = [8, 128], strides = [1, 1]} : vector<8x512xf32> to vector<8x128xf32>
    %649 = arith.negf %648 : vector<8x128xf32>
    %650 = math.exp %649 : vector<8x128xf32>
    %cst_113 = arith.constant 1.000000e+00 : f32
    %651 = vector.broadcast %cst_113 : f32 to vector<8x128xf32>
    %652 = arith.addf %651, %650 : vector<8x128xf32>
    %653 = arith.divf %651, %652 : vector<8x128xf32>
    %654 = vector.extract_strided_slice %641 {offsets = [0, 256], sizes = [8, 128], strides = [1, 1]} : vector<8x512xf32> to vector<8x128xf32>
    %655 = math.tanh %654 : vector<8x128xf32>
    %656 = vector.extract_strided_slice %641 {offsets = [0, 384], sizes = [8, 128], strides = [1, 1]} : vector<8x512xf32> to vector<8x128xf32>
    %657 = arith.negf %656 : vector<8x128xf32>
    %658 = math.exp %657 : vector<8x128xf32>
    %cst_114 = arith.constant 1.000000e+00 : f32
    %659 = vector.broadcast %cst_114 : f32 to vector<8x128xf32>
    %660 = arith.addf %659, %658 : vector<8x128xf32>
    %661 = arith.divf %659, %660 : vector<8x128xf32>
    %662 = arith.mulf %653, %635 : vector<8x128xf32>
    %663 = arith.mulf %647, %655 : vector<8x128xf32>
    %664 = arith.addf %662, %663 : vector<8x128xf32>
    %665 = math.tanh %664 : vector<8x128xf32>
    %666 = arith.mulf %661, %665 : vector<8x128xf32>
    %667 = vector.extract_strided_slice %489 {offsets = [48, 0], sizes = [8, 512], strides = [1, 1]} : vector<64x512xf32> to vector<8x512xf32>
    %668 = arith.truncf %666 : vector<8x128xf32> to vector<8x128xbf16>
    %cst_115 = arith.constant dense<0.000000e+00> : vector<8x512xf32>
    %669 = tpu.matmul %668, %490, %cst_115 {dimension_numbers = #tpu.dot_dimension_numbers<[1], [0], [0], [1], [0, 0, 1, 1], [], []>} : vector<8x128xbf16>, vector<128x512xbf16>, vector<8x512xf32> -> vector<8x512xf32>
    %670 = arith.addf %667, %669 : vector<8x512xf32>
    %671 = vector.extract_strided_slice %670 {offsets = [0, 0], sizes = [8, 128], strides = [1, 1]} : vector<8x512xf32> to vector<8x128xf32>
    %672 = arith.negf %671 : vector<8x128xf32>
    %673 = math.exp %672 : vector<8x128xf32>
    %cst_116 = arith.constant 1.000000e+00 : f32
    %674 = vector.broadcast %cst_116 : f32 to vector<8x128xf32>
    %675 = arith.addf %674, %673 : vector<8x128xf32>
    %676 = arith.divf %674, %675 : vector<8x128xf32>
    %677 = vector.extract_strided_slice %670 {offsets = [0, 128], sizes = [8, 128], strides = [1, 1]} : vector<8x512xf32> to vector<8x128xf32>
    %678 = arith.negf %677 : vector<8x128xf32>
    %679 = math.exp %678 : vector<8x128xf32>
    %cst_117 = arith.constant 1.000000e+00 : f32
    %680 = vector.broadcast %cst_117 : f32 to vector<8x128xf32>
    %681 = arith.addf %680, %679 : vector<8x128xf32>
    %682 = arith.divf %680, %681 : vector<8x128xf32>
    %683 = vector.extract_strided_slice %670 {offsets = [0, 256], sizes = [8, 128], strides = [1, 1]} : vector<8x512xf32> to vector<8x128xf32>
    %684 = math.tanh %683 : vector<8x128xf32>
    %685 = vector.extract_strided_slice %670 {offsets = [0, 384], sizes = [8, 128], strides = [1, 1]} : vector<8x512xf32> to vector<8x128xf32>
    %686 = arith.negf %685 : vector<8x128xf32>
    %687 = math.exp %686 : vector<8x128xf32>
    %cst_118 = arith.constant 1.000000e+00 : f32
    %688 = vector.broadcast %cst_118 : f32 to vector<8x128xf32>
    %689 = arith.addf %688, %687 : vector<8x128xf32>
    %690 = arith.divf %688, %689 : vector<8x128xf32>
    %691 = arith.mulf %682, %664 : vector<8x128xf32>
    %692 = arith.mulf %676, %684 : vector<8x128xf32>
    %693 = arith.addf %691, %692 : vector<8x128xf32>
    %694 = math.tanh %693 : vector<8x128xf32>
    %695 = arith.mulf %690, %694 : vector<8x128xf32>
    %696 = vector.extract_strided_slice %489 {offsets = [56, 0], sizes = [8, 512], strides = [1, 1]} : vector<64x512xf32> to vector<8x512xf32>
    %697 = arith.truncf %695 : vector<8x128xf32> to vector<8x128xbf16>
    %cst_119 = arith.constant dense<0.000000e+00> : vector<8x512xf32>
    %698 = tpu.matmul %697, %490, %cst_119 {dimension_numbers = #tpu.dot_dimension_numbers<[1], [0], [0], [1], [0, 0, 1, 1], [], []>} : vector<8x128xbf16>, vector<128x512xbf16>, vector<8x512xf32> -> vector<8x512xf32>
    %699 = arith.addf %696, %698 : vector<8x512xf32>
    %700 = vector.extract_strided_slice %699 {offsets = [0, 0], sizes = [8, 128], strides = [1, 1]} : vector<8x512xf32> to vector<8x128xf32>
    %701 = arith.negf %700 : vector<8x128xf32>
    %702 = math.exp %701 : vector<8x128xf32>
    %cst_120 = arith.constant 1.000000e+00 : f32
    %703 = vector.broadcast %cst_120 : f32 to vector<8x128xf32>
    %704 = arith.addf %703, %702 : vector<8x128xf32>
    %705 = arith.divf %703, %704 : vector<8x128xf32>
    %706 = vector.extract_strided_slice %699 {offsets = [0, 128], sizes = [8, 128], strides = [1, 1]} : vector<8x512xf32> to vector<8x128xf32>
    %707 = arith.negf %706 : vector<8x128xf32>
    %708 = math.exp %707 : vector<8x128xf32>
    %cst_121 = arith.constant 1.000000e+00 : f32
    %709 = vector.broadcast %cst_121 : f32 to vector<8x128xf32>
    %710 = arith.addf %709, %708 : vector<8x128xf32>
    %711 = arith.divf %709, %710 : vector<8x128xf32>
    %712 = vector.extract_strided_slice %699 {offsets = [0, 256], sizes = [8, 128], strides = [1, 1]} : vector<8x512xf32> to vector<8x128xf32>
    %713 = math.tanh %712 : vector<8x128xf32>
    %714 = vector.extract_strided_slice %699 {offsets = [0, 384], sizes = [8, 128], strides = [1, 1]} : vector<8x512xf32> to vector<8x128xf32>
    %715 = arith.negf %714 : vector<8x128xf32>
    %716 = math.exp %715 : vector<8x128xf32>
    %cst_122 = arith.constant 1.000000e+00 : f32
    %717 = vector.broadcast %cst_122 : f32 to vector<8x128xf32>
    %718 = arith.addf %717, %716 : vector<8x128xf32>
    %719 = arith.divf %717, %718 : vector<8x128xf32>
    %720 = arith.mulf %711, %693 : vector<8x128xf32>
    %721 = arith.mulf %705, %713 : vector<8x128xf32>
    %722 = arith.addf %720, %721 : vector<8x128xf32>
    %723 = math.tanh %722 : vector<8x128xf32>
    %724 = arith.mulf %719, %723 : vector<8x128xf32>
    %c0_123 = arith.constant 0 : index
    %c0_124 = arith.constant 0 : index
    %725 = vector.load %arg10[%c0_123, %c0_124] : memref<128x1xf32, #tpu.memory_space<vmem>>, vector<128x1xf32>
    %cst_125 = arith.constant dense<0.000000e+00> : vector<8x1xf32>
    %726 = tpu.matmul %724, %725, %cst_125 {dimension_numbers = #tpu.dot_dimension_numbers<[1], [0], [0], [1], [0, 0, 1, 1], [], []>} : vector<8x128xf32>, vector<128x1xf32>, vector<8x1xf32> -> vector<8x1xf32>
    %c0_126 = arith.constant 0 : index
    %c0_127 = arith.constant 0 : index
    %727 = vector.load %arg11[%c0_126, %c0_127] : memref<1x1xf32, #tpu.memory_space<vmem>>, vector<1x1xf32>
    %728 = vector.broadcast %727 : vector<1x1xf32> to vector<8x1xf32>
    %729 = arith.addf %726, %728 : vector<8x1xf32>
    %c0_128 = arith.constant 0 : index
    %c0_129 = arith.constant 0 : index
    %730 = vector.load %arg12[%c0_128, %c0_129] : memref<8x1xf32, #tpu.memory_space<vmem>>, vector<8x1xf32>
    tpu.vector_store %arg12[%c0_128, %c0_129], %729 {strides = array<i32>} : memref<8x1xf32, #tpu.memory_space<vmem>>, vector<8x1xf32>,
    return
  }
}

</mosaic_0001>

<bundles_post_ra>
// kernel: tpu_custom_call.1
= control target key start
LH: loop header
LB: loop body
LE: loop exit
PB: predicated region body
PF: predicated region fallthrough
CT: control target
= control target key end

     0   :  { %s7639_s0 = inlined_call_operand.vmem [shape: bf16[64,4], index: 0, kind: input, shape index: {}]   ;;  %s7640_s1 = inlined_call_operand.vmem [shape: bf16[4,512], index: 1, kind: input, shape index: {}]   ;;  %s7641_s2 = inlined_call_operand.hbm [shape: bf16[128,512], index: 2, kind: input, shape index: {}]   ;;  %s7642_s3 = inlined_call_operand.vmem [shape: f32[1,512], index: 3, kind: input, shape index: {}]   ;;  %s7643_s4 = inlined_call_operand.hbm [shape: bf16[128,512], index: 4, kind: input, shape index: {}]   ;;  %s7644_s5 = inlined_call_operand.hbm [shape: bf16[128,512], index: 5, kind: input, shape index: {}]   ;;  %s7645_s6 = inlined_call_operand.vmem [shape: f32[1,512], index: 6, kind: input, shape index: {}]   ;;  %s7646_s7 = inlined_call_operand.hbm [shape: bf16[128,512], index: 7, kind: input, shape index: {}]   ;;  %s7647_s8 = inlined_call_operand.hbm [shape: bf16[128,512], index: 8, kind: input, shape index: {}]   ;;  %s7648_s9 = inlined_call_operand.vmem [shape: f32[1,512], index: 9, kind: input, shape index: {}]   ;;  %s7649_s10 = inlined_call_operand.vmem [shape: f32[128,1], index: 10, kind: input, shape index: {}]   ;;  %s7650_s11 = inlined_call_operand.<no memory space> [shape: f32[1,1], index: 11, kind: input, shape index: {}]   ;;  %s7651_s12 = inlined_call_operand.vmem [shape: f32[8,1], index: 12, kind: output, shape index: {}]  }
   0x1   :  { %v17_v0 = vstv %s7650_s11 }
   0x2   :  { %18 = vst [vmem:[#allocation2] sm:$0x1] %v17_v0 }
   0x3   :  { %19 = vsyncpa [#allocation4], 0 }
   0x4   :  { %20 = vsyncpa [#allocation6], 0 }
   0x5   :  { %21 = vsyncpa [#allocation9], 0  ;;  %s5596_s23 = smov [#allocation5]   ;;  %s5597_s25 = smov [#allocation8]  }
   0x6   :  { %s45_s24 = sshll.u32 %s5596_s23, 4  ;;  %s71_s26 = sshll.u32 %s5597_s25, 4  ;;  %s46_s24 = int_to_ptr.vmem [resolvable:$true] %s45_s24  ;;  %s5676_s26 = int_to_ptr.vmem [resolvable:$true] %s71_s26 }
   0x7   :  { %s5480_s29 = scalar_lea.hbm %s7643_s4, 4096 }
   0x8   :  { %p5481_p0 = scmp.ne.s32.totalorder %s7643_s4, %s5480_s29  ;;  %p5484_p1 = scmp.lt.u32.totalorder %s5480_s29, %s7643_s4 }
   0xa   :  { %p5486_p2 = pnand %p5484_p1, %p5481_p0 }
   0xc   :  { %5489 = shalt.err (!%p5486_p2)
}
   0xd   :  { %s5490_s15 = scalar_lea.vmem %s46_s24, 4096  ;;  %p5495_p4 = scmp.lt.s32.totalorder %s46_s24, %s46_s24 }
   0xe   :  { %p5491_p3 = scmp.ne.s32.totalorder %s46_s24, %s5490_s15  ;;  %p5496_p5 = scmp.lt.s32.totalorder %s5490_s15, %s5490_s15 }
  0x10   :  { %p5497_p6 = por %p5496_p5, %p5495_p4 }
  0x12   :  { %p5498_p7 = pnand %p5497_p6, %p5491_p3 }
  0x14   :  { %5501 = shalt.err (!%p5498_p7)
}
  0x15   :  { %s5598_s16 = smov 256   ;;  %s5599_s17 = smov 16  }
  0x16   :  { %51 = dma.hbm_to_vmem [thread:$0]  %s7643_s4, 4096, %s46_s24, [#allocation6], %s5598_s16, %s5598_s16, %s5599_s17  }
  0x17   :  { %s5502_s22 = scalar_lea.hbm %s7646_s7, 4096 }
  0x18   :  { %p5503_p8 = scmp.ne.s32.totalorder %s7646_s7, %s5502_s22  ;;  %p5506_p9 = scmp.lt.u32.totalorder %s5502_s22, %s7646_s7 }
  0x1a   :  { %p5508_p10 = pnand %p5506_p9, %p5503_p8 }
  0x1c   :  { %5511 = shalt.err (!%p5508_p10)
}
  0x1d   :  { %s5512_s29 = scalar_lea.vmem %s5676_s26, 4096  ;;  %p5517_p12 = scmp.lt.s32.totalorder %s5676_s26, %s5676_s26 }
  0x1e   :  { %p5513_p11 = scmp.ne.s32.totalorder %s5676_s26, %s5512_s29  ;;  %p5518_p13 = scmp.lt.s32.totalorder %s5512_s29, %s5512_s29 }
  0x20   :  { %p5519_p0 = por %p5518_p13, %p5517_p12 }
  0x22   :  { %p5520_p1 = pnand %p5519_p0, %p5513_p11 }
  0x24   :  { %5523 = shalt.err (!%p5520_p1)
}
  0x25   :  { %77 = dma.hbm_to_vmem [thread:$0]  %s7646_s7, 4096, %s5676_s26, [#allocation9], %s5598_s16, %s5598_s16, %s5599_s17  }
  0x26   :  { %s5600_s30 = smov [#allocation3]   ;;  %s5601_s11 = smov [#allocation7]  }
  0x27   :  { %s31_s13 = sshll.u32 %s5600_s30, 4  ;;  %s57_s14 = sshll.u32 %s5601_s11, 4  ;;  %s32_s13 = int_to_ptr.vmem [resolvable:$true] %s31_s13  ;;  %s5713_s14 = int_to_ptr.vmem [resolvable:$true] %s57_s14 }
  0x28   :  { %s5524_s19 = scalar_lea.hbm %s7641_s2, 4096 }
  0x29   :  { %p5525_p2 = scmp.ne.s32.totalorder %s7641_s2, %s5524_s19  ;;  %p5528_p3 = scmp.lt.u32.totalorder %s5524_s19, %s7641_s2 }
  0x2b   :  { %p5530_p4 = pnand %p5528_p3, %p5525_p2 }
  0x2d   :  { %5533 = shalt.err (!%p5530_p4)
}
  0x2e   :  { %s5534_s7 = scalar_lea.vmem %s32_s13, 4096  ;;  %p5539_p6 = scmp.lt.s32.totalorder %s32_s13, %s32_s13 }
  0x2f   :  { %p5535_p5 = scmp.ne.s32.totalorder %s32_s13, %s5534_s7  ;;  %p5540_p7 = scmp.lt.s32.totalorder %s5534_s7, %s5534_s7 }
  0x31   :  { %p5541_p8 = por %p5540_p7, %p5539_p6 }
  0x33   :  { %p5542_p9 = pnand %p5541_p8, %p5535_p5 }
  0x35   :  { %5545 = shalt.err (!%p5542_p9)
}
  0x36   :  { %37 = dma.hbm_to_vmem [thread:$0]  %s7641_s2, 4096, %s32_s13, [#allocation4], %s5598_s16, %s5598_s16, %s5599_s17  }
  0x37   :  { %s5546_s29 = scalar_lea.hbm %s7644_s5, 4096 }
  0x38   :  { %p5547_p10 = scmp.ne.s32.totalorder %s7644_s5, %s5546_s29  ;;  %p5550_p11 = scmp.lt.u32.totalorder %s5546_s29, %s7644_s5 }
  0x3a   :  { %p5552_p12 = pnand %p5550_p11, %p5547_p10 }
  0x3c   :  { %5555 = shalt.err (!%p5552_p12)
}
  0x3d   :  { %s5556_s15 = scalar_lea.vmem %s5713_s14, 4096  ;;  %p5561_p0 = scmp.lt.s32.totalorder %s5713_s14, %s5713_s14 }
  0x3e   :  { %p5557_p13 = scmp.ne.s32.totalorder %s5713_s14, %s5556_s15  ;;  %p5562_p1 = scmp.lt.s32.totalorder %s5556_s15, %s5556_s15 }
  0x40   :  { %p5563_p2 = por %p5562_p1, %p5561_p0 }
  0x42   :  { %p5564_p3 = pnand %p5563_p2, %p5557_p13 }
  0x44   :  { %5567 = shalt.err (!%p5564_p3)
}
  0x45   :  { %63 = dma.hbm_to_vmem [thread:$0]  %s7644_s5, 4096, %s5713_s14, [#allocation6], %s5598_s16, %s5598_s16, %s5599_s17  }
  0x46   :  { %s5602_s18 = smov [#allocation10]   ;;  %s5568_s22 = scalar_lea.hbm %s7647_s8, 4096 }
  0x47   :  { %s83_s19 = sshll.u32 %s5602_s18, 4  ;;  %p5569_p4 = scmp.ne.s32.totalorder %s7647_s8, %s5568_s22  ;;  %s84_s19 = int_to_ptr.vmem [resolvable:$true] %s83_s19 }
  0x48   :  { %p5572_p5 = scmp.lt.u32.totalorder %s5568_s22, %s7647_s8 }
  0x4a   :  { %p5574_p6 = pnand %p5572_p5, %p5569_p4 }
  0x4c   :  { %5577 = shalt.err (!%p5574_p6)
}
  0x4d   :  { %s5578_s27 = scalar_lea.vmem %s84_s19, 4096  ;;  %p5583_p8 = scmp.lt.s32.totalorder %s84_s19, %s84_s19 }
  0x4e   :  { %p5579_p7 = scmp.ne.s32.totalorder %s84_s19, %s5578_s27  ;;  %p5584_p9 = scmp.lt.s32.totalorder %s5578_s27, %s5578_s27 }
  0x50   :  { %p5585_p10 = por %p5584_p9, %p5583_p8 }
  0x52   :  { %p5586_p11 = pnand %p5585_p10, %p5579_p7 }
  0x54   :  { %5589 = shalt.err (!%p5586_p11)
}
  0x55   :  { %89 = dma.hbm_to_vmem [thread:$0]  %s7647_s8, 4096, %s84_s19, [#allocation9], %s5598_s16, %s5598_s16, %s5599_s17  }
  0x56   :  { %5590 = dma.done.wait [#allocation4], 4096  }
  0x57   :  { %5591 = vsyncadd [#allocation4], 4294963200 }
  0x58   :  { %5592 = dma.done.wait [#allocation6], 8192  }
  0x59   :  { %5593 = vsyncadd [#allocation6], 4294959104 }
  0x5a   :  { %5594 = dma.done.wait [#allocation9], 8192  }
  0x5b   :  { %5595 = vsyncadd [#allocation9], 4294959104  ;;  %v123_v1 = vlaneseq  ;;  %v5603_v2 = vmov 1983009808   ;;  %v7652_v4 = vmov 0   ;;  %v120_v8 = vld [vmem:[%s7640_s1] sm:$0xff] }
  0x5c   :  { %v166_v3 = vunpack.c.l.s4 %v5603_v2  ;;  %239 = vmatprep.mubr.bf16.mxu0 %v7652_v4  ;;  %312 = vmatprep.mubr.bf16.mxu1 %v7652_v4  ;;  %vm194_vm0 = vcmask 1041408   ;;  %v164_v10 = vcombine.high %v120_v8, %v120_v8  ;;  %v5773_v14 = vld [vmem:[#allocation3 + $0x4] ss:$16 sps:$4 sm:$0xff]   ;;  %v5778_v18 = vld [vmem:[#allocation3 + $0xc] ss:$16 sps:$4 sm:$0xff]   ;;  %vm181_vm1 = vcmask 31744  }
  0x5d   :  { %v5767_v5 = vshrl.u32 %v123_v1, 7  ;;  %v4756_v15 = vld [vmem:[%s7639_s0] sm:$0xff]   ;;  %v5785_v21 = vld [vmem:[#allocation3 + $0x8] ss:$16 sps:$4 sm:$0xff]   ;;  %v4782_v35 = vld [vmem:[%s7639_s0 + $0x10] sm:$0xff]   ;;  %vm5606_vm2 = vmmov 0  }
  0x5e   :  { %v167_v6 = vunpack.c.0.s8 %v166_v3  ;;  %v5780_v19 = vld [vmem:[#allocation3] ss:$16 sps:$4 sm:$0xff]   ;;  %v5783_v20 = vld [vmem:[#allocation3 + $0x24] ss:$16 sps:$4 sm:$0xff]   ;;  %v5789_v22 = vld [vmem:[#allocation3 + $0x2c] ss:$16 sps:$4 sm:$0xff]  }
  0x5f   :  { %v5792_v23 = vld [vmem:[#allocation3 + $0x20] ss:$16 sps:$4 sm:$0xff]   ;;  %v5797_v24 = vld [vmem:[#allocation3 + $0x44] ss:$16 sps:$4 sm:$0xff]   ;;  %v5800_v25 = vld [vmem:[#allocation3 + $0x28] ss:$16 sps:$4 sm:$0xff]  }
  0x60   :  { %v170_v7 = vsub.s32 %v167_v6, %v5767_v5  ;;  %v4769_v26 = vld [vmem:[%s7639_s0 + $0x8] sm:$0xff]   ;;  %v5810_v28 = vld [vmem:[#allocation3 + $0x40] ss:$16 sps:$4 sm:$0xff]   ;;  %v4795_v44 = vld [vmem:[%s7639_s0 + $0x18] sm:$0xff]   ;;  %v5936_v52 = vsub.s32 0, %v5767_v5  ;;  %v5939_v53 = vsub.s32 2, %v5767_v5 }
  0x61   :  { %v5807_v27 = vld [vmem:[#allocation3 + $0x4c] ss:$16 sps:$4 sm:$0xff]   ;;  %v5813_v29 = vld [vmem:[#allocation3 + $0x64] ss:$16 sps:$4 sm:$0xff]   ;;  %v5816_v30 = vld [vmem:[#allocation3 + $0x48] ss:$16 sps:$4 sm:$0xff]  }
  0x62   :  { %v171_v9 = vrot.slane %v120_v8, %v170_v7  ;;  %v178_v13 = vrot.slane %v164_v10, %v170_v7  ;;  %v5820_v31 = vld [vmem:[#allocation3 + $0x6c] ss:$16 sps:$4 sm:$0xff]   ;;  %v5823_v32 = vld [vmem:[#allocation3 + $0x60] ss:$16 sps:$4 sm:$0xff]   ;;  %v5828_v33 = vld [vmem:[#allocation3 + $0x84] ss:$16 sps:$4 sm:$0xff]  }
  0x63   :  { %v5831_v34 = vld [vmem:[#allocation3 + $0x68] ss:$16 sps:$4 sm:$0xff]   ;;  %v5838_v36 = vld [vmem:[#allocation3 + $0x8c] ss:$16 sps:$4 sm:$0xff]   ;;  %v5841_v37 = vld [vmem:[#allocation3 + $0x80] ss:$16 sps:$4 sm:$0xff]  }
  0x64   :  { %v179_v11 = vcombine.high %v171_v9, %v171_v9  ;;  %v196_v12 = vsel %vm194_vm0, %v171_v9, 0  ;;  %v180_v16 = vcombine.high %v178_v13, %v178_v13  ;;  %v202_v17 = vsel %vm194_vm0, %v178_v13, 0  ;;  %v5844_v38 = vld [vmem:[#allocation3 + $0xa4] ss:$16 sps:$4 sm:$0xff]   ;;  %v5847_v39 = vld [vmem:[#allocation3 + $0x88] ss:$16 sps:$4 sm:$0xff]  }
  0x65   :  { %v5851_v40 = vld [vmem:[#allocation3 + $0xa0] ss:$16 sps:$4 sm:$0xff]   ;;  %v5853_v41 = vld [vmem:[#allocation3 + $0xac] ss:$16 sps:$4 sm:$0xff]   ;;  %v5855_v42 = vld [vmem:[#allocation3 + $0xc4] ss:$16 sps:$4 sm:$0xff]  }
  0x66   :  { %4424 = vmatprep.subr.msk.bf16.mxu0 %vm194_vm0, %v179_v11  ;;  %4429 = vmatprep.subr.msk.bf16.mxu1 %vm194_vm0, %v180_v16  ;;  %v5859_v43 = vld [vmem:[#allocation3 + $0xa8] ss:$16 sps:$4 sm:$0xff]   ;;  %v5866_v45 = vld [vmem:[#allocation3 + $0xcc] ss:$16 sps:$4 sm:$0xff]   ;;  %v5870_v46 = vld [vmem:[#allocation3 + $0xc0] ss:$16 sps:$4 sm:$0xff]  }
  0x67   :  { %208 = vmatpush1.bf16.msra.mxu0 %v196_v12  ;;  %281 = vmatpush1.bf16.msra.mxu1 %v202_v17  ;;  %v5873_v47 = vld [vmem:[#allocation3 + $0xe4] ss:$16 sps:$4 sm:$0xff]   ;;  %v5876_v48 = vld [vmem:[#allocation3 + $0xc8] ss:$16 sps:$4 sm:$0xff]   ;;  %v5879_v49 = vld [vmem:[#allocation3 + $0xec] ss:$16 sps:$4 sm:$0xff]  }
  0x68   :  { %545 = vmatprep.subr.bf16.mxu0 %v5773_v14  ;;  %586 = vmatprep.subr.bf16.mxu1 %v5778_v18  ;;  %v5882_v50 = vld [vmem:[#allocation3 + $0xe0] ss:$16 sps:$4 sm:$0xff]   ;;  %v5888_v51 = vld [vmem:[#allocation3 + $0xe8] ss:$16 sps:$4 sm:$0xff]   ;;  %7662 = vst [vmem:[#allocation14_spill] sm:$0xff] %v5936_v52  ;;  %7663 = vst [vmem:[#allocation15_spill] sm:$0xff] %v5939_v53 }
  0x69   :  { %v121_v54 = vld [vmem:[%s7642_s3] sm:$0xf]  ;;  %v5945_v55 = vsub.s32 1, %v5767_v5  ;;  %v5948_v56 = vsub.s32 3, %v5767_v5  ;;  %vm4411_vm3 = vcmask 7168  }
  0x6a   :  { %4425 = vmatmul.mubr.msk.bf16.vlgmr.msra.gmra.mrb[0].mxu0 %vm181_vm1, %v4756_v15  ;;  %4430 = vmatmul.mubr.msk.bf16.vlgmr.msra.gmra.mrb[0].mxu1 %vm181_vm1, %v4756_v15  ;;  %v5953_v58 = vrot.slane %v121_v54, %v5936_v52  ;;  %v5958_v60 = vrot.slane %v121_v54, %v5939_v53 }
  0x6b   :  { %546 = vmatpush1.bf16.msra.mxu0 %v5780_v19  ;;  %249 = vmatprep.mubr.bf16.mxu0 %v7652_v4  ;;  %7664 = vst [vmem:[#allocation16_spill] sm:$0xff] %v5945_v55  ;;  %7665 = vst [vmem:[#allocation17_spill] sm:$0xff] %v5948_v56  ;;  %v130_v61 = vrot.slane %v121_v54, %v5945_v55  ;;  %v5962_v0 = vrot.slane %v121_v54, %v5948_v56 }
  0x6c   :  { %547 = vmatprep.subr.bf16.mxu0 %v5783_v20  ;;  %587 = vmatpush1.bf16.msra.mxu1 %v5785_v21 }
  0x6d   :  { %322 = vmatprep.mubr.bf16.mxu1 %v7652_v4  ;;  %588 = vmatprep.subr.bf16.mxu1 %v5789_v22 }
  0x6f   :  { %548 = vmatpush1.bf16.msra.mxu0 %v5792_v23 }
  0x70   :  { %549 = vmatprep.subr.bf16.mxu0 %v5797_v24  ;;  %589 = vmatpush1.bf16.msra.mxu1 %v5800_v25 }
  0x71   :  { %590 = vmatprep.subr.bf16.mxu1 %v5807_v27 }
  0x72   :  { %4426 = vmatmul.mubr.msk.bf16.gmra.mrb[4].mxu0 %vm181_vm1, %v4769_v26  ;;  %4431 = vmatmul.mubr.msk.bf16.gmra.mrb[4].mxu1 %vm181_vm1, %v4769_v26 }
  0x73   :  { %550 = vmatpush1.bf16.msra.mxu0 %v5810_v28  ;;  %259 = vmatprep.mubr.bf16.mxu0 %v7652_v4 }
  0x74   :  { %551 = vmatprep.subr.bf16.mxu0 %v5813_v29  ;;  %591 = vmatpush1.bf16.msra.mxu1 %v5816_v30 }
  0x75   :  { %332 = vmatprep.mubr.bf16.mxu1 %v7652_v4  ;;  %592 = vmatprep.subr.bf16.mxu1 %v5820_v31 }
  0x77   :  { %552 = vmatpush1.bf16.msra.mxu0 %v5823_v32 }
  0x78   :  { %553 = vmatprep.subr.bf16.mxu0 %v5828_v33  ;;  %593 = vmatpush1.bf16.msra.mxu1 %v5831_v34 }
  0x79   :  { %594 = vmatprep.subr.bf16.mxu1 %v5838_v36 }
  0x7a   :  { %4427 = vmatmul.mubr.msk.bf16.gmra.mrb[8].mxu0 %vm181_vm1, %v4782_v35  ;;  %4432 = vmatmul.mubr.msk.bf16.gmra.mrb[8].mxu1 %vm181_vm1, %v4782_v35 }
  0x7b   :  { %554 = vmatpush1.bf16.msra.mxu0 %v5841_v37  ;;  %269 = vmatprep.mubr.bf16.mxu0 %v7652_v4 }
  0x7c   :  { %555 = vmatprep.subr.bf16.mxu0 %v5844_v38  ;;  %595 = vmatpush1.bf16.msra.mxu1 %v5847_v39 }
  0x7d   :  { %342 = vmatprep.mubr.bf16.mxu1 %v7652_v4  ;;  %596 = vmatprep.subr.bf16.mxu1 %v5853_v41 }
  0x7f   :  { %556 = vmatpush1.bf16.msra.mxu0 %v5851_v40 }
  0x80   :  { %557 = vmatprep.subr.bf16.mxu0 %v5855_v42  ;;  %597 = vmatpush1.bf16.msra.mxu1 %v5859_v43 }
  0x81   :  { %598 = vmatprep.subr.bf16.mxu1 %v5866_v45 }
  0x82   :  { %4428 = vmatmul.mubr.msk.bf16.gmra.mrb[12].mxu0 %vm181_vm1, %v4795_v44  ;;  %4433 = vmatmul.mubr.msk.bf16.gmra.mrb[12].mxu1 %vm181_vm1, %v4795_v44 }
  0x83   :  { %558 = vmatpush1.bf16.msra.mxu0 %v5870_v46  ;;  %577 = vmatprep.mubr.bf16.mxu0 %v7652_v4 }
  0x84   :  { %559 = vmatprep.subr.bf16.mxu0 %v5873_v47  ;;  %599 = vmatpush1.bf16.msra.mxu1 %v5876_v48 }
  0x85   :  { %618 = vmatprep.mubr.bf16.mxu1 %v7652_v4  ;;  %600 = vmatprep.subr.bf16.mxu1 %v5879_v49 }
  0x87   :  { %560 = vmatpush1.bf16.msra.mxu0 %v5882_v50 }
  0x88   :  { %656 = vmatprep.subr.bf16.mxu0 %v5773_v14  ;;  %601 = vmatpush1.bf16.msra.mxu1 %v5888_v51 }
  0x89   :  { %697 = vmatprep.subr.bf16.mxu1 %v5778_v18 }
  0x8a   :  { %578 = vmatmul.mubr.bf16.vlgmr.msra.gmra.mrb[16].mxu0 %v7652_v4 }
  0x8b   :  { %657 = vmatpush1.bf16.msra.mxu0 %v5780_v19  ;;  %688 = vmatprep.mubr.bf16.mxu0 %v7652_v4 }
  0x8c   :  { %619 = vmatmul.mubr.bf16.vlgmr.msra.gmra.mrb[16].mxu1 %v7652_v4  ;;  %658 = vmatprep.subr.bf16.mxu0 %v5783_v20 }
  0x8d   :  { %698 = vmatpush1.bf16.msra.mxu1 %v5785_v21  ;;  %729 = vmatprep.mubr.bf16.mxu1 %v7652_v4 }
  0x8e   :  { %699 = vmatprep.subr.bf16.mxu1 %v5789_v22 }
  0x8f   :  { %659 = vmatpush1.bf16.msra.mxu0 %v5792_v23 }
  0x90   :  { %660 = vmatprep.subr.bf16.mxu0 %v5797_v24 }
  0x91   :  { %700 = vmatpush1.bf16.msra.mxu1 %v5800_v25 }
  0x92   :  { %701 = vmatprep.subr.bf16.mxu1 %v5807_v27 }
  0x93   :  { %661 = vmatpush1.bf16.msra.mxu0 %v5810_v28 }
  0x94   :  { %662 = vmatprep.subr.bf16.mxu0 %v5813_v29 }
  0x95   :  { %702 = vmatpush1.bf16.msra.mxu1 %v5816_v30 }
  0x96   :  { %703 = vmatprep.subr.bf16.mxu1 %v5820_v31 }
  0x97   :  { %663 = vmatpush1.bf16.msra.mxu0 %v5823_v32 }
  0x98   :  { %664 = vmatprep.subr.bf16.mxu0 %v5828_v33 }
  0x99   :  { %704 = vmatpush1.bf16.msra.mxu1 %v5831_v34 }
  0x9a   :  { %705 = vmatprep.subr.bf16.mxu1 %v5838_v36 }
  0x9b   :  { %665 = vmatpush1.bf16.msra.mxu0 %v5841_v37 }
  0x9c   :  { %666 = vmatprep.subr.bf16.mxu0 %v5844_v38 }
  0x9d   :  { %706 = vmatpush1.bf16.msra.mxu1 %v5847_v39 }
  0x9e   :  { %707 = vmatprep.subr.bf16.mxu1 %v5853_v41 }
  0x9f   :  { %667 = vmatpush1.bf16.msra.mxu0 %v5851_v40 }
  0xa0   :  { %668 = vmatprep.subr.bf16.mxu0 %v5855_v42 }
  0xa1   :  { %708 = vmatpush1.bf16.msra.mxu1 %v5859_v43 }
  0xa2   :  { %709 = vmatprep.subr.bf16.mxu1 %v5866_v45 }
  0xa3   :  { %669 = vmatpush1.bf16.msra.mxu0 %v5870_v46 }
  0xa4   :  { %670 = vmatprep.subr.bf16.mxu0 %v5873_v47 }
  0xa5   :  { %710 = vmatpush1.bf16.msra.mxu1 %v5876_v48 }
  0xa6   :  { %711 = vmatprep.subr.bf16.mxu1 %v5879_v49 }
  0xa7   :  { %671 = vmatpush1.bf16.msra.mxu0 %v5882_v50 }
  0xa8   :  { %767 = vmatprep.subr.bf16.mxu0 %v5773_v14 }
  0xa9   :  { %712 = vmatpush1.bf16.msra.mxu1 %v5888_v51 }
  0xaa   :  { %808 = vmatprep.subr.bf16.mxu1 %v5778_v18 }
 0x13d   :  { %v5950_v57 = vpop.f32.mrb[0].mxu0  ;;  %v314_v63 = vpop.f32.mrb[0].mxu1 }
 0x13e   :  { %v5955_v59 = vpop.f32.mrb[1].mxu0  ;;  %v316_v3 = vpop.f32.mrb[1].mxu1 }
 0x13f   :  { %v245_v62 = vpop.f32.mrb[2].mxu0  ;;  %v318_v6 = vpop.f32.mrb[2].mxu1 }
 0x140   :  { %v5965_v1 = vadd.f32 %v245_v62, %v5953_v58  ;;  %v247_v2 = vpop.f32.mrb[3].mxu0  ;;  %v5970_v7 = vadd.f32 %v318_v6, %v5958_v60  ;;  %v320_v8 = vpop.f32.mrb[3].mxu1 }
 0x141   :  { %v5967_v5 = vadd.f32 %v247_v2, %v130_v61  ;;  %v5973_v9 = vadd.f32 %v320_v8, %v5962_v0 }
 0x145   :  { %v251_v10 = vpop.f32.mrb[4].mxu0  ;;  %v324_v16 = vpop.f32.mrb[4].mxu1 }
 0x146   :  { %v5976_v11 = vadd.f32 %v251_v10, %v5953_v58  ;;  %v253_v12 = vpop.f32.mrb[5].mxu0  ;;  %v5984_v35 = vadd.f32 %v324_v16, %v5958_v60  ;;  %v326_v44 = vpop.f32.mrb[5].mxu1 }
 0x147   :  { %v5978_v13 = vadd.f32 %v253_v12, %v130_v61  ;;  %v255_v15 = vpop.f32.mrb[6].mxu0  ;;  %v5989_v62 = vadd.f32 %v326_v44, %v5962_v0  ;;  %v328_v2 = vpop.f32.mrb[6].mxu1 }
 0x148   :  { %v5981_v17 = vadd.f32 %v255_v15, %v5953_v58  ;;  %v257_v26 = vpop.f32.mrb[7].mxu0  ;;  %v5992_v6 = vadd.f32 %v328_v2, %v5958_v60  ;;  %v330_v8 = vpop.f32.mrb[7].mxu1 }
 0x149   :  { %v5986_v54 = vadd.f32 %v257_v26, %v130_v61  ;;  %7668 = vst [vmem:[#allocation20_spill] sm:$0xff] %v5989_v62  ;;  %v5995_v10 = vadd.f32 %v330_v8, %v5962_v0 }
 0x14a   :  { %7666 = vst [vmem:[#allocation18_spill] sm:$0xff] %v5981_v17  ;;  %7669 = vst [vmem:[#allocation21_spill] sm:$0xff] %v5992_v6 }
 0x14b   :  { %7667 = vst [vmem:[#allocation19_spill] sm:$0xff] %v5986_v54  ;;  %7670 = vst [vmem:[#allocation22_spill] sm:$0xff] %v5995_v10 }
 0x14d   :  { %v261_v12 = vpop.f32.mrb[8].mxu0  ;;  %v334_v56 = vpop.f32.mrb[8].mxu1 }
 0x14e   :  { %v5998_v15 = vadd.f32 %v261_v12, %v5953_v58  ;;  %v263_v16 = vpop.f32.mrb[9].mxu0  ;;  %v6006_v2 = vadd.f32 %v334_v56, %v5958_v60  ;;  %v336_v53 = vpop.f32.mrb[9].mxu1 }
 0x14f   :  { %v6000_v4 = vadd.f32 %v263_v16, %v130_v61  ;;  %v265_v26 = vpop.f32.mrb[10].mxu0  ;;  %v6011_v8 = vadd.f32 %v336_v53, %v5962_v0  ;;  %v338_v12 = vpop.f32.mrb[10].mxu1 }
 0x150   :  { %7671 = vst [vmem:[#allocation23_spill] sm:$0xff] %v5998_v15  ;;  %v6003_v44 = vadd.f32 %v265_v26, %v5953_v58  ;;  %v267_v55 = vpop.f32.mrb[11].mxu0  ;;  %7674 = vst [vmem:[#allocation26_spill] sm:$0xff] %v6006_v2  ;;  %v6014_v15 = vadd.f32 %v338_v12, %v5958_v60  ;;  %v340_v16 = vpop.f32.mrb[11].mxu1 }
 0x151   :  { %7672 = vst [vmem:[#allocation24_spill] sm:$0xff] %v6000_v4  ;;  %v6008_v52 = vadd.f32 %v267_v55, %v130_v61  ;;  %7676 = vst [vmem:[#allocation28_spill] sm:$0xff] %v6011_v8  ;;  %v6017_v4 = vadd.f32 %v340_v16, %v5962_v0 }
 0x152   :  { %7673 = vst [vmem:[#allocation25_spill] sm:$0xff] %v6003_v44  ;;  %7677 = vst [vmem:[#allocation29_spill] sm:$0xff] %v6014_v15 }
 0x153   :  { %7675 = vst [vmem:[#allocation27_spill] sm:$0xff] %v6008_v52  ;;  %7678 = vst [vmem:[#allocation30_spill] sm:$0xff] %v6017_v4 }
 0x155   :  { %v271_v26 = vpop.f32.mrb[12].mxu0  ;;  %v344_v52 = vpop.f32.mrb[12].mxu1 }
 0x156   :  { %v6020_v44 = vadd.f32 %v271_v26, %v5953_v58  ;;  %v273_v56 = vpop.f32.mrb[13].mxu0  ;;  %v6028_v12 = vadd.f32 %v344_v52, %v5958_v60  ;;  %v346_v15 = vpop.f32.mrb[13].mxu1  ;;  %v244_v52 = vadd.f32 %v5955_v59, %v130_v61 }
 0x157   :  { %v6022_v2 = vadd.f32 %v273_v56, %v130_v61  ;;  %v275_v55 = vpop.f32.mrb[14].mxu0  ;;  %v6033_v16 = vadd.f32 %v346_v15, %v5962_v0  ;;  %v348_v26 = vpop.f32.mrb[14].mxu1  ;;  %v317_v15 = vadd.f32 %v316_v3, %v5962_v0 }
 0x158   :  { %7679 = vst [vmem:[#allocation31_spill] sm:$0xff] %v6020_v44  ;;  %v6025_v53 = vadd.f32 %v275_v55, %v5953_v58  ;;  %v277_v8 = vpop.f32.mrb[15].mxu0  ;;  %7682 = vst [vmem:[#allocation34_spill] sm:$0xff] %v6028_v12  ;;  %v6036_v44 = vadd.f32 %v348_v26, %v5958_v60  ;;  %v350_v56 = vpop.f32.mrb[15].mxu1  ;;  %v242_v55 = vadd.f32 %v5950_v57, %v5953_v58 }
 0x159   :  { %7680 = vst [vmem:[#allocation32_spill] sm:$0xff] %v6022_v2  ;;  %v6030_v10 = vadd.f32 %v277_v8, %v130_v61  ;;  %7684 = vst [vmem:[#allocation36_spill] sm:$0xff] %v6033_v16  ;;  %v6039_v2 = vadd.f32 %v350_v56, %v5962_v0  ;;  %v315_v8 = vadd.f32 %v314_v63, %v5958_v60 }
 0x15a   :  { %7681 = vst [vmem:[#allocation33_spill] sm:$0xff] %v6025_v53  ;;  %7685 = vst [vmem:[#allocation37_spill] sm:$0xff] %v6036_v44 }
 0x15b   :  { %7683 = vst [vmem:[#allocation35_spill] sm:$0xff] %v6030_v10  ;;  %7686 = vst [vmem:[#allocation38_spill] sm:$0xff] %v6039_v2 }
 0x15d   :  { %v579_v53 = vpop.f32.mrb[16].mxu0 }
 0x15e   :  { %v627_v10 = vadd.f32 %v579_v53, %v242_v55  ;;  %v581_v12 = vpop.f32.mrb[17].mxu0 }
 0x15f   :  { %v628_v16 = vadd.f32 %v581_v12, %v244_v52  ;;  %v583_v4 = vpop.f32.mrb[18].mxu0  ;;  %v620_v26 = vpop.f32.mrb[16].mxu1 }
 0x160   :  { %v4466_v44 = vmul.f32 -1.442695, %v627_v10  ;;  %v629_v54 = vadd.f32 %v620_v26, %v315_v8  ;;  %v584_v6 = vpop.f32.mrb[19].mxu0  ;;  %v622_v56 = vpop.f32.mrb[17].mxu1 }
 0x161   :  { %v4467_v2 = vmul.f32 -1.442695, %v628_v16  ;;  %v630_v17 = vadd.f32 %v622_v56, %v317_v15  ;;  %v624_v62 = vpop.f32.mrb[18].mxu1  ;;  %v7687_v16 = vmov 0  }
 0x162   :  { %5000 = vpow2.f32 %v4466_v44  ;;  %v625_v57 = vpop.f32.mrb[19].mxu1 }
 0x163   :  { %5002 = vpow2.f32 %v4467_v2  ;;  %v4468_v58 = vmul.f32 -1.442695, %v630_v17 }
 0x165   :  { %5004 = vpow2.f32 %v4468_v58 }
 0x166   :  { %5006 = vtanh.f32 %v629_v54 }
 0x16c   :  { %v5001_v59 = vpop.eup %5000 }
 0x16d   :  { %v5003_v60 = vpop.eup %5002  ;;  %v634_v61 = vadd.f32 1.0, %v5001_v59 }
 0x16e   :  { %v640_v63 = vadd.f32 1.0, %v5003_v60 }
 0x16f   :  { %5008 = vrcp.f32 %v634_v61  ;;  %v5005_v4 = vpop.eup %5004 }
 0x170   :  { %5010 = vrcp.f32 %v640_v63  ;;  %v5007_v0 = vpop.eup %5006  ;;  %v647_v53 = vadd.f32 1.0, %v5005_v4 }
 0x172   :  { %5012 = vrcp.f32 %v647_v53 }
 0x179   :  { %v5009_v3 = vpop.eup %5008 }
 0x17a   :  { %v5011_v6 = vpop.eup %5010  ;;  %v651_v10 = vmul.f32 %v5009_v3, %v5007_v0 }
 0x17b   :  { %v650_v12 = vmul.f32 0.0, %v5011_v6 }
 0x17c   :  { %v5013_v17 = vpop.eup %5012 }
 0x17d   :  { %v6046_v62 = vadd.f32 %v651_v10, %v650_v12 }
 0x17f   :  { %5014 = vtanh.f32 %v6046_v62 }
 0x189   :  { %v5015_v44 = vpop.eup %5014 }
 0x18a   :  { %v6049_v2 = vmul.f32 %v5015_v44, %v5013_v17 }
 0x18c   :  { %v655_v54 = vpack.c.bf16 %v6049_v2, %v6049_v2 }
 0x18e   :  { %689 = vmatmul.mubr.bf16.vlgmr.msra.gmra.mrb[20].mxu0 %v655_v54  ;;  %730 = vmatmul.mubr.bf16.vlgmr.msra.gmra.mrb[20].mxu1 %v655_v54 }
 0x18f   :  { %768 = vmatpush1.bf16.msra.mxu0 %v5780_v19  ;;  %809 = vmatpush1.bf16.msra.mxu1 %v5785_v21 }
 0x190   :  { %769 = vmatprep.subr.bf16.mxu0 %v5783_v20  ;;  %810 = vmatprep.subr.bf16.mxu1 %v5789_v22 }
 0x191   :  { %799 = vmatprep.mubr.bf16.mxu0 %v7687_v16  ;;  %840 = vmatprep.mubr.bf16.mxu1 %v7687_v16 }
 0x193   :  { %770 = vmatpush1.bf16.msra.mxu0 %v5792_v23  ;;  %811 = vmatpush1.bf16.msra.mxu1 %v5800_v25 }
 0x194   :  { %771 = vmatprep.subr.bf16.mxu0 %v5797_v24  ;;  %812 = vmatprep.subr.bf16.mxu1 %v5807_v27 }
 0x197   :  { %772 = vmatpush1.bf16.msra.mxu0 %v5810_v28  ;;  %813 = vmatpush1.bf16.msra.mxu1 %v5816_v30 }
 0x198   :  { %773 = vmatprep.subr.bf16.mxu0 %v5813_v29  ;;  %814 = vmatprep.subr.bf16.mxu1 %v5820_v31 }
 0x19b   :  { %774 = vmatpush1.bf16.msra.mxu0 %v5823_v32  ;;  %815 = vmatpush1.bf16.msra.mxu1 %v5831_v34 }
 0x19c   :  { %775 = vmatprep.subr.bf16.mxu0 %v5828_v33  ;;  %816 = vmatprep.subr.bf16.mxu1 %v5838_v36 }
 0x19f   :  { %776 = vmatpush1.bf16.msra.mxu0 %v5841_v37  ;;  %817 = vmatpush1.bf16.msra.mxu1 %v5847_v39 }
 0x1a0   :  { %777 = vmatprep.subr.bf16.mxu0 %v5844_v38  ;;  %818 = vmatprep.subr.bf16.mxu1 %v5853_v41 }
 0x1a3   :  { %778 = vmatpush1.bf16.msra.mxu0 %v5851_v40  ;;  %819 = vmatpush1.bf16.msra.mxu1 %v5859_v43 }
 0x1a4   :  { %779 = vmatprep.subr.bf16.mxu0 %v5855_v42  ;;  %820 = vmatprep.subr.bf16.mxu1 %v5866_v45 }
 0x1a7   :  { %780 = vmatpush1.bf16.msra.mxu0 %v5870_v46  ;;  %821 = vmatpush1.bf16.msra.mxu1 %v5876_v48 }
 0x1a8   :  { %781 = vmatprep.subr.bf16.mxu0 %v5873_v47  ;;  %822 = vmatprep.subr.bf16.mxu1 %v5879_v49 }
 0x1ab   :  { %782 = vmatpush1.bf16.msra.mxu0 %v5882_v50  ;;  %823 = vmatpush1.bf16.msra.mxu1 %v5888_v51 }
 0x1ac   :  { %878 = vmatprep.subr.bf16.mxu0 %v5773_v14  ;;  %919 = vmatprep.subr.bf16.mxu1 %v5778_v18 }
 0x261   :  { %v690_v55 = vpop.f32.mrb[20].mxu0  ;;  %v731_v52 = vpop.f32.mrb[20].mxu1 }
 0x262   :  { %v738_v8 = vadd.f32 %v690_v55, %v5965_v1  ;;  %v740_v15 = vadd.f32 %v731_v52, %v5970_v7  ;;  %v692_v26 = vpop.f32.mrb[21].mxu0  ;;  %v733_v56 = vpop.f32.mrb[21].mxu1 }
 0x263   :  { %v739_v57 = vadd.f32 %v692_v26, %v5967_v5  ;;  %v741_v58 = vadd.f32 %v733_v56, %v5973_v9  ;;  %v694_v59 = vpop.f32.mrb[22].mxu0  ;;  %v735_v60 = vpop.f32.mrb[22].mxu1 }
 0x264   :  { %v4469_v61 = vmul.f32 -1.442695, %v738_v8  ;;  %v695_v63 = vpop.f32.mrb[23].mxu0  ;;  %v736_v4 = vpop.f32.mrb[23].mxu1 }
 0x265   :  { %v4470_v14 = vmul.f32 -1.442695, %v739_v57  ;;  %v4471_v0 = vmul.f32 -1.442695, %v741_v58 }
 0x266   :  { %5016 = vpow2.f32 %v4469_v61 }
 0x267   :  { %5018 = vpow2.f32 %v4470_v14 }
 0x268   :  { %5020 = vpow2.f32 %v4471_v0 }
 0x269   :  { %5022 = vtanh.f32 %v740_v15 }
 0x270   :  { %v5017_v3 = vpop.eup %5016 }
 0x271   :  { %v5019_v6 = vpop.eup %5018  ;;  %v745_v1 = vadd.f32 1.0, %v5017_v3 }
 0x272   :  { %v751_v7 = vadd.f32 1.0, %v5019_v6  ;;  %v5021_v5 = vpop.eup %5020 }
 0x273   :  { %5024 = vrcp.f32 %v745_v1  ;;  %v5023_v10 = vpop.eup %5022  ;;  %v758_v17 = vadd.f32 1.0, %v5021_v5 }
 0x274   :  { %5026 = vrcp.f32 %v751_v7 }
 0x275   :  { %5028 = vrcp.f32 %v758_v17  ;;  %v6156_v17 = vld [vmem:[#allocation3 + $0x2c] ss:$16 sps:$4 sm:$0xff]  }
 0x27d   :  { %v5025_v9 = vpop.eup %5024 }
 0x27e   :  { %v5027_v53 = vpop.eup %5026  ;;  %v762_v12 = vmul.f32 %v5025_v9, %v5023_v10  ;;  %v6147_v9 = vld [vmem:[#allocation3] ss:$16 sps:$4 sm:$0xff]  }
 0x27f   :  { %v761_v44 = vmul.f32 %v5027_v53, %v6046_v62  ;;  %v5029_v55 = vpop.eup %5028  ;;  %v6150_v53 = vld [vmem:[#allocation3 + $0x8] ss:$16 sps:$4 sm:$0xff]  }
 0x281   :  { %v6092_v54 = vadd.f32 %v762_v12, %v761_v44  ;;  %v6153_v12 = vld [vmem:[#allocation3 + $0x24] ss:$16 sps:$4 sm:$0xff]   ;;  %v6161_v44 = vld [vmem:[#allocation3 + $0x20] ss:$16 sps:$4 sm:$0xff]  }
 0x283   :  { %5030 = vtanh.f32 %v6092_v54 }
 0x28d   :  { %v5031_v52 = vpop.eup %5030 }
 0x28e   :  { %v6095_v8 = vmul.f32 %v5031_v52, %v5029_v55  ;;  %v6167_v55 = vld [vmem:[#allocation3 + $0x44] ss:$16 sps:$4 sm:$0xff]   ;;  %v6170_v52 = vld [vmem:[#allocation3 + $0x4c] ss:$16 sps:$4 sm:$0xff]  }
 0x290   :  { %v766_v15 = vpack.c.bf16 %v6095_v8, %v6095_v8 }
 0x292   :  { %800 = vmatmul.mubr.bf16.vlgmr.msra.gmra.mrb[24].mxu0 %v766_v15  ;;  %841 = vmatmul.mubr.bf16.vlgmr.msra.gmra.mrb[24].mxu1 %v766_v15  ;;  %v6173_v15 = vld [vmem:[#allocation3 + $0x40] ss:$16 sps:$4 sm:$0xff]  }
 0x293   :  { %879 = vmatpush1.bf16.msra.mxu0 %v5780_v19  ;;  %920 = vmatpush1.bf16.msra.mxu1 %v5785_v21  ;;  %v6131_v19 = vld [vmem:[#allocation3 + $0x4] ss:$16 sps:$4 sm:$0xff]  }
 0x294   :  { %880 = vmatprep.subr.bf16.mxu0 %v5783_v20  ;;  %921 = vmatprep.subr.bf16.mxu1 %v5789_v22 }
 0x295   :  { %910 = vmatprep.mubr.bf16.mxu0 %v7687_v16  ;;  %951 = vmatprep.mubr.bf16.mxu1 %v7687_v16 }
 0x297   :  { %881 = vmatpush1.bf16.msra.mxu0 %v5792_v23  ;;  %922 = vmatpush1.bf16.msra.mxu1 %v5800_v25 }
 0x298   :  { %882 = vmatprep.subr.bf16.mxu0 %v5797_v24  ;;  %923 = vmatprep.subr.bf16.mxu1 %v5807_v27 }
 0x29b   :  { %883 = vmatpush1.bf16.msra.mxu0 %v5810_v28  ;;  %924 = vmatpush1.bf16.msra.mxu1 %v5816_v30  ;;  %v7688_v28 = vld [vmem:[#allocation20_spill] sm:$0xff] }
 0x29c   :  { %884 = vmatprep.subr.bf16.mxu0 %v5813_v29  ;;  %925 = vmatprep.subr.bf16.mxu1 %v5820_v31 }
 0x29f   :  { %885 = vmatpush1.bf16.msra.mxu0 %v5823_v32  ;;  %926 = vmatpush1.bf16.msra.mxu1 %v5831_v34 }
 0x2a0   :  { %886 = vmatprep.subr.bf16.mxu0 %v5828_v33  ;;  %927 = vmatprep.subr.bf16.mxu1 %v5838_v36 }
 0x2a3   :  { %887 = vmatpush1.bf16.msra.mxu0 %v5841_v37  ;;  %928 = vmatpush1.bf16.msra.mxu1 %v5847_v39 }
 0x2a4   :  { %888 = vmatprep.subr.bf16.mxu0 %v5844_v38  ;;  %929 = vmatprep.subr.bf16.mxu1 %v5853_v41 }
 0x2a7   :  { %889 = vmatpush1.bf16.msra.mxu0 %v5851_v40  ;;  %930 = vmatpush1.bf16.msra.mxu1 %v5859_v43 }
 0x2a8   :  { %890 = vmatprep.subr.bf16.mxu0 %v5855_v42  ;;  %931 = vmatprep.subr.bf16.mxu1 %v5866_v45 }
 0x2ab   :  { %891 = vmatpush1.bf16.msra.mxu0 %v5870_v46  ;;  %932 = vmatpush1.bf16.msra.mxu1 %v5876_v48 }
 0x2ac   :  { %892 = vmatprep.subr.bf16.mxu0 %v5873_v47  ;;  %933 = vmatprep.subr.bf16.mxu1 %v5879_v49 }
 0x2af   :  { %893 = vmatpush1.bf16.msra.mxu0 %v5882_v50  ;;  %934 = vmatpush1.bf16.msra.mxu1 %v5888_v51 }
 0x2b0   :  { %989 = vmatprep.subr.bf16.mxu0 %v6131_v19  ;;  %1030 = vmatprep.subr.bf16.mxu1 %v5778_v18 }
 0x365   :  { %v801_v20 = vpop.f32.mrb[24].mxu0  ;;  %v842_v21 = vpop.f32.mrb[24].mxu1 }
 0x366   :  { %v849_v22 = vadd.f32 %v801_v20, %v5976_v11  ;;  %v851_v23 = vadd.f32 %v842_v21, %v5984_v35  ;;  %v803_v24 = vpop.f32.mrb[25].mxu0  ;;  %v844_v25 = vpop.f32.mrb[25].mxu1  ;;  %v6176_v20 = vld [vmem:[#allocation3 + $0x48] ss:$16 sps:$4 sm:$0xff]   ;;  %v6179_v21 = vld [vmem:[#allocation3 + $0x64] ss:$16 sps:$4 sm:$0xff]  }
 0x367   :  { %v850_v27 = vadd.f32 %v803_v24, %v5978_v13  ;;  %v852_v29 = vadd.f32 %v844_v25, %v7688_v28  ;;  %v805_v30 = vpop.f32.mrb[26].mxu0  ;;  %v846_v62 = vpop.f32.mrb[26].mxu1 }
 0x368   :  { %v4472_v26 = vmul.f32 -1.442695, %v849_v22  ;;  %v806_v56 = vpop.f32.mrb[27].mxu0  ;;  %v847_v57 = vpop.f32.mrb[27].mxu1 }
 0x369   :  { %v4473_v58 = vmul.f32 -1.442695, %v850_v27  ;;  %v4474_v18 = vmul.f32 -1.442695, %v852_v29 }
 0x36a   :  { %5032 = vpow2.f32 %v4472_v26 }
 0x36b   :  { %5034 = vpow2.f32 %v4473_v58 }
 0x36c   :  { %5036 = vpow2.f32 %v4474_v18 }
 0x36d   :  { %5038 = vtanh.f32 %v851_v23 }
 0x374   :  { %v5033_v59 = vpop.eup %5032 }
 0x375   :  { %v5035_v60 = vpop.eup %5034  ;;  %v856_v11 = vadd.f32 1.0, %v5033_v59 }
 0x376   :  { %v862_v35 = vadd.f32 1.0, %v5035_v60  ;;  %v5037_v13 = vpop.eup %5036 }
 0x377   :  { %5040 = vrcp.f32 %v856_v11  ;;  %v5039_v61 = vpop.eup %5038  ;;  %v869_v0 = vadd.f32 1.0, %v5037_v13  ;;  %v6233_v13 = vld [vmem:[#allocation3 + $0x60] ss:$16 sps:$4 sm:$0xff]  }
 0x378   :  { %5042 = vrcp.f32 %v862_v35  ;;  %v6230_v35 = vld [vmem:[#allocation3 + $0x6c] ss:$16 sps:$4 sm:$0xff]  }
 0x379   :  { %5044 = vrcp.f32 %v869_v0  ;;  %v6248_v0 = vld [vmem:[#allocation3 + $0x88] ss:$16 sps:$4 sm:$0xff]  }
 0x381   :  { %v5041_v63 = vpop.eup %5040 }
 0x382   :  { %v5043_v4 = vpop.eup %5042  ;;  %v873_v14 = vmul.f32 %v5041_v63, %v5039_v61  ;;  %v6236_v61 = vld [vmem:[#allocation3 + $0x68] ss:$16 sps:$4 sm:$0xff]   ;;  %v6239_v63 = vld [vmem:[#allocation3 + $0x84] ss:$16 sps:$4 sm:$0xff]  }
 0x383   :  { %v872_v3 = vmul.f32 %v5043_v4, %v6092_v54  ;;  %v5045_v1 = vpop.eup %5044  ;;  %v6164_v54 = vld [vmem:[#allocation3 + $0x28] ss:$16 sps:$4 sm:$0xff]   ;;  %v6242_v4 = vld [vmem:[#allocation3 + $0x8c] ss:$16 sps:$4 sm:$0xff]  }
 0x385   :  { %v6140_v6 = vadd.f32 %v873_v14, %v872_v3  ;;  %v6245_v14 = vld [vmem:[#allocation3 + $0x80] ss:$16 sps:$4 sm:$0xff]   ;;  %v6251_v3 = vld [vmem:[#allocation3 + $0xa4] ss:$16 sps:$4 sm:$0xff]  }
 0x387   :  { %5046 = vtanh.f32 %v6140_v6 }
 0x391   :  { %v5047_v7 = vpop.eup %5046 }
 0x392   :  { %v6143_v5 = vmul.f32 %v5047_v7, %v5045_v1  ;;  %v6257_v1 = vld [vmem:[#allocation3 + $0xa0] ss:$16 sps:$4 sm:$0xff]   ;;  %v6260_v7 = vld [vmem:[#allocation3 + $0xa8] ss:$16 sps:$4 sm:$0xff]  }
 0x394   :  { %v877_v10 = vpack.c.bf16 %v6143_v5, %v6143_v5 }
 0x396   :  { %911 = vmatmul.mubr.bf16.vlgmr.msra.gmra.mrb[28].mxu0 %v877_v10  ;;  %952 = vmatmul.mubr.bf16.vlgmr.msra.gmra.mrb[28].mxu1 %v877_v10  ;;  %v6263_v10 = vld [vmem:[#allocation3 + $0xc4] ss:$16 sps:$4 sm:$0xff]  }
 0x397   :  { %990 = vmatpush1.bf16.msra.mxu0 %v6147_v9  ;;  %1031 = vmatpush1.bf16.msra.mxu1 %v6150_v53 }
 0x398   :  { %991 = vmatprep.subr.bf16.mxu0 %v6153_v12  ;;  %1032 = vmatprep.subr.bf16.mxu1 %v6156_v17 }
 0x399   :  { %1021 = vmatprep.mubr.bf16.mxu0 %v7687_v16  ;;  %1062 = vmatprep.mubr.bf16.mxu1 %v7687_v16 }
 0x39b   :  { %992 = vmatpush1.bf16.msra.mxu0 %v6161_v44  ;;  %1033 = vmatpush1.bf16.msra.mxu1 %v6164_v54 }
 0x39c   :  { %993 = vmatprep.subr.bf16.mxu0 %v6167_v55  ;;  %1034 = vmatprep.subr.bf16.mxu1 %v6170_v52 }
 0x39f   :  { %994 = vmatpush1.bf16.msra.mxu0 %v6173_v15  ;;  %1035 = vmatpush1.bf16.msra.mxu1 %v6176_v20 }
 0x3a0   :  { %995 = vmatprep.subr.bf16.mxu0 %v6179_v21  ;;  %1036 = vmatprep.subr.bf16.mxu1 %v5820_v31  ;;  %v6202_v31 = vld [vmem:[#allocation3 + $0xc] ss:$16 sps:$4 sm:$0xff]  }
 0x3a3   :  { %996 = vmatpush1.bf16.msra.mxu0 %v5823_v32  ;;  %1037 = vmatpush1.bf16.msra.mxu1 %v5831_v34  ;;  %v7689_v34 = vld [vmem:[#allocation18_spill] sm:$0xff] }
 0x3a4   :  { %997 = vmatprep.subr.bf16.mxu0 %v5828_v33  ;;  %1038 = vmatprep.subr.bf16.mxu1 %v5838_v36 }
 0x3a7   :  { %998 = vmatpush1.bf16.msra.mxu0 %v5841_v37  ;;  %1039 = vmatpush1.bf16.msra.mxu1 %v5847_v39  ;;  %v7690_v37 = vld [vmem:[#allocation21_spill] sm:$0xff] }
 0x3a8   :  { %999 = vmatprep.subr.bf16.mxu0 %v5844_v38  ;;  %1040 = vmatprep.subr.bf16.mxu1 %v5853_v41  ;;  %v7691_v41 = vld [vmem:[#allocation19_spill] sm:$0xff] }
 0x3ab   :  { %1000 = vmatpush1.bf16.msra.mxu0 %v5851_v40  ;;  %1041 = vmatpush1.bf16.msra.mxu1 %v5859_v43  ;;  %v7692_v43 = vld [vmem:[#allocation22_spill] sm:$0xff] }
 0x3ac   :  { %1001 = vmatprep.subr.bf16.mxu0 %v5855_v42  ;;  %1042 = vmatprep.subr.bf16.mxu1 %v5866_v45 }
 0x3af   :  { %1002 = vmatpush1.bf16.msra.mxu0 %v5870_v46  ;;  %1043 = vmatpush1.bf16.msra.mxu1 %v5876_v48 }
 0x3b0   :  { %1003 = vmatprep.subr.bf16.mxu0 %v5873_v47  ;;  %1044 = vmatprep.subr.bf16.mxu1 %v5879_v49 }
 0x3b3   :  { %1004 = vmatpush1.bf16.msra.mxu0 %v5882_v50  ;;  %1045 = vmatpush1.bf16.msra.mxu1 %v5888_v51 }
 0x3b4   :  { %1100 = vmatprep.subr.bf16.mxu0 %v6131_v19  ;;  %1141 = vmatprep.subr.bf16.mxu1 %v6202_v31 }
 0x469   :  { %v912_v32 = vpop.f32.mrb[28].mxu0  ;;  %v953_v33 = vpop.f32.mrb[28].mxu1 }
 0x46a   :  { %v960_v36 = vadd.f32 %v912_v32, %v7689_v34  ;;  %v962_v38 = vadd.f32 %v953_v33, %v7690_v37  ;;  %v914_v39 = vpop.f32.mrb[29].mxu0  ;;  %v955_v40 = vpop.f32.mrb[29].mxu1  ;;  %v6266_v32 = vld [vmem:[#allocation3 + $0xcc] ss:$16 sps:$4 sm:$0xff]   ;;  %v6269_v33 = vld [vmem:[#allocation3 + $0xc0] ss:$16 sps:$4 sm:$0xff]  }
 0x46b   :  { %v961_v42 = vadd.f32 %v914_v39, %v7691_v41  ;;  %v963_v45 = vadd.f32 %v955_v40, %v7692_v43  ;;  %v916_v46 = vpop.f32.mrb[30].mxu0  ;;  %v957_v47 = vpop.f32.mrb[30].mxu1  ;;  %v6272_v34 = vld [vmem:[#allocation3 + $0xc8] ss:$16 sps:$4 sm:$0xff]   ;;  %v6278_v37 = vld [vmem:[#allocation3 + $0xec] ss:$16 sps:$4 sm:$0xff]  }
 0x46c   :  { %v4475_v48 = vmul.f32 -1.442695, %v960_v36  ;;  %v917_v49 = vpop.f32.mrb[31].mxu0  ;;  %v958_v50 = vpop.f32.mrb[31].mxu1  ;;  %v6275_v36 = vld [vmem:[#allocation3 + $0xe4] ss:$16 sps:$4 sm:$0xff]  }
 0x46d   :  { %v4476_v51 = vmul.f32 -1.442695, %v961_v42  ;;  %v4477_v22 = vmul.f32 -1.442695, %v963_v45  ;;  %v6284_v39 = vld [vmem:[#allocation3 + $0xe8] ss:$16 sps:$4 sm:$0xff]  }
 0x46e   :  { %5048 = vpow2.f32 %v4475_v48  ;;  %v7693_v42 = vld [vmem:[#allocation23_spill] sm:$0xff]  ;;  %v7694_v45 = vld [vmem:[#allocation26_spill] sm:$0xff]  ;;  %v7695_v49 = vld [vmem:[#allocation24_spill] sm:$0xff] }
 0x46f   :  { %5050 = vpow2.f32 %v4476_v51  ;;  %v7696_v51 = vld [vmem:[#allocation28_spill] sm:$0xff] }
 0x470   :  { %5052 = vpow2.f32 %v4477_v22 }
 0x471   :  { %5054 = vtanh.f32 %v962_v38  ;;  %v6281_v38 = vld [vmem:[#allocation3 + $0xe0] ss:$16 sps:$4 sm:$0xff]  }
 0x478   :  { %v5049_v23 = vpop.eup %5048 }
 0x479   :  { %v5051_v24 = vpop.eup %5050  ;;  %v967_v25 = vadd.f32 1.0, %v5049_v23 }
 0x47a   :  { %v973_v27 = vadd.f32 1.0, %v5051_v24  ;;  %v5053_v28 = vpop.eup %5052 }
 0x47b   :  { %5056 = vrcp.f32 %v967_v25  ;;  %v5055_v29 = vpop.eup %5054  ;;  %v980_v56 = vadd.f32 1.0, %v5053_v28 }
 0x47c   :  { %5058 = vrcp.f32 %v973_v27 }
 0x47d   :  { %5060 = vrcp.f32 %v980_v56 }
 0x485   :  { %v5057_v30 = vpop.eup %5056 }
 0x486   :  { %v5059_v62 = vpop.eup %5058  ;;  %v984_v26 = vmul.f32 %v5057_v30, %v5055_v29 }
 0x487   :  { %v983_v57 = vmul.f32 %v5059_v62, %v6140_v6  ;;  %v5061_v18 = vpop.eup %5060  ;;  %v6254_v6 = vld [vmem:[#allocation3 + $0xac] ss:$16 sps:$4 sm:$0xff]  }
 0x489   :  { %v6210_v58 = vadd.f32 %v984_v26, %v983_v57 }
 0x48b   :  { %5062 = vtanh.f32 %v6210_v58 }
 0x495   :  { %v5063_v59 = vpop.eup %5062 }
 0x496   :  { %v6213_v60 = vmul.f32 %v5063_v59, %v5061_v18 }
 0x498   :  { %v988_v11 = vpack.c.bf16 %v6213_v60, %v6213_v60 }
 0x49a   :  { %1022 = vmatmul.mubr.bf16.vlgmr.msra.gmra.mrb[32].mxu0 %v988_v11  ;;  %1063 = vmatmul.mubr.bf16.vlgmr.msra.gmra.mrb[32].mxu1 %v988_v11 }
 0x49b   :  { %1101 = vmatpush1.bf16.msra.mxu0 %v6147_v9  ;;  %1142 = vmatpush1.bf16.msra.mxu1 %v6150_v53 }
 0x49c   :  { %1102 = vmatprep.subr.bf16.mxu0 %v6153_v12  ;;  %1143 = vmatprep.subr.bf16.mxu1 %v6156_v17 }
 0x49d   :  { %1132 = vmatprep.mubr.bf16.mxu0 %v7687_v16  ;;  %1173 = vmatprep.mubr.bf16.mxu1 %v7687_v16 }
 0x49f   :  { %1103 = vmatpush1.bf16.msra.mxu0 %v6161_v44  ;;  %1144 = vmatpush1.bf16.msra.mxu1 %v6164_v54 }
 0x4a0   :  { %1104 = vmatprep.subr.bf16.mxu0 %v6167_v55  ;;  %1145 = vmatprep.subr.bf16.mxu1 %v6170_v52 }
 0x4a3   :  { %1105 = vmatpush1.bf16.msra.mxu0 %v6173_v15  ;;  %1146 = vmatpush1.bf16.msra.mxu1 %v6176_v20 }
 0x4a4   :  { %1106 = vmatprep.subr.bf16.mxu0 %v6179_v21  ;;  %1147 = vmatprep.subr.bf16.mxu1 %v6230_v35 }
 0x4a7   :  { %1107 = vmatpush1.bf16.msra.mxu0 %v6233_v13  ;;  %1148 = vmatpush1.bf16.msra.mxu1 %v6236_v61 }
 0x4a8   :  { %1108 = vmatprep.subr.bf16.mxu0 %v6239_v63  ;;  %1149 = vmatprep.subr.bf16.mxu1 %v6242_v4 }
 0x4ab   :  { %1109 = vmatpush1.bf16.msra.mxu0 %v6245_v14  ;;  %1150 = vmatpush1.bf16.msra.mxu1 %v6248_v0 }
 0x4ac   :  { %1110 = vmatprep.subr.bf16.mxu0 %v6251_v3  ;;  %1151 = vmatprep.subr.bf16.mxu1 %v6254_v6 }
 0x4af   :  { %1111 = vmatpush1.bf16.msra.mxu0 %v6257_v1  ;;  %1152 = vmatpush1.bf16.msra.mxu1 %v6260_v7 }
 0x4b0   :  { %1112 = vmatprep.subr.bf16.mxu0 %v6263_v10  ;;  %1153 = vmatprep.subr.bf16.mxu1 %v6266_v32 }
 0x4b3   :  { %1113 = vmatpush1.bf16.msra.mxu0 %v6269_v33  ;;  %1154 = vmatpush1.bf16.msra.mxu1 %v6272_v34 }
 0x4b4   :  { %1114 = vmatprep.subr.bf16.mxu0 %v6275_v36  ;;  %1155 = vmatprep.subr.bf16.mxu1 %v6278_v37 }
 0x4b7   :  { %1115 = vmatpush1.bf16.msra.mxu0 %v6281_v38  ;;  %1156 = vmatpush1.bf16.msra.mxu1 %v6284_v39 }
 0x4b8   :  { %1211 = vmatprep.subr.bf16.mxu0 %v6131_v19  ;;  %1252 = vmatprep.subr.bf16.mxu1 %v6202_v31 }
 0x56d   :  { %v1023_v40 = vpop.f32.mrb[32].mxu0  ;;  %v1064_v41 = vpop.f32.mrb[32].mxu1 }
 0x56e   :  { %v1071_v43 = vadd.f32 %v1023_v40, %v7693_v42  ;;  %v1073_v46 = vadd.f32 %v1064_v41, %v7694_v45  ;;  %v1025_v47 = vpop.f32.mrb[33].mxu0  ;;  %v1066_v48 = vpop.f32.mrb[33].mxu1 }
 0x56f   :  { %v1072_v50 = vadd.f32 %v1025_v47, %v7695_v49  ;;  %v1074_v22 = vadd.f32 %v1066_v48, %v7696_v51  ;;  %v1027_v23 = vpop.f32.mrb[34].mxu0  ;;  %v1068_v24 = vpop.f32.mrb[34].mxu1  ;;  %v7697_v51 = vld [vmem:[#allocation25_spill] sm:$0xff] }
 0x570   :  { %v4478_v25 = vmul.f32 -1.442695, %v1071_v43  ;;  %v1028_v27 = vpop.f32.mrb[35].mxu0  ;;  %v1069_v28 = vpop.f32.mrb[35].mxu1  ;;  %v7698_v23 = vld [vmem:[#allocation29_spill] sm:$0xff] }
 0x571   :  { %v4479_v29 = vmul.f32 -1.442695, %v1072_v50  ;;  %v4480_v30 = vmul.f32 -1.442695, %v1074_v22  ;;  %v7699_v28 = vld [vmem:[#allocation27_spill] sm:$0xff] }
 0x572   :  { %5064 = vpow2.f32 %v4478_v25 }
 0x573   :  { %5066 = vpow2.f32 %v4479_v29 }
 0x574   :  { %5068 = vpow2.f32 %v4480_v30  ;;  %v7700_v30 = vld [vmem:[#allocation30_spill] sm:$0xff] }
 0x575   :  { %5070 = vtanh.f32 %v1073_v46 }
 0x57c   :  { %v5065_v62 = vpop.eup %5064 }
 0x57d   :  { %v5067_v26 = vpop.eup %5066  ;;  %v1078_v56 = vadd.f32 1.0, %v5065_v62 }
 0x57e   :  { %v1084_v57 = vadd.f32 1.0, %v5067_v26  ;;  %v5069_v18 = vpop.eup %5068 }
 0x57f   :  { %5072 = vrcp.f32 %v1078_v56  ;;  %v5071_v59 = vpop.eup %5070  ;;  %v1091_v42 = vadd.f32 1.0, %v5069_v18 }
 0x580   :  { %5074 = vrcp.f32 %v1084_v57 }
 0x581   :  { %5076 = vrcp.f32 %v1091_v42 }
 0x589   :  { %v5073_v11 = vpop.eup %5072 }
 0x58a   :  { %v5075_v40 = vpop.eup %5074  ;;  %v1095_v41 = vmul.f32 %v5073_v11, %v5071_v59 }
 0x58b   :  { %v1094_v43 = vmul.f32 %v5075_v40, %v6210_v58  ;;  %v5077_v47 = vpop.eup %5076 }
 0x58d   :  { %v6294_v45 = vadd.f32 %v1095_v41, %v1094_v43 }
 0x58f   :  { %5078 = vtanh.f32 %v6294_v45 }
 0x599   :  { %v5079_v48 = vpop.eup %5078 }
 0x59a   :  { %v6297_v49 = vmul.f32 %v5079_v48, %v5077_v47 }
 0x59c   :  { %v1099_v46 = vpack.c.bf16 %v6297_v49, %v6297_v49 }
 0x59e   :  { %1133 = vmatmul.mubr.bf16.vlgmr.msra.gmra.mrb[36].mxu0 %v1099_v46  ;;  %1174 = vmatmul.mubr.bf16.vlgmr.msra.gmra.mrb[36].mxu1 %v1099_v46 }
 0x59f   :  { %1212 = vmatpush1.bf16.msra.mxu0 %v6147_v9  ;;  %1253 = vmatpush1.bf16.msra.mxu1 %v6150_v53 }
 0x5a0   :  { %1213 = vmatprep.subr.bf16.mxu0 %v6153_v12  ;;  %1254 = vmatprep.subr.bf16.mxu1 %v6156_v17 }
 0x5a1   :  { %1243 = vmatprep.mubr.bf16.mxu0 %v7687_v16  ;;  %1284 = vmatprep.mubr.bf16.mxu1 %v7687_v16 }
 0x5a3   :  { %1214 = vmatpush1.bf16.msra.mxu0 %v6161_v44  ;;  %1255 = vmatpush1.bf16.msra.mxu1 %v6164_v54 }
 0x5a4   :  { %1215 = vmatprep.subr.bf16.mxu0 %v6167_v55  ;;  %1256 = vmatprep.subr.bf16.mxu1 %v6170_v52 }
 0x5a7   :  { %1216 = vmatpush1.bf16.msra.mxu0 %v6173_v15  ;;  %1257 = vmatpush1.bf16.msra.mxu1 %v6176_v20 }
 0x5a8   :  { %1217 = vmatprep.subr.bf16.mxu0 %v6179_v21  ;;  %1258 = vmatprep.subr.bf16.mxu1 %v6230_v35 }
 0x5ab   :  { %1218 = vmatpush1.bf16.msra.mxu0 %v6233_v13  ;;  %1259 = vmatpush1.bf16.msra.mxu1 %v6236_v61 }
 0x5ac   :  { %1219 = vmatprep.subr.bf16.mxu0 %v6239_v63  ;;  %1260 = vmatprep.subr.bf16.mxu1 %v6242_v4 }
 0x5af   :  { %1220 = vmatpush1.bf16.msra.mxu0 %v6245_v14  ;;  %1261 = vmatpush1.bf16.msra.mxu1 %v6248_v0 }
 0x5b0   :  { %1221 = vmatprep.subr.bf16.mxu0 %v6251_v3  ;;  %1262 = vmatprep.subr.bf16.mxu1 %v6254_v6 }
 0x5b3   :  { %1222 = vmatpush1.bf16.msra.mxu0 %v6257_v1  ;;  %1263 = vmatpush1.bf16.msra.mxu1 %v6260_v7 }
 0x5b4   :  { %1223 = vmatprep.subr.bf16.mxu0 %v6263_v10  ;;  %1264 = vmatprep.subr.bf16.mxu1 %v6266_v32 }
 0x5b7   :  { %1224 = vmatpush1.bf16.msra.mxu0 %v6269_v33  ;;  %1265 = vmatpush1.bf16.msra.mxu1 %v6272_v34 }
 0x5b8   :  { %1225 = vmatprep.subr.bf16.mxu0 %v6275_v36  ;;  %1266 = vmatprep.subr.bf16.mxu1 %v6278_v37 }
 0x5bb   :  { %1226 = vmatpush1.bf16.msra.mxu0 %v6281_v38  ;;  %1267 = vmatpush1.bf16.msra.mxu1 %v6284_v39 }
 0x5bc   :  { %1322 = vmatprep.subr.bf16.mxu0 %v6131_v19  ;;  %1363 = vmatprep.subr.bf16.mxu1 %v6202_v31 }
 0x671   :  { %v1134_v58 = vpop.f32.mrb[36].mxu0  ;;  %v1175_v50 = vpop.f32.mrb[36].mxu1 }
 0x672   :  { %v1182_v22 = vadd.f32 %v1134_v58, %v7697_v51  ;;  %v1184_v24 = vadd.f32 %v1175_v50, %v7698_v23  ;;  %v1136_v25 = vpop.f32.mrb[37].mxu0  ;;  %v1177_v27 = vpop.f32.mrb[37].mxu1 }
 0x673   :  { %v1183_v29 = vadd.f32 %v1136_v25, %v7699_v28  ;;  %v1185_v62 = vadd.f32 %v1177_v27, %v7700_v30  ;;  %v1138_v26 = vpop.f32.mrb[38].mxu0  ;;  %v1179_v56 = vpop.f32.mrb[38].mxu1 }
 0x674   :  { %v4481_v57 = vmul.f32 -1.442695, %v1182_v22  ;;  %v1139_v18 = vpop.f32.mrb[39].mxu0  ;;  %v1180_v59 = vpop.f32.mrb[39].mxu1  ;;  %v4808_v56 = vld [vmem:[#allocation5] ss:$16 sps:$4 sm:$0xff]  }
 0x675   :  { %v4482_v19 = vmul.f32 -1.442695, %v1183_v29  ;;  %v4483_v31 = vmul.f32 -1.442695, %v1185_v62  ;;  %v4816_v59 = vld [vmem:[#allocation5 + $0x24] ss:$16 sps:$4 sm:$0xff]  }
 0x676   :  { %5080 = vpow2.f32 %v4481_v57  ;;  %v4811_v57 = vld [vmem:[#allocation5 + $0x8] ss:$16 sps:$4 sm:$0xff]  }
 0x677   :  { %5082 = vpow2.f32 %v4482_v19  ;;  %v4819_v19 = vld [vmem:[#allocation5 + $0x2c] ss:$16 sps:$4 sm:$0xff]  }
 0x678   :  { %5084 = vpow2.f32 %v4483_v31  ;;  %v4814_v31 = vld [vmem:[#allocation5 + $0x20] ss:$16 sps:$4 sm:$0xff]  }
 0x679   :  { %5086 = vtanh.f32 %v1184_v24 }
 0x680   :  { %v5081_v11 = vpop.eup %5080 }
 0x681   :  { %v5083_v40 = vpop.eup %5082  ;;  %v1189_v41 = vadd.f32 1.0, %v5081_v11  ;;  %v4817_v11 = vld [vmem:[#allocation5 + $0x28] ss:$16 sps:$4 sm:$0xff]  }
 0x682   :  { %v1195_v42 = vadd.f32 1.0, %v5083_v40  ;;  %v5085_v43 = vpop.eup %5084  ;;  %v4822_v40 = vld [vmem:[#allocation5 + $0x44] ss:$16 sps:$4 sm:$0xff]  }
 0x683   :  { %5088 = vrcp.f32 %v1189_v41  ;;  %v5087_v47 = vpop.eup %5086  ;;  %v1202_v50 = vadd.f32 1.0, %v5085_v43  ;;  %v4825_v41 = vld [vmem:[#allocation5 + $0x4c] ss:$16 sps:$4 sm:$0xff]   ;;  %v4823_v43 = vld [vmem:[#allocation5 + $0x48] ss:$16 sps:$4 sm:$0xff]  }
 0x684   :  { %5090 = vrcp.f32 %v1195_v42  ;;  %v4820_v42 = vld [vmem:[#allocation5 + $0x40] ss:$16 sps:$4 sm:$0xff]  }
 0x685   :  { %5092 = vrcp.f32 %v1202_v50  ;;  %v4834_v50 = vld [vmem:[#allocation5 + $0x84] ss:$16 sps:$4 sm:$0xff]  }
 0x68d   :  { %v5089_v48 = vpop.eup %5088 }
 0x68e   :  { %v5091_v46 = vpop.eup %5090  ;;  %v1206_v58 = vmul.f32 %v5089_v48, %v5087_v47  ;;  %v4828_v47 = vld [vmem:[#allocation5 + $0x64] ss:$16 sps:$4 sm:$0xff]   ;;  %v4831_v48 = vld [vmem:[#allocation5 + $0x6c] ss:$16 sps:$4 sm:$0xff]  }
 0x68f   :  { %v1205_v51 = vmul.f32 %v5091_v46, %v6294_v45  ;;  %v5093_v23 = vpop.eup %5092  ;;  %v4826_v46 = vld [vmem:[#allocation5 + $0x60] ss:$16 sps:$4 sm:$0xff]  }
 0x691   :  { %v6340_v22 = vadd.f32 %v1206_v58, %v1205_v51  ;;  %v4829_v58 = vld [vmem:[#allocation5 + $0x68] ss:$16 sps:$4 sm:$0xff]   ;;  %v4837_v51 = vld [vmem:[#allocation5 + $0x8c] ss:$16 sps:$4 sm:$0xff]  }
 0x693   :  { %5094 = vtanh.f32 %v6340_v22 }
 0x69d   :  { %v5095_v25 = vpop.eup %5094 }
 0x69e   :  { %v6343_v27 = vmul.f32 %v5095_v25, %v5093_v23  ;;  %v4835_v23 = vld [vmem:[#allocation5 + $0x88] ss:$16 sps:$4 sm:$0xff]   ;;  %v4840_v25 = vld [vmem:[#allocation5 + $0xa4] ss:$16 sps:$4 sm:$0xff]  }
 0x6a0   :  { %v1210_v24 = vpack.c.bf16 %v6343_v27, %v6343_v27 }
 0x6a2   :  { %1244 = vmatmul.mubr.bf16.vlgmr.msra.gmra.mrb[40].mxu0 %v1210_v24  ;;  %1285 = vmatmul.mubr.bf16.vlgmr.msra.gmra.mrb[40].mxu1 %v1210_v24  ;;  %v4843_v24 = vld [vmem:[#allocation5 + $0xac] ss:$16 sps:$4 sm:$0xff]  }
 0x6a3   :  { %1323 = vmatpush1.bf16.msra.mxu0 %v6147_v9  ;;  %1364 = vmatpush1.bf16.msra.mxu1 %v6150_v53  ;;  %v4810_v9 = vld [vmem:[#allocation5 + $0x4] ss:$16 sps:$4 sm:$0xff]   ;;  %v4813_v53 = vld [vmem:[#allocation5 + $0xc] ss:$16 sps:$4 sm:$0xff]  }
 0x6a4   :  { %1324 = vmatprep.subr.bf16.mxu0 %v6153_v12  ;;  %1365 = vmatprep.subr.bf16.mxu1 %v6156_v17 }
 0x6a5   :  { %1354 = vmatprep.mubr.bf16.mxu0 %v7687_v16  ;;  %1395 = vmatprep.mubr.bf16.mxu1 %v7687_v16 }
 0x6a7   :  { %1325 = vmatpush1.bf16.msra.mxu0 %v6161_v44  ;;  %1366 = vmatpush1.bf16.msra.mxu1 %v6164_v54  ;;  %v7701_v44 = vld [vmem:[#allocation31_spill] sm:$0xff] }
 0x6a8   :  { %1326 = vmatprep.subr.bf16.mxu0 %v6167_v55  ;;  %1367 = vmatprep.subr.bf16.mxu1 %v6170_v52  ;;  %v7702_v55 = vld [vmem:[#allocation34_spill] sm:$0xff] }
 0x6ab   :  { %1327 = vmatpush1.bf16.msra.mxu0 %v6173_v15  ;;  %1368 = vmatpush1.bf16.msra.mxu1 %v6176_v20 }
 0x6ac   :  { %1328 = vmatprep.subr.bf16.mxu0 %v6179_v21  ;;  %1369 = vmatprep.subr.bf16.mxu1 %v6230_v35  ;;  %v7703_v21 = vld [vmem:[#allocation32_spill] sm:$0xff] }
 0x6af   :  { %1329 = vmatpush1.bf16.msra.mxu0 %v6233_v13  ;;  %1370 = vmatpush1.bf16.msra.mxu1 %v6236_v61  ;;  %v7704_v13 = vld [vmem:[#allocation36_spill] sm:$0xff] }
 0x6b0   :  { %1330 = vmatprep.subr.bf16.mxu0 %v6239_v63  ;;  %1371 = vmatprep.subr.bf16.mxu1 %v6242_v4 }
 0x6b3   :  { %1331 = vmatpush1.bf16.msra.mxu0 %v6245_v14  ;;  %1372 = vmatpush1.bf16.msra.mxu1 %v6248_v0 }
 0x6b4   :  { %1332 = vmatprep.subr.bf16.mxu0 %v6251_v3  ;;  %1373 = vmatprep.subr.bf16.mxu1 %v6254_v6 }
 0x6b7   :  { %1333 = vmatpush1.bf16.msra.mxu0 %v6257_v1  ;;  %1374 = vmatpush1.bf16.msra.mxu1 %v6260_v7 }
 0x6b8   :  { %1334 = vmatprep.subr.bf16.mxu0 %v6263_v10  ;;  %1375 = vmatprep.subr.bf16.mxu1 %v6266_v32 }
 0x6bb   :  { %1335 = vmatpush1.bf16.msra.mxu0 %v6269_v33  ;;  %1376 = vmatpush1.bf16.msra.mxu1 %v6272_v34 }
 0x6bc   :  { %1336 = vmatprep.subr.bf16.mxu0 %v6275_v36  ;;  %1377 = vmatprep.subr.bf16.mxu1 %v6278_v37 }
 0x6bf   :  { %1337 = vmatpush1.bf16.msra.mxu0 %v6281_v38  ;;  %1378 = vmatpush1.bf16.msra.mxu1 %v6284_v39 }
 0x6c0   :  { %1650 = vmatprep.subr.bf16.mxu0 %v4810_v9  ;;  %1723 = vmatprep.subr.bf16.mxu1 %v4813_v53  ;;  %v4838_v9 = vld [vmem:[#allocation5 + $0xa0] ss:$16 sps:$4 sm:$0xff]   ;;  %v4841_v53 = vld [vmem:[#allocation5 + $0xa8] ss:$16 sps:$4 sm:$0xff]  }
 0x775   :  { %v1245_v12 = vpop.f32.mrb[40].mxu0  ;;  %v1286_v17 = vpop.f32.mrb[40].mxu1 }
 0x776   :  { %v1293_v54 = vadd.f32 %v1245_v12, %v7701_v44  ;;  %v1295_v52 = vadd.f32 %v1286_v17, %v7702_v55  ;;  %v1247_v15 = vpop.f32.mrb[41].mxu0  ;;  %v1288_v20 = vpop.f32.mrb[41].mxu1  ;;  %v4846_v12 = vld [vmem:[#allocation5 + $0xc4] ss:$16 sps:$4 sm:$0xff]   ;;  %v4849_v17 = vld [vmem:[#allocation5 + $0xcc] ss:$16 sps:$4 sm:$0xff]  }
 0x777   :  { %v1294_v35 = vadd.f32 %v1247_v15, %v7703_v21  ;;  %v1296_v61 = vadd.f32 %v1288_v20, %v7704_v13  ;;  %v1249_v63 = vpop.f32.mrb[42].mxu0  ;;  %v1290_v4 = vpop.f32.mrb[42].mxu1  ;;  %v4844_v44 = vld [vmem:[#allocation5 + $0xc0] ss:$16 sps:$4 sm:$0xff]   ;;  %v4852_v55 = vld [vmem:[#allocation5 + $0xe4] ss:$16 sps:$4 sm:$0xff]   ;;  %v1432_v21 = vpack.c.bf16 %v6095_v8, %v6049_v2  ;;  %v1434_v13 = vpack.c.bf16 %v6343_v27, %v6297_v49 }
 0x778   :  { %v4484_v14 = vmul.f32 -1.442695, %v1293_v54  ;;  %v1250_v0 = vpop.f32.mrb[43].mxu0  ;;  %v1291_v3 = vpop.f32.mrb[43].mxu1  ;;  %v4847_v54 = vld [vmem:[#allocation5 + $0xc8] ss:$16 sps:$4 sm:$0xff]  }
 0x779   :  { %v4485_v6 = vmul.f32 -1.442695, %v1294_v35  ;;  %v4486_v1 = vmul.f32 -1.442695, %v1296_v61  ;;  %v4850_v15 = vld [vmem:[#allocation5 + $0xe0] ss:$16 sps:$4 sm:$0xff]   ;;  %v1433_v35 = vpack.c.bf16 %v6213_v60, %v6143_v5 }
 0x77a   :  { %5096 = vpow2.f32 %v4484_v14  ;;  %v4853_v20 = vld [vmem:[#allocation5 + $0xe8] ss:$16 sps:$4 sm:$0xff]   ;;  %v6405_v2 = vld [vmem:[#allocation7 + $0x4] ss:$16 sps:$4 sm:$0xff]   ;;  %v6407_v8 = vld [vmem:[#allocation7 + $0xc] ss:$16 sps:$4 sm:$0xff]  }
 0x77b   :  { %5098 = vpow2.f32 %v4485_v6  ;;  %v6409_v5 = vld [vmem:[#allocation7] ss:$16 sps:$4 sm:$0xff]   ;;  %v6411_v60 = vld [vmem:[#allocation7 + $0x8] ss:$16 sps:$4 sm:$0xff]   ;;  %v6417_v49 = vld [vmem:[#allocation7 + $0x24] ss:$16 sps:$4 sm:$0xff]  }
 0x77c   :  { %5100 = vpow2.f32 %v4486_v1  ;;  %v6419_v27 = vld [vmem:[#allocation7 + $0x2c] ss:$16 sps:$4 sm:$0xff]   ;;  %v6421_v61 = vld [vmem:[#allocation7 + $0x20] ss:$16 sps:$4 sm:$0xff]   ;;  %v6423_v63 = vld [vmem:[#allocation7 + $0x28] ss:$16 sps:$4 sm:$0xff]  }
 0x77d   :  { %5102 = vtanh.f32 %v1295_v52  ;;  %v4855_v52 = vld [vmem:[#allocation5 + $0xec] ss:$16 sps:$4 sm:$0xff]   ;;  %v6429_v4 = vld [vmem:[#allocation7 + $0x44] ss:$16 sps:$4 sm:$0xff]   ;;  %v6433_v0 = vld [vmem:[#allocation7 + $0x40] ss:$16 sps:$4 sm:$0xff]  }
 0x77e   :  { %v6431_v14 = vld [vmem:[#allocation7 + $0x4c] ss:$16 sps:$4 sm:$0xff]   ;;  %v6435_v3 = vld [vmem:[#allocation7 + $0x48] ss:$16 sps:$4 sm:$0xff]   ;;  %v6441_v6 = vld [vmem:[#allocation7 + $0x64] ss:$16 sps:$4 sm:$0xff]  }
 0x77f   :  { %v6443_v1 = vld [vmem:[#allocation7 + $0x6c] ss:$16 sps:$4 sm:$0xff]  }
 0x784   :  { %v5097_v7 = vpop.eup %5096 }
 0x785   :  { %v5099_v10 = vpop.eup %5098  ;;  %v1300_v32 = vadd.f32 1.0, %v5097_v7  ;;  %v6445_v7 = vld [vmem:[#allocation7 + $0x60] ss:$16 sps:$4 sm:$0xff]  }
 0x786   :  { %v1306_v33 = vadd.f32 1.0, %v5099_v10  ;;  %v5101_v34 = vpop.eup %5100  ;;  %v6447_v10 = vld [vmem:[#allocation7 + $0x68] ss:$16 sps:$4 sm:$0xff]  }
 0x787   :  { %5104 = vrcp.f32 %v1300_v32  ;;  %v5103_v36 = vpop.eup %5102  ;;  %v1313_v45 = vadd.f32 1.0, %v5101_v34  ;;  %v6453_v32 = vld [vmem:[#allocation7 + $0x84] ss:$16 sps:$4 sm:$0xff]   ;;  %v6457_v34 = vld [vmem:[#allocation7 + $0x80] ss:$16 sps:$4 sm:$0xff]  }
 0x788   :  { %5106 = vrcp.f32 %v1306_v33  ;;  %v6455_v33 = vld [vmem:[#allocation7 + $0x8c] ss:$16 sps:$4 sm:$0xff]  }
 0x789   :  { %5108 = vrcp.f32 %v1313_v45  ;;  %v6471_v45 = vld [vmem:[#allocation7 + $0xa8] ss:$16 sps:$4 sm:$0xff]  }
 0x791   :  { %v5105_v37 = vpop.eup %5104 }
 0x792   :  { %v5107_v38 = vpop.eup %5106  ;;  %v1317_v39 = vmul.f32 %v5105_v37, %v5103_v36  ;;  %v6459_v36 = vld [vmem:[#allocation7 + $0x88] ss:$16 sps:$4 sm:$0xff]   ;;  %v6465_v37 = vld [vmem:[#allocation7 + $0xa4] ss:$16 sps:$4 sm:$0xff]  }
 0x793   :  { %v1316_v28 = vmul.f32 %v5107_v38, %v6340_v22  ;;  %v5109_v30 = vpop.eup %5108  ;;  %v4832_v22 = vld [vmem:[#allocation5 + $0x80] ss:$16 sps:$4 sm:$0xff]   ;;  %v6467_v38 = vld [vmem:[#allocation7 + $0xac] ss:$16 sps:$4 sm:$0xff]  }
 0x795   :  { %v6384_v29 = vadd.f32 %v1317_v39, %v1316_v28  ;;  %v6469_v39 = vld [vmem:[#allocation7 + $0xa0] ss:$16 sps:$4 sm:$0xff]   ;;  %v6477_v28 = vld [vmem:[#allocation7 + $0xc4] ss:$16 sps:$4 sm:$0xff]  }
 0x797   :  { %5110 = vtanh.f32 %v6384_v29 }
 0x7a1   :  { %v5111_v62 = vpop.eup %5110 }
 0x7a2   :  { %v6387_v26 = vmul.f32 %v5111_v62, %v5109_v30  ;;  %v6479_v30 = vld [vmem:[#allocation7 + $0xcc] ss:$16 sps:$4 sm:$0xff]   ;;  %v6481_v62 = vld [vmem:[#allocation7 + $0xc0] ss:$16 sps:$4 sm:$0xff]  }
 0x7a4   :  { %v1321_v18 = vpack.c.bf16 %v6387_v26, %v6387_v26 }
 0x7a6   :  { %1355 = vmatmul.mubr.bf16.vlgmr.msra.gmra.mrb[44].mxu0 %v1321_v18  ;;  %1396 = vmatmul.mubr.bf16.vlgmr.msra.gmra.mrb[44].mxu1 %v1321_v18  ;;  %v6491_v18 = vld [vmem:[#allocation7 + $0xec] ss:$16 sps:$4 sm:$0xff]  }
 0x7a7   :  { %1651 = vmatpush1.bf16.msra.mxu0 %v4808_v56  ;;  %1724 = vmatpush1.bf16.msra.mxu1 %v4811_v57  ;;  %v6483_v56 = vld [vmem:[#allocation7 + $0xc8] ss:$16 sps:$4 sm:$0xff]   ;;  %v6489_v57 = vld [vmem:[#allocation7 + $0xe4] ss:$16 sps:$4 sm:$0xff]  }
 0x7a8   :  { %1652 = vmatprep.subr.bf16.mxu0 %v4816_v59  ;;  %1725 = vmatprep.subr.bf16.mxu1 %v4819_v19  ;;  %v6493_v59 = vld [vmem:[#allocation7 + $0xe0] ss:$16 sps:$4 sm:$0xff]   ;;  %v6495_v19 = vld [vmem:[#allocation7 + $0xe8] ss:$16 sps:$4 sm:$0xff]  }
 0x7a9   :  { %1682 = vmatprep.mubr.bf16.mxu0 %v7687_v16  ;;  %1755 = vmatprep.mubr.bf16.mxu1 %v7687_v16 }
 0x7ab   :  { %1653 = vmatpush1.bf16.msra.mxu0 %v4814_v31  ;;  %1726 = vmatpush1.bf16.msra.mxu1 %v4817_v11 }
 0x7ac   :  { %1654 = vmatprep.subr.bf16.mxu0 %v4822_v40  ;;  %1727 = vmatprep.subr.bf16.mxu1 %v4825_v41  ;;  %v7705_v40 = vld [vmem:[#allocation33_spill] sm:$0xff] }
 0x7af   :  { %1655 = vmatpush1.bf16.msra.mxu0 %v4820_v42  ;;  %1728 = vmatpush1.bf16.msra.mxu1 %v4823_v43  ;;  %v7706_v42 = vld [vmem:[#allocation37_spill] sm:$0xff] }
 0x7b0   :  { %1656 = vmatprep.subr.bf16.mxu0 %v4828_v47  ;;  %1729 = vmatprep.subr.bf16.mxu1 %v4831_v48 }
 0x7b3   :  { %1657 = vmatpush1.bf16.msra.mxu0 %v4826_v46  ;;  %1730 = vmatpush1.bf16.msra.mxu1 %v4829_v58  ;;  %v7707_v46 = vld [vmem:[#allocation35_spill] sm:$0xff] }
 0x7b4   :  { %1658 = vmatprep.subr.bf16.mxu0 %v4834_v50  ;;  %1731 = vmatprep.subr.bf16.mxu1 %v4837_v51  ;;  %v7708_v50 = vld [vmem:[#allocation38_spill] sm:$0xff] }
 0x7b7   :  { %1659 = vmatpush1.bf16.msra.mxu0 %v4832_v22  ;;  %1732 = vmatpush1.bf16.msra.mxu1 %v4835_v23 }
 0x7b8   :  { %1660 = vmatprep.subr.bf16.mxu0 %v4840_v25  ;;  %1733 = vmatprep.subr.bf16.mxu1 %v4843_v24 }
 0x7bb   :  { %1661 = vmatpush1.bf16.msra.mxu0 %v4838_v9  ;;  %1734 = vmatpush1.bf16.msra.mxu1 %v4841_v53 }
 0x7bc   :  { %1662 = vmatprep.subr.bf16.mxu0 %v4846_v12  ;;  %1735 = vmatprep.subr.bf16.mxu1 %v4849_v17 }
 0x7bf   :  { %1663 = vmatpush1.bf16.msra.mxu0 %v4844_v44  ;;  %1736 = vmatpush1.bf16.msra.mxu1 %v4847_v54 }
 0x7c0   :  { %1664 = vmatprep.subr.bf16.mxu0 %v4852_v55  ;;  %1737 = vmatprep.subr.bf16.mxu1 %v4855_v52 }
 0x7c3   :  { %1665 = vmatpush1.bf16.msra.mxu0 %v4850_v15  ;;  %1738 = vmatpush1.bf16.msra.mxu1 %v4853_v20 }
 0x7c4   :  { %1988 = vmatprep.subr.bf16.mxu0 %v6405_v2  ;;  %2029 = vmatprep.subr.bf16.mxu1 %v6407_v8 }
 0x7c6   :  { %1683 = vmatmul.mubr.bf16.vlgmr.msra.gmra.mrb[48].mxu0 %v1432_v21  ;;  %1756 = vmatmul.mubr.bf16.vlgmr.msra.gmra.mrb[48].mxu1 %v1432_v21 }
 0x7c7   :  { %1692 = vmatprep.mubr.bf16.mxu0 %v7687_v16  ;;  %1765 = vmatprep.mubr.bf16.mxu1 %v7687_v16 }
 0x7c8   :  { %1989 = vmatpush1.bf16.msra.mxu0 %v6409_v5  ;;  %2030 = vmatpush1.bf16.msra.mxu1 %v6411_v60 }
 0x7c9   :  { %1990 = vmatprep.subr.bf16.mxu0 %v6417_v49  ;;  %2031 = vmatprep.subr.bf16.mxu1 %v6419_v27 }
 0x7cc   :  { %1991 = vmatpush1.bf16.msra.mxu0 %v6421_v61  ;;  %2032 = vmatpush1.bf16.msra.mxu1 %v6423_v63 }
 0x7cd   :  { %1992 = vmatprep.subr.bf16.mxu0 %v6429_v4  ;;  %2033 = vmatprep.subr.bf16.mxu1 %v6431_v14 }
 0x7ce   :  { %1693 = vmatmul.mubr.bf16.gmra.mrb[52].mxu0 %v1433_v35  ;;  %1766 = vmatmul.mubr.bf16.gmra.mrb[52].mxu1 %v1433_v35 }
 0x7cf   :  { %1702 = vmatprep.mubr.bf16.mxu0 %v7687_v16  ;;  %1775 = vmatprep.mubr.bf16.mxu1 %v7687_v16 }
 0x7d0   :  { %1993 = vmatpush1.bf16.msra.mxu0 %v6433_v0  ;;  %2034 = vmatpush1.bf16.msra.mxu1 %v6435_v3 }
 0x7d1   :  { %1994 = vmatprep.subr.bf16.mxu0 %v6441_v6  ;;  %2035 = vmatprep.subr.bf16.mxu1 %v6443_v1 }
 0x7d4   :  { %1995 = vmatpush1.bf16.msra.mxu0 %v6445_v7  ;;  %2036 = vmatpush1.bf16.msra.mxu1 %v6447_v10 }
 0x7d5   :  { %1996 = vmatprep.subr.bf16.mxu0 %v6453_v32  ;;  %2037 = vmatprep.subr.bf16.mxu1 %v6455_v33 }
 0x7d6   :  { %1703 = vmatmul.mubr.bf16.gmra.mrb[56].mxu0 %v1434_v13  ;;  %1776 = vmatmul.mubr.bf16.gmra.mrb[56].mxu1 %v1434_v13 }
 0x7d7   :  { %1712 = vmatprep.mubr.bf16.mxu0 %v7687_v16  ;;  %1785 = vmatprep.mubr.bf16.mxu1 %v7687_v16 }
 0x7d8   :  { %1997 = vmatpush1.bf16.msra.mxu0 %v6457_v34  ;;  %2038 = vmatpush1.bf16.msra.mxu1 %v6459_v36 }
 0x7d9   :  { %1998 = vmatprep.subr.bf16.mxu0 %v6465_v37  ;;  %2039 = vmatprep.subr.bf16.mxu1 %v6467_v38 }
 0x7dc   :  { %1999 = vmatpush1.bf16.msra.mxu0 %v6469_v39  ;;  %2040 = vmatpush1.bf16.msra.mxu1 %v6471_v45 }
 0x7dd   :  { %2000 = vmatprep.subr.bf16.mxu0 %v6477_v28  ;;  %2041 = vmatprep.subr.bf16.mxu1 %v6479_v30 }
 0x7e0   :  { %2001 = vmatpush1.bf16.msra.mxu0 %v6481_v62  ;;  %2042 = vmatpush1.bf16.msra.mxu1 %v6483_v56 }
 0x7e1   :  { %2002 = vmatprep.subr.bf16.mxu0 %v6489_v57  ;;  %2043 = vmatprep.subr.bf16.mxu1 %v6491_v18 }
 0x7e4   :  { %2003 = vmatpush1.bf16.msra.mxu0 %v6493_v59  ;;  %2044 = vmatpush1.bf16.msra.mxu1 %v6495_v19 }
 0x7e5   :  { %2099 = vmatprep.subr.bf16.mxu0 %v6405_v2  ;;  %2140 = vmatprep.subr.bf16.mxu1 %v6407_v8 }
 0x879   :  { %v1356_v31 = vpop.f32.mrb[44].mxu0  ;;  %v1397_v11 = vpop.f32.mrb[44].mxu1 }
 0x87a   :  { %v1404_v41 = vadd.f32 %v1356_v31, %v7705_v40  ;;  %v1406_v43 = vadd.f32 %v1397_v11, %v7706_v42  ;;  %v1358_v47 = vpop.f32.mrb[45].mxu0  ;;  %v1399_v48 = vpop.f32.mrb[45].mxu1 }
 0x87b   :  { %v1405_v58 = vadd.f32 %v1358_v47, %v7707_v46  ;;  %v1407_v51 = vadd.f32 %v1399_v48, %v7708_v50  ;;  %v1360_v22 = vpop.f32.mrb[46].mxu0  ;;  %v1401_v23 = vpop.f32.mrb[46].mxu1 }
 0x87c   :  { %v4487_v25 = vmul.f32 -1.442695, %v1404_v41  ;;  %v1361_v24 = vpop.f32.mrb[47].mxu0  ;;  %v1402_v9 = vpop.f32.mrb[47].mxu1 }
 0x87d   :  { %v4488_v53 = vmul.f32 -1.442695, %v1405_v58  ;;  %v4489_v12 = vmul.f32 -1.442695, %v1407_v51 }
 0x87e   :  { %5112 = vpow2.f32 %v4487_v25 }
 0x87f   :  { %5114 = vpow2.f32 %v4488_v53 }
 0x880   :  { %5116 = vpow2.f32 %v4489_v12 }
 0x881   :  { %5118 = vtanh.f32 %v1406_v43 }
 0x888   :  { %v5113_v17 = vpop.eup %5112 }
 0x889   :  { %v5115_v44 = vpop.eup %5114  ;;  %v1411_v54 = vadd.f32 1.0, %v5113_v17 }
 0x88a   :  { %v1417_v55 = vadd.f32 1.0, %v5115_v44  ;;  %v5117_v52 = vpop.eup %5116 }
 0x88b   :  { %5120 = vrcp.f32 %v1411_v54  ;;  %v5119_v15 = vpop.eup %5118  ;;  %v1424_v13 = vadd.f32 1.0, %v5117_v52 }
 0x88c   :  { %5122 = vrcp.f32 %v1417_v55 }
 0x88d   :  { %5124 = vrcp.f32 %v1424_v13  ;;  %v1468_v13 = vld [vmem:[%s7645_s6] sm:$0xf] }
 0x895   :  { %v5121_v20 = vpop.eup %5120 }
 0x896   :  { %v5123_v21 = vpop.eup %5122  ;;  %v1428_v35 = vmul.f32 %v5121_v20, %v5119_v15 }
 0x897   :  { %v1427_v31 = vmul.f32 %v5123_v21, %v6384_v29  ;;  %v5125_v24 = vpop.eup %5124 }
 0x899   :  { %v6508_v11 = vpop.f32.mrb[48].mxu0  ;;  %v6510_v40 = vpop.f32.mrb[48].mxu1  ;;  %v1429_v41 = vadd.f32 %v1428_v35, %v1427_v31 }
 0x89a   :  { %v6512_v42 = vpop.f32.mrb[49].mxu0  ;;  %v6514_v43 = vpop.f32.mrb[49].mxu1 }
 0x89b   :  { %v6516_v47 = vpop.f32.mrb[50].mxu0  ;;  %v6518_v48 = vpop.f32.mrb[50].mxu1  ;;  %5126 = vtanh.f32 %v1429_v41 }
 0x89c   :  { %v6520_v46 = vpop.f32.mrb[51].mxu0  ;;  %v6522_v58 = vpop.f32.mrb[51].mxu1 }
 0x8a1   :  { %v6524_v29 = vpop.f32.mrb[52].mxu0  ;;  %v6526_v50 = vpop.f32.mrb[52].mxu1 }
 0x8a2   :  { %7709 = vst [vmem:[#allocation20_spill] sm:$0xff] %v6526_v50  ;;  %v6528_v51 = vpop.f32.mrb[53].mxu0  ;;  %v6530_v22 = vpop.f32.mrb[53].mxu1 }
 0x8a3   :  { %7710 = vst [vmem:[#allocation18_spill] sm:$0xff] %v6528_v51  ;;  %7711 = vst [vmem:[#allocation21_spill] sm:$0xff] %v6530_v22  ;;  %v6532_v23 = vpop.f32.mrb[54].mxu0  ;;  %v6534_v25 = vpop.f32.mrb[54].mxu1 }
 0x8a4   :  { %7712 = vst [vmem:[#allocation19_spill] sm:$0xff] %v6532_v23  ;;  %7713 = vst [vmem:[#allocation22_spill] sm:$0xff] %v6534_v25  ;;  %v6536_v9 = vpop.f32.mrb[55].mxu0  ;;  %v6538_v53 = vpop.f32.mrb[55].mxu1 }
 0x8a5   :  { %7714 = vst [vmem:[#allocation23_spill] sm:$0xff] %v6536_v9  ;;  %7715 = vst [vmem:[#allocation26_spill] sm:$0xff] %v6538_v53  ;;  %v5127_v12 = vpop.eup %5126 }
 0x8a6   :  { %v1431_v17 = vmul.f32 %v5127_v12, %v5125_v24 }
 0x8a8   :  { %v1435_v44 = vpack.c.bf16 %v1431_v17, %v6387_v26 }
 0x8a9   :  { %v6541_v54 = vpop.f32.mrb[56].mxu0  ;;  %v6543_v55 = vpop.f32.mrb[56].mxu1 }
 0x8aa   :  { %7716 = vst [vmem:[#allocation24_spill] sm:$0xff] %v6541_v54  ;;  %7717 = vst [vmem:[#allocation28_spill] sm:$0xff] %v6543_v55  ;;  %v6545_v52 = vpop.f32.mrb[57].mxu0  ;;  %v6547_v15 = vpop.f32.mrb[57].mxu1  ;;  %1713 = vmatmul.mubr.bf16.gmra.mrb[60].mxu0 %v1435_v44  ;;  %1786 = vmatmul.mubr.bf16.gmra.mrb[60].mxu1 %v1435_v44 }
 0x8ab   :  { %7718 = vst [vmem:[#allocation25_spill] sm:$0xff] %v6545_v52  ;;  %7719 = vst [vmem:[#allocation29_spill] sm:$0xff] %v6547_v15  ;;  %v6549_v20 = vpop.f32.mrb[58].mxu0  ;;  %v6551_v21 = vpop.f32.mrb[58].mxu1  ;;  %2020 = vmatprep.mubr.bf16.mxu0 %v7687_v16  ;;  %2061 = vmatprep.mubr.bf16.mxu1 %v7687_v16 }
 0x8ac   :  { %7720 = vst [vmem:[#allocation27_spill] sm:$0xff] %v6549_v20  ;;  %7721 = vst [vmem:[#allocation30_spill] sm:$0xff] %v6551_v21  ;;  %v6555_v35 = vpop.f32.mrb[59].mxu0  ;;  %v6557_v26 = vpop.f32.mrb[59].mxu1  ;;  %v7731_v21 = vld [vmem:[#allocation15_spill] sm:$0xff] }
 0x8ad   :  { %7722 = vst [vmem:[#allocation31_spill] sm:$0xff] %v6555_v35  ;;  %7723 = vst [vmem:[#allocation34_spill] sm:$0xff] %v6557_v26  ;;  %v7730_v26 = vld [vmem:[#allocation14_spill] sm:$0xff]  ;;  %v6614_v20 = vrot.slane %v1468_v13, %v7731_v21 }
 0x8ae   :  { %v6611_v35 = vrot.slane %v1468_v13, %v7730_v26 }
 0x8af   :  { %v1758_v26 = vadd.f32 %v6510_v40, %v6614_v20 }
 0x8b2   :  { %2021 = vmatmul.mubr.bf16.vlgmr.msra.gmra.mrb[64].mxu0 %v7687_v16  ;;  %2062 = vmatmul.mubr.bf16.vlgmr.msra.gmra.mrb[64].mxu1 %v7687_v16 }
 0x8b3   :  { %2100 = vmatpush1.bf16.msra.mxu0 %v6409_v5  ;;  %2141 = vmatpush1.bf16.msra.mxu1 %v6411_v60 }
 0x8b4   :  { %2101 = vmatprep.subr.bf16.mxu0 %v6417_v49  ;;  %2142 = vmatprep.subr.bf16.mxu1 %v6419_v27 }
 0x8b5   :  { %2131 = vmatprep.mubr.bf16.mxu0 %v7687_v16  ;;  %2172 = vmatprep.mubr.bf16.mxu1 %v7687_v16 }
 0x8b7   :  { %2102 = vmatpush1.bf16.msra.mxu0 %v6421_v61  ;;  %2143 = vmatpush1.bf16.msra.mxu1 %v6423_v63 }
 0x8b8   :  { %2103 = vmatprep.subr.bf16.mxu0 %v6429_v4  ;;  %2144 = vmatprep.subr.bf16.mxu1 %v6431_v14 }
 0x8bb   :  { %2104 = vmatpush1.bf16.msra.mxu0 %v6433_v0  ;;  %2145 = vmatpush1.bf16.msra.mxu1 %v6435_v3 }
 0x8bc   :  { %2105 = vmatprep.subr.bf16.mxu0 %v6441_v6  ;;  %2146 = vmatprep.subr.bf16.mxu1 %v6443_v1 }
 0x8bf   :  { %2106 = vmatpush1.bf16.msra.mxu0 %v6445_v7  ;;  %2147 = vmatpush1.bf16.msra.mxu1 %v6447_v10 }
 0x8c0   :  { %2107 = vmatprep.subr.bf16.mxu0 %v6453_v32  ;;  %2148 = vmatprep.subr.bf16.mxu1 %v6455_v33 }
 0x8c3   :  { %2108 = vmatpush1.bf16.msra.mxu0 %v6457_v34  ;;  %2149 = vmatpush1.bf16.msra.mxu1 %v6459_v36 }
 0x8c4   :  { %2109 = vmatprep.subr.bf16.mxu0 %v6465_v37  ;;  %2150 = vmatprep.subr.bf16.mxu1 %v6467_v38 }
 0x8c7   :  { %2110 = vmatpush1.bf16.msra.mxu0 %v6469_v39  ;;  %2151 = vmatpush1.bf16.msra.mxu1 %v6471_v45 }
 0x8c8   :  { %2111 = vmatprep.subr.bf16.mxu0 %v6477_v28  ;;  %2152 = vmatprep.subr.bf16.mxu1 %v6479_v30 }
 0x8cb   :  { %2112 = vmatpush1.bf16.msra.mxu0 %v6481_v62  ;;  %2153 = vmatpush1.bf16.msra.mxu1 %v6483_v56 }
 0x8cc   :  { %2113 = vmatprep.subr.bf16.mxu0 %v6489_v57  ;;  %2154 = vmatprep.subr.bf16.mxu1 %v6491_v18 }
 0x8cf   :  { %2114 = vmatpush1.bf16.msra.mxu0 %v6493_v59  ;;  %2155 = vmatpush1.bf16.msra.mxu1 %v6495_v19 }
 0x8d0   :  { %2210 = vmatprep.subr.bf16.mxu0 %v6405_v2  ;;  %2251 = vmatprep.subr.bf16.mxu1 %v6407_v8 }
 0x97d   :  { %v6598_v31 = vpop.f32.mrb[60].mxu0  ;;  %v6600_v41 = vpop.f32.mrb[60].mxu1 }
 0x97e   :  { %7724 = vst [vmem:[#allocation32_spill] sm:$0xff] %v6598_v31  ;;  %7725 = vst [vmem:[#allocation36_spill] sm:$0xff] %v6600_v41  ;;  %v6602_v24 = vpop.f32.mrb[61].mxu0  ;;  %v6604_v12 = vpop.f32.mrb[61].mxu1  ;;  %v7734_v31 = vld [vmem:[#allocation16_spill] sm:$0xff] }
 0x97f   :  { %7726 = vst [vmem:[#allocation33_spill] sm:$0xff] %v6602_v24  ;;  %7727 = vst [vmem:[#allocation37_spill] sm:$0xff] %v6604_v12  ;;  %v6606_v17 = vpop.f32.mrb[62].mxu0  ;;  %v6608_v44 = vpop.f32.mrb[62].mxu1  ;;  %v6621_v41 = vrot.slane %v1468_v13, %v7734_v31  ;;  %v7735_v24 = vld [vmem:[#allocation17_spill] sm:$0xff] }
 0x980   :  { %7728 = vst [vmem:[#allocation35_spill] sm:$0xff] %v6606_v17  ;;  %7729 = vst [vmem:[#allocation38_spill] sm:$0xff] %v6608_v44  ;;  %v6616_v15 = vpop.f32.mrb[63].mxu0  ;;  %v6618_v52 = vpop.f32.mrb[63].mxu1  ;;  %v6624_v55 = vrot.slane %v1468_v13, %v7735_v24  ;;  %v1685_v17 = vadd.f32 %v6508_v11, %v6611_v35 }
 0x981   :  { %7732 = vst [vmem:[#allocation39_spill] sm:$0xff] %v6616_v15  ;;  %7733 = vst [vmem:[#allocation40_spill] sm:$0xff] %v6618_v52  ;;  %v1687_v21 = vadd.f32 %v6512_v42, %v6621_v41 }
 0x982   :  { %v1760_v15 = vadd.f32 %v6514_v43, %v6624_v55 }
 0x985   :  { %v2022_v44 = vpop.f32.mrb[64].mxu0  ;;  %v2063_v52 = vpop.f32.mrb[64].mxu1 }
 0x986   :  { %v2070_v12 = vadd.f32 %v2022_v44, %v1685_v17  ;;  %v2072_v31 = vadd.f32 %v2063_v52, %v1758_v26  ;;  %v2024_v54 = vpop.f32.mrb[65].mxu0  ;;  %v2065_v53 = vpop.f32.mrb[65].mxu1  ;;  %v1764_v44 = vadd.f32 %v6522_v58, %v6624_v55 }
 0x987   :  { %v2071_v13 = vadd.f32 %v2024_v54, %v1687_v21  ;;  %v2073_v24 = vadd.f32 %v2065_v53, %v1760_v15  ;;  %v2026_v9 = vpop.f32.mrb[66].mxu0  ;;  %v2067_v25 = vpop.f32.mrb[66].mxu1 }
 0x988   :  { %v4554_v11 = vmul.f32 -1.442695, %v2070_v12  ;;  %v2027_v23 = vpop.f32.mrb[67].mxu0  ;;  %v2068_v22 = vpop.f32.mrb[67].mxu1  ;;  %v1691_v12 = vadd.f32 %v6520_v46, %v6621_v41 }
 0x989   :  { %v4555_v40 = vmul.f32 -1.442695, %v2071_v13  ;;  %v4556_v42 = vmul.f32 -1.442695, %v2073_v24  ;;  %v1762_v24 = vadd.f32 %v6518_v48, %v6614_v20 }
 0x98a   :  { %5128 = vpow2.f32 %v4554_v11 }
 0x98b   :  { %5130 = vpow2.f32 %v4555_v40 }
 0x98c   :  { %5132 = vpow2.f32 %v4556_v42 }
 0x98d   :  { %5134 = vtanh.f32 %v2072_v31  ;;  %v1689_v31 = vadd.f32 %v6516_v47, %v6611_v35 }
 0x994   :  { %v5129_v51 = vpop.eup %5128 }
 0x995   :  { %v5131_v50 = vpop.eup %5130  ;;  %v2077_v43 = vadd.f32 1.0, %v5129_v51 }
 0x996   :  { %v2083_v17 = vadd.f32 1.0, %v5131_v50  ;;  %v5133_v52 = vpop.eup %5132 }
 0x997   :  { %5136 = vrcp.f32 %v2077_v43  ;;  %v5135_v54 = vpop.eup %5134  ;;  %v2090_v15 = vadd.f32 1.0, %v5133_v52 }
 0x998   :  { %5138 = vrcp.f32 %v2083_v17 }
 0x999   :  { %5140 = vrcp.f32 %v2090_v15 }
 0x9a1   :  { %v5137_v53 = vpop.eup %5136 }
 0x9a2   :  { %v5139_v9 = vpop.eup %5138  ;;  %v2094_v25 = vmul.f32 %v5137_v53, %v5135_v54 }
 0x9a3   :  { %v2093_v23 = vmul.f32 0.0, %v5139_v9  ;;  %v5141_v21 = vpop.eup %5140 }
 0x9a5   :  { %v6634_v22 = vadd.f32 %v2094_v25, %v2093_v23 }
 0x9a7   :  { %5142 = vtanh.f32 %v6634_v22 }
 0x9b1   :  { %v5143_v26 = vpop.eup %5142 }
 0x9b2   :  { %v6637_v51 = vmul.f32 %v5143_v26, %v5141_v21 }
 0x9b4   :  { %v2098_v50 = vpack.c.bf16 %v6637_v51, %v6637_v51 }
 0x9b6   :  { %2132 = vmatmul.mubr.bf16.vlgmr.msra.gmra.mrb[68].mxu0 %v2098_v50  ;;  %2173 = vmatmul.mubr.bf16.vlgmr.msra.gmra.mrb[68].mxu1 %v2098_v50 }
 0x9b7   :  { %2211 = vmatpush1.bf16.msra.mxu0 %v6409_v5  ;;  %2252 = vmatpush1.bf16.msra.mxu1 %v6411_v60 }
 0x9b8   :  { %2212 = vmatprep.subr.bf16.mxu0 %v6417_v49  ;;  %2253 = vmatprep.subr.bf16.mxu1 %v6419_v27 }
 0x9b9   :  { %2242 = vmatprep.mubr.bf16.mxu0 %v7687_v16  ;;  %2283 = vmatprep.mubr.bf16.mxu1 %v7687_v16 }
 0x9bb   :  { %2213 = vmatpush1.bf16.msra.mxu0 %v6421_v61  ;;  %2254 = vmatpush1.bf16.msra.mxu1 %v6423_v63 }
 0x9bc   :  { %2214 = vmatprep.subr.bf16.mxu0 %v6429_v4  ;;  %2255 = vmatprep.subr.bf16.mxu1 %v6431_v14 }
 0x9bf   :  { %2215 = vmatpush1.bf16.msra.mxu0 %v6433_v0  ;;  %2256 = vmatpush1.bf16.msra.mxu1 %v6435_v3 }
 0x9c0   :  { %2216 = vmatprep.subr.bf16.mxu0 %v6441_v6  ;;  %2257 = vmatprep.subr.bf16.mxu1 %v6443_v1 }
 0x9c3   :  { %2217 = vmatpush1.bf16.msra.mxu0 %v6445_v7  ;;  %2258 = vmatpush1.bf16.msra.mxu1 %v6447_v10 }
 0x9c4   :  { %2218 = vmatprep.subr.bf16.mxu0 %v6453_v32  ;;  %2259 = vmatprep.subr.bf16.mxu1 %v6455_v33 }
 0x9c7   :  { %2219 = vmatpush1.bf16.msra.mxu0 %v6457_v34  ;;  %2260 = vmatpush1.bf16.msra.mxu1 %v6459_v36 }
 0x9c8   :  { %2220 = vmatprep.subr.bf16.mxu0 %v6465_v37  ;;  %2261 = vmatprep.subr.bf16.mxu1 %v6467_v38 }
 0x9cb   :  { %2221 = vmatpush1.bf16.msra.mxu0 %v6469_v39  ;;  %2262 = vmatpush1.bf16.msra.mxu1 %v6471_v45 }
 0x9cc   :  { %2222 = vmatprep.subr.bf16.mxu0 %v6477_v28  ;;  %2263 = vmatprep.subr.bf16.mxu1 %v6479_v30 }
 0x9cf   :  { %2223 = vmatpush1.bf16.msra.mxu0 %v6481_v62  ;;  %2264 = vmatpush1.bf16.msra.mxu1 %v6483_v56 }
 0x9d0   :  { %2224 = vmatprep.subr.bf16.mxu0 %v6489_v57  ;;  %2265 = vmatprep.subr.bf16.mxu1 %v6491_v18 }
 0x9d3   :  { %2225 = vmatpush1.bf16.msra.mxu0 %v6493_v59  ;;  %2266 = vmatpush1.bf16.msra.mxu1 %v6495_v19 }
 0x9d4   :  { %2321 = vmatprep.subr.bf16.mxu0 %v6405_v2  ;;  %2362 = vmatprep.subr.bf16.mxu1 %v6407_v8 }
 0xa89   :  { %v2133_v13 = vpop.f32.mrb[68].mxu0  ;;  %v2174_v11 = vpop.f32.mrb[68].mxu1 }
 0xa8a   :  { %v2181_v40 = vadd.f32 %v2133_v13, %v1689_v31  ;;  %v2183_v42 = vadd.f32 %v2174_v11, %v1762_v24  ;;  %v2135_v43 = vpop.f32.mrb[69].mxu0  ;;  %v2176_v17 = vpop.f32.mrb[69].mxu1 }
 0xa8b   :  { %v2182_v52 = vadd.f32 %v2135_v43, %v1691_v12  ;;  %v2184_v54 = vadd.f32 %v2176_v17, %v1764_v44  ;;  %v2137_v53 = vpop.f32.mrb[70].mxu0  ;;  %v2178_v9 = vpop.f32.mrb[70].mxu1 }
 0xa8c   :  { %v4557_v47 = vmul.f32 -1.442695, %v2181_v40  ;;  %v2138_v25 = vpop.f32.mrb[71].mxu0  ;;  %v2179_v15 = vpop.f32.mrb[71].mxu1  ;;  %v7737_v9 = vld [vmem:[#allocation18_spill] sm:$0xff] }
 0xa8d   :  { %v4558_v48 = vmul.f32 -1.442695, %v2182_v52  ;;  %v4559_v46 = vmul.f32 -1.442695, %v2184_v54  ;;  %v7736_v54 = vld [vmem:[#allocation20_spill] sm:$0xff]  ;;  %v7738_v25 = vld [vmem:[#allocation21_spill] sm:$0xff] }
 0xa8e   :  { %5144 = vpow2.f32 %v4557_v47  ;;  %v1768_v53 = vadd.f32 %v7736_v54, %v6614_v20  ;;  %v1697_v47 = vadd.f32 %v7737_v9, %v6621_v41  ;;  %v1770_v15 = vadd.f32 %v7738_v25, %v6624_v55 }
 0xa8f   :  { %5146 = vpow2.f32 %v4558_v48 }
 0xa90   :  { %5148 = vpow2.f32 %v4559_v46 }
 0xa91   :  { %5150 = vtanh.f32 %v2183_v42 }
 0xa98   :  { %v5145_v23 = vpop.eup %5144 }
 0xa99   :  { %v5147_v21 = vpop.eup %5146  ;;  %v2188_v58 = vadd.f32 1.0, %v5145_v23 }
 0xa9a   :  { %v2194_v26 = vadd.f32 1.0, %v5147_v21  ;;  %v5149_v50 = vpop.eup %5148 }
 0xa9b   :  { %5152 = vrcp.f32 %v2188_v58  ;;  %v5151_v31 = vpop.eup %5150  ;;  %v2201_v13 = vadd.f32 1.0, %v5149_v50 }
 0xa9c   :  { %5154 = vrcp.f32 %v2194_v26 }
 0xa9d   :  { %5156 = vrcp.f32 %v2201_v13 }
 0xaa5   :  { %v5153_v24 = vpop.eup %5152 }
 0xaa6   :  { %v5155_v12 = vpop.eup %5154  ;;  %v2205_v44 = vmul.f32 %v5153_v24, %v5151_v31 }
 0xaa7   :  { %v2204_v11 = vmul.f32 %v5155_v12, %v6634_v22  ;;  %v5157_v43 = vpop.eup %5156  ;;  %v1695_v22 = vadd.f32 %v6524_v29, %v6611_v35 }
 0xaa9   :  { %v6684_v40 = vadd.f32 %v2205_v44, %v2204_v11 }
 0xaab   :  { %5158 = vtanh.f32 %v6684_v40 }
 0xab5   :  { %v5159_v17 = vpop.eup %5158 }
 0xab6   :  { %v6687_v52 = vmul.f32 %v5159_v17, %v5157_v43 }
 0xab8   :  { %v2209_v42 = vpack.c.bf16 %v6687_v52, %v6687_v52 }
 0xaba   :  { %2243 = vmatmul.mubr.bf16.vlgmr.msra.gmra.mrb[72].mxu0 %v2209_v42  ;;  %2284 = vmatmul.mubr.bf16.vlgmr.msra.gmra.mrb[72].mxu1 %v2209_v42 }
 0xabb   :  { %2322 = vmatpush1.bf16.msra.mxu0 %v6409_v5  ;;  %2363 = vmatpush1.bf16.msra.mxu1 %v6411_v60 }
 0xabc   :  { %2323 = vmatprep.subr.bf16.mxu0 %v6417_v49  ;;  %2364 = vmatprep.subr.bf16.mxu1 %v6419_v27 }
 0xabd   :  { %2353 = vmatprep.mubr.bf16.mxu0 %v7687_v16  ;;  %2394 = vmatprep.mubr.bf16.mxu1 %v7687_v16 }
 0xabf   :  { %2324 = vmatpush1.bf16.msra.mxu0 %v6421_v61  ;;  %2365 = vmatpush1.bf16.msra.mxu1 %v6423_v63 }
 0xac0   :  { %2325 = vmatprep.subr.bf16.mxu0 %v6429_v4  ;;  %2366 = vmatprep.subr.bf16.mxu1 %v6431_v14 }
 0xac3   :  { %2326 = vmatpush1.bf16.msra.mxu0 %v6433_v0  ;;  %2367 = vmatpush1.bf16.msra.mxu1 %v6435_v3 }
 0xac4   :  { %2327 = vmatprep.subr.bf16.mxu0 %v6441_v6  ;;  %2368 = vmatprep.subr.bf16.mxu1 %v6443_v1 }
 0xac7   :  { %2328 = vmatpush1.bf16.msra.mxu0 %v6445_v7  ;;  %2369 = vmatpush1.bf16.msra.mxu1 %v6447_v10 }
 0xac8   :  { %2329 = vmatprep.subr.bf16.mxu0 %v6453_v32  ;;  %2370 = vmatprep.subr.bf16.mxu1 %v6455_v33 }
 0xacb   :  { %2330 = vmatpush1.bf16.msra.mxu0 %v6457_v34  ;;  %2371 = vmatpush1.bf16.msra.mxu1 %v6459_v36 }
 0xacc   :  { %2331 = vmatprep.subr.bf16.mxu0 %v6465_v37  ;;  %2372 = vmatprep.subr.bf16.mxu1 %v6467_v38 }
 0xacf   :  { %2332 = vmatpush1.bf16.msra.mxu0 %v6469_v39  ;;  %2373 = vmatpush1.bf16.msra.mxu1 %v6471_v45 }
 0xad0   :  { %2333 = vmatprep.subr.bf16.mxu0 %v6477_v28  ;;  %2374 = vmatprep.subr.bf16.mxu1 %v6479_v30 }
 0xad3   :  { %2334 = vmatpush1.bf16.msra.mxu0 %v6481_v62  ;;  %2375 = vmatpush1.bf16.msra.mxu1 %v6483_v56 }
 0xad4   :  { %2335 = vmatprep.subr.bf16.mxu0 %v6489_v57  ;;  %2376 = vmatprep.subr.bf16.mxu1 %v6491_v18 }
 0xad7   :  { %2336 = vmatpush1.bf16.msra.mxu0 %v6493_v59  ;;  %2377 = vmatpush1.bf16.msra.mxu1 %v6495_v19 }
 0xad8   :  { %2432 = vmatprep.subr.bf16.mxu0 %v6405_v2  ;;  %2473 = vmatprep.subr.bf16.mxu1 %v6407_v8 }
 0xb8d   :  { %v2244_v48 = vpop.f32.mrb[72].mxu0  ;;  %v2285_v46 = vpop.f32.mrb[72].mxu1 }
 0xb8e   :  { %v2292_v23 = vadd.f32 %v2244_v48, %v1695_v22  ;;  %v2294_v21 = vadd.f32 %v2285_v46, %v1768_v53  ;;  %v2246_v58 = vpop.f32.mrb[73].mxu0  ;;  %v2287_v26 = vpop.f32.mrb[73].mxu1 }
 0xb8f   :  { %v2293_v50 = vadd.f32 %v2246_v58, %v1697_v47  ;;  %v2295_v31 = vadd.f32 %v2287_v26, %v1770_v15  ;;  %v2248_v24 = vpop.f32.mrb[74].mxu0  ;;  %v2289_v12 = vpop.f32.mrb[74].mxu1 }
 0xb90   :  { %v4560_v29 = vmul.f32 -1.442695, %v2292_v23  ;;  %v2249_v44 = vpop.f32.mrb[75].mxu0  ;;  %v2290_v13 = vpop.f32.mrb[75].mxu1  ;;  %v7740_v24 = vld [vmem:[#allocation22_spill] sm:$0xff] }
 0xb91   :  { %v4561_v11 = vmul.f32 -1.442695, %v2293_v50  ;;  %v4562_v43 = vmul.f32 -1.442695, %v2295_v31  ;;  %v1772_v12 = vadd.f32 %v7740_v24, %v6614_v20  ;;  %v7742_v13 = vld [vmem:[#allocation26_spill] sm:$0xff] }
 0xb92   :  { %5160 = vpow2.f32 %v4560_v29  ;;  %v7741_v29 = vld [vmem:[#allocation23_spill] sm:$0xff] }
 0xb93   :  { %5162 = vpow2.f32 %v4561_v11  ;;  %v1701_v44 = vadd.f32 %v7741_v29, %v6621_v41  ;;  %v1774_v11 = vadd.f32 %v7742_v13, %v6624_v55 }
 0xb94   :  { %5164 = vpow2.f32 %v4562_v43 }
 0xb95   :  { %5166 = vtanh.f32 %v2294_v21 }
 0xb9c   :  { %v5161_v17 = vpop.eup %5160 }
 0xb9d   :  { %v5163_v42 = vpop.eup %5162  ;;  %v2299_v54 = vadd.f32 1.0, %v5161_v17 }
 0xb9e   :  { %v2305_v22 = vadd.f32 1.0, %v5163_v42  ;;  %v5165_v53 = vpop.eup %5164 }
 0xb9f   :  { %5168 = vrcp.f32 %v2299_v54  ;;  %v5167_v9 = vpop.eup %5166  ;;  %v2312_v48 = vadd.f32 1.0, %v5165_v53 }
 0xba0   :  { %5170 = vrcp.f32 %v2305_v22 }
 0xba1   :  { %5172 = vrcp.f32 %v2312_v48 }
 0xba9   :  { %v5169_v47 = vpop.eup %5168 }
 0xbaa   :  { %v5171_v25 = vpop.eup %5170  ;;  %v2316_v15 = vmul.f32 %v5169_v47, %v5167_v9 }
 0xbab   :  { %v2315_v46 = vmul.f32 %v5171_v25, %v6684_v40  ;;  %v5173_v58 = vpop.eup %5172  ;;  %v7739_v40 = vld [vmem:[#allocation19_spill] sm:$0xff] }
 0xbac   :  { %v1699_v31 = vadd.f32 %v7739_v40, %v6611_v35 }
 0xbad   :  { %v6734_v23 = vadd.f32 %v2316_v15, %v2315_v46 }
 0xbaf   :  { %5174 = vtanh.f32 %v6734_v23 }
 0xbb9   :  { %v5175_v26 = vpop.eup %5174 }
 0xbba   :  { %v6737_v50 = vmul.f32 %v5175_v26, %v5173_v58 }
 0xbbc   :  { %v2320_v21 = vpack.c.bf16 %v6737_v50, %v6737_v50 }
 0xbbe   :  { %2354 = vmatmul.mubr.bf16.vlgmr.msra.gmra.mrb[76].mxu0 %v2320_v21  ;;  %2395 = vmatmul.mubr.bf16.vlgmr.msra.gmra.mrb[76].mxu1 %v2320_v21 }
 0xbbf   :  { %2433 = vmatpush1.bf16.msra.mxu0 %v6409_v5  ;;  %2474 = vmatpush1.bf16.msra.mxu1 %v6411_v60 }
 0xbc0   :  { %2434 = vmatprep.subr.bf16.mxu0 %v6417_v49  ;;  %2475 = vmatprep.subr.bf16.mxu1 %v6419_v27 }
 0xbc1   :  { %2464 = vmatprep.mubr.bf16.mxu0 %v7687_v16  ;;  %2505 = vmatprep.mubr.bf16.mxu1 %v7687_v16 }
 0xbc3   :  { %2435 = vmatpush1.bf16.msra.mxu0 %v6421_v61  ;;  %2476 = vmatpush1.bf16.msra.mxu1 %v6423_v63 }
 0xbc4   :  { %2436 = vmatprep.subr.bf16.mxu0 %v6429_v4  ;;  %2477 = vmatprep.subr.bf16.mxu1 %v6431_v14 }
 0xbc7   :  { %2437 = vmatpush1.bf16.msra.mxu0 %v6433_v0  ;;  %2478 = vmatpush1.bf16.msra.mxu1 %v6435_v3 }
 0xbc8   :  { %2438 = vmatprep.subr.bf16.mxu0 %v6441_v6  ;;  %2479 = vmatprep.subr.bf16.mxu1 %v6443_v1 }
 0xbcb   :  { %2439 = vmatpush1.bf16.msra.mxu0 %v6445_v7  ;;  %2480 = vmatpush1.bf16.msra.mxu1 %v6447_v10 }
 0xbcc   :  { %2440 = vmatprep.subr.bf16.mxu0 %v6453_v32  ;;  %2481 = vmatprep.subr.bf16.mxu1 %v6455_v33 }
 0xbcf   :  { %2441 = vmatpush1.bf16.msra.mxu0 %v6457_v34  ;;  %2482 = vmatpush1.bf16.msra.mxu1 %v6459_v36 }
 0xbd0   :  { %2442 = vmatprep.subr.bf16.mxu0 %v6465_v37  ;;  %2483 = vmatprep.subr.bf16.mxu1 %v6467_v38 }
 0xbd3   :  { %2443 = vmatpush1.bf16.msra.mxu0 %v6469_v39  ;;  %2484 = vmatpush1.bf16.msra.mxu1 %v6471_v45 }
 0xbd4   :  { %2444 = vmatprep.subr.bf16.mxu0 %v6477_v28  ;;  %2485 = vmatprep.subr.bf16.mxu1 %v6479_v30 }
 0xbd7   :  { %2445 = vmatpush1.bf16.msra.mxu0 %v6481_v62  ;;  %2486 = vmatpush1.bf16.msra.mxu1 %v6483_v56 }
 0xbd8   :  { %2446 = vmatprep.subr.bf16.mxu0 %v6489_v57  ;;  %2487 = vmatprep.subr.bf16.mxu1 %v6491_v18 }
 0xbdb   :  { %2447 = vmatpush1.bf16.msra.mxu0 %v6493_v59  ;;  %2488 = vmatpush1.bf16.msra.mxu1 %v6495_v19 }
 0xbdc   :  { %2543 = vmatprep.subr.bf16.mxu0 %v6405_v2  ;;  %2584 = vmatprep.subr.bf16.mxu1 %v6407_v8 }
 0xc91   :  { %v2355_v43 = vpop.f32.mrb[76].mxu0  ;;  %v2396_v17 = vpop.f32.mrb[76].mxu1 }
 0xc92   :  { %v2403_v42 = vadd.f32 %v2355_v43, %v1699_v31  ;;  %v2405_v54 = vadd.f32 %v2396_v17, %v1772_v12  ;;  %v2357_v22 = vpop.f32.mrb[77].mxu0  ;;  %v2398_v53 = vpop.f32.mrb[77].mxu1 }
 0xc93   :  { %v2404_v9 = vadd.f32 %v2357_v22, %v1701_v44  ;;  %v2406_v47 = vadd.f32 %v2398_v53, %v1774_v11  ;;  %v2359_v25 = vpop.f32.mrb[78].mxu0  ;;  %v2400_v15 = vpop.f32.mrb[78].mxu1 }
 0xc94   :  { %v4563_v48 = vmul.f32 -1.442695, %v2403_v42  ;;  %v2360_v46 = vpop.f32.mrb[79].mxu0  ;;  %v2401_v58 = vpop.f32.mrb[79].mxu1 }
 0xc95   :  { %v4564_v26 = vmul.f32 -1.442695, %v2404_v9  ;;  %v4565_v21 = vmul.f32 -1.442695, %v2406_v47 }
 0xc96   :  { %5176 = vpow2.f32 %v4563_v48 }
 0xc97   :  { %5178 = vpow2.f32 %v4564_v26 }
 0xc98   :  { %5180 = vpow2.f32 %v4565_v21  ;;  %v6841_v21 = vld [vmem:[#allocation7] ss:$16 sps:$4 sm:$0xff]  }
 0xc99   :  { %5182 = vtanh.f32 %v2405_v54 }
 0xca0   :  { %v5177_v40 = vpop.eup %5176 }
 0xca1   :  { %v5179_v24 = vpop.eup %5178  ;;  %v2410_v29 = vadd.f32 1.0, %v5177_v40  ;;  %v6844_v40 = vld [vmem:[#allocation7 + $0x8] ss:$16 sps:$4 sm:$0xff]  }
 0xca2   :  { %v2416_v31 = vadd.f32 1.0, %v5179_v24  ;;  %v5181_v12 = vpop.eup %5180  ;;  %v6847_v24 = vld [vmem:[#allocation7 + $0x24] ss:$16 sps:$4 sm:$0xff]  }
 0xca3   :  { %5184 = vrcp.f32 %v2410_v29  ;;  %v5183_v44 = vpop.eup %5182  ;;  %v2423_v17 = vadd.f32 1.0, %v5181_v12  ;;  %v6850_v29 = vld [vmem:[#allocation7 + $0x2c] ss:$16 sps:$4 sm:$0xff]   ;;  %v6858_v12 = vld [vmem:[#allocation7 + $0x28] ss:$16 sps:$4 sm:$0xff]  }
 0xca4   :  { %5186 = vrcp.f32 %v2416_v31  ;;  %v6855_v31 = vld [vmem:[#allocation7 + $0x20] ss:$16 sps:$4 sm:$0xff]  }
 0xca5   :  { %5188 = vrcp.f32 %v2423_v17  ;;  %v6873_v17 = vld [vmem:[#allocation7 + $0x64] ss:$16 sps:$4 sm:$0xff]  }
 0xcad   :  { %v5185_v13 = vpop.eup %5184 }
 0xcae   :  { %v5187_v11 = vpop.eup %5186  ;;  %v2427_v43 = vmul.f32 %v5185_v13, %v5183_v44  ;;  %v6861_v44 = vld [vmem:[#allocation7 + $0x44] ss:$16 sps:$4 sm:$0xff]   ;;  %v6864_v13 = vld [vmem:[#allocation7 + $0x4c] ss:$16 sps:$4 sm:$0xff]  }
 0xcaf   :  { %v2426_v42 = vmul.f32 %v5187_v11, %v6734_v23  ;;  %v5189_v53 = vpop.eup %5188  ;;  %v6867_v11 = vld [vmem:[#allocation7 + $0x40] ss:$16 sps:$4 sm:$0xff]  }
 0xcb1   :  { %v6784_v22 = vadd.f32 %v2427_v43, %v2426_v42  ;;  %v6870_v43 = vld [vmem:[#allocation7 + $0x48] ss:$16 sps:$4 sm:$0xff]   ;;  %v6876_v42 = vld [vmem:[#allocation7 + $0x6c] ss:$16 sps:$4 sm:$0xff]  }
 0xcb3   :  { %5190 = vtanh.f32 %v6784_v22 }
 0xcbd   :  { %v5191_v9 = vpop.eup %5190 }
 0xcbe   :  { %v6787_v47 = vmul.f32 %v5191_v9, %v5189_v53  ;;  %v6882_v53 = vld [vmem:[#allocation7 + $0x68] ss:$16 sps:$4 sm:$0xff]   ;;  %v6885_v9 = vld [vmem:[#allocation7 + $0x84] ss:$16 sps:$4 sm:$0xff]  }
 0xcc0   :  { %v2431_v54 = vpack.c.bf16 %v6787_v47, %v6787_v47 }
 0xcc2   :  { %2465 = vmatmul.mubr.bf16.vlgmr.msra.gmra.mrb[80].mxu0 %v2431_v54  ;;  %2506 = vmatmul.mubr.bf16.vlgmr.msra.gmra.mrb[80].mxu1 %v2431_v54  ;;  %v6888_v54 = vld [vmem:[#allocation7 + $0x8c] ss:$16 sps:$4 sm:$0xff]  }
 0xcc3   :  { %2544 = vmatpush1.bf16.msra.mxu0 %v6409_v5  ;;  %2585 = vmatpush1.bf16.msra.mxu1 %v6411_v60  ;;  %v7743_v5 = vld [vmem:[#allocation24_spill] sm:$0xff] }
 0xcc4   :  { %2545 = vmatprep.subr.bf16.mxu0 %v6417_v49  ;;  %2586 = vmatprep.subr.bf16.mxu1 %v6419_v27  ;;  %v1705_v60 = vadd.f32 %v7743_v5, %v6611_v35  ;;  %v7744_v49 = vld [vmem:[#allocation28_spill] sm:$0xff] }
 0xcc5   :  { %2575 = vmatprep.mubr.bf16.mxu0 %v7687_v16  ;;  %2616 = vmatprep.mubr.bf16.mxu1 %v7687_v16  ;;  %v1778_v27 = vadd.f32 %v7744_v49, %v6614_v20  ;;  %v6891_v5 = vld [vmem:[#allocation7 + $0x80] ss:$16 sps:$4 sm:$0xff]   ;;  %v6897_v49 = vld [vmem:[#allocation7 + $0xa4] ss:$16 sps:$4 sm:$0xff]  }
 0xcc7   :  { %2546 = vmatpush1.bf16.msra.mxu0 %v6421_v61  ;;  %2587 = vmatpush1.bf16.msra.mxu1 %v6423_v63  ;;  %v7745_v61 = vld [vmem:[#allocation25_spill] sm:$0xff] }
 0xcc8   :  { %2547 = vmatprep.subr.bf16.mxu0 %v6429_v4  ;;  %2588 = vmatprep.subr.bf16.mxu1 %v6431_v14  ;;  %v1707_v63 = vadd.f32 %v7745_v61, %v6621_v41  ;;  %v7746_v4 = vld [vmem:[#allocation29_spill] sm:$0xff]  ;;  %v6903_v61 = vld [vmem:[#allocation7 + $0xa0] ss:$16 sps:$4 sm:$0xff]  }
 0xcc9   :  { %v1780_v14 = vadd.f32 %v7746_v4, %v6624_v55  ;;  %v6909_v4 = vld [vmem:[#allocation7 + $0xc4] ss:$16 sps:$4 sm:$0xff]  }
 0xccb   :  { %2548 = vmatpush1.bf16.msra.mxu0 %v6433_v0  ;;  %2589 = vmatpush1.bf16.msra.mxu1 %v6435_v3 }
 0xccc   :  { %2549 = vmatprep.subr.bf16.mxu0 %v6441_v6  ;;  %2590 = vmatprep.subr.bf16.mxu1 %v6443_v1 }
 0xccf   :  { %2550 = vmatpush1.bf16.msra.mxu0 %v6445_v7  ;;  %2591 = vmatpush1.bf16.msra.mxu1 %v6447_v10 }
 0xcd0   :  { %2551 = vmatprep.subr.bf16.mxu0 %v6453_v32  ;;  %2592 = vmatprep.subr.bf16.mxu1 %v6455_v33 }
 0xcd3   :  { %2552 = vmatpush1.bf16.msra.mxu0 %v6457_v34  ;;  %2593 = vmatpush1.bf16.msra.mxu1 %v6459_v36 }
 0xcd4   :  { %2553 = vmatprep.subr.bf16.mxu0 %v6465_v37  ;;  %2594 = vmatprep.subr.bf16.mxu1 %v6467_v38 }
 0xcd7   :  { %2554 = vmatpush1.bf16.msra.mxu0 %v6469_v39  ;;  %2595 = vmatpush1.bf16.msra.mxu1 %v6471_v45 }
 0xcd8   :  { %2555 = vmatprep.subr.bf16.mxu0 %v6477_v28  ;;  %2596 = vmatprep.subr.bf16.mxu1 %v6479_v30 }
 0xcdb   :  { %2556 = vmatpush1.bf16.msra.mxu0 %v6481_v62  ;;  %2597 = vmatpush1.bf16.msra.mxu1 %v6483_v56 }
 0xcdc   :  { %2557 = vmatprep.subr.bf16.mxu0 %v6489_v57  ;;  %2598 = vmatprep.subr.bf16.mxu1 %v6491_v18 }
 0xcdf   :  { %2558 = vmatpush1.bf16.msra.mxu0 %v6493_v59  ;;  %2599 = vmatpush1.bf16.msra.mxu1 %v6495_v19 }
 0xce0   :  { %2654 = vmatprep.subr.bf16.mxu0 %v6405_v2  ;;  %2695 = vmatprep.subr.bf16.mxu1 %v6407_v8 }
 0xd95   :  { %v2466_v0 = vpop.f32.mrb[80].mxu0  ;;  %v2507_v3 = vpop.f32.mrb[80].mxu1 }
 0xd96   :  { %v2514_v6 = vadd.f32 %v2466_v0, %v1705_v60  ;;  %v2516_v1 = vadd.f32 %v2507_v3, %v1778_v27  ;;  %v2468_v7 = vpop.f32.mrb[81].mxu0  ;;  %v2509_v2 = vpop.f32.mrb[81].mxu1  ;;  %v6894_v60 = vld [vmem:[#allocation7 + $0x88] ss:$16 sps:$4 sm:$0xff]   ;;  %v6900_v27 = vld [vmem:[#allocation7 + $0xac] ss:$16 sps:$4 sm:$0xff]  }
 0xd97   :  { %v2515_v10 = vadd.f32 %v2468_v7, %v1707_v63  ;;  %v2517_v8 = vadd.f32 %v2509_v2, %v1780_v14  ;;  %v2470_v32 = vpop.f32.mrb[82].mxu0  ;;  %v2511_v33 = vpop.f32.mrb[82].mxu1  ;;  %v6906_v63 = vld [vmem:[#allocation7 + $0xa8] ss:$16 sps:$4 sm:$0xff]   ;;  %v6912_v14 = vld [vmem:[#allocation7 + $0xcc] ss:$16 sps:$4 sm:$0xff]  }
 0xd98   :  { %v4566_v34 = vmul.f32 -1.442695, %v2514_v6  ;;  %v2471_v36 = vpop.f32.mrb[83].mxu0  ;;  %v2512_v37 = vpop.f32.mrb[83].mxu1  ;;  %v6915_v0 = vld [vmem:[#allocation7 + $0xc0] ss:$16 sps:$4 sm:$0xff]  }
 0xd99   :  { %v4567_v38 = vmul.f32 -1.442695, %v2515_v10  ;;  %v4568_v39 = vmul.f32 -1.442695, %v2517_v8  ;;  %v6918_v3 = vld [vmem:[#allocation7 + $0xc8] ss:$16 sps:$4 sm:$0xff]  }
 0xd9a   :  { %5192 = vpow2.f32 %v4566_v34  ;;  %v6921_v6 = vld [vmem:[#allocation7 + $0xe4] ss:$16 sps:$4 sm:$0xff]   ;;  %v6927_v7 = vld [vmem:[#allocation7 + $0xe0] ss:$16 sps:$4 sm:$0xff]   ;;  %v6930_v2 = vld [vmem:[#allocation7 + $0xe8] ss:$16 sps:$4 sm:$0xff]  }
 0xd9b   :  { %5194 = vpow2.f32 %v4567_v38  ;;  %v5446_v10 = vld [vmem:[#allocation7 + $0x4] ss:$16 sps:$4 sm:$0xff]   ;;  %v5447_v8 = vld [vmem:[#allocation7 + $0xc] ss:$16 sps:$4 sm:$0xff]  }
 0xd9c   :  { %5196 = vpow2.f32 %v4568_v39  ;;  %v7747_v32 = vld [vmem:[#allocation27_spill] sm:$0xff]  ;;  %v7748_v34 = vld [vmem:[#allocation30_spill] sm:$0xff] }
 0xd9d   :  { %5198 = vtanh.f32 %v2516_v1  ;;  %v6924_v1 = vld [vmem:[#allocation7 + $0xec] ss:$16 sps:$4 sm:$0xff]   ;;  %v1709_v33 = vadd.f32 %v7747_v32, %v6611_v35  ;;  %v1782_v36 = vadd.f32 %v7748_v34, %v6614_v20  ;;  %v7750_v39 = vld [vmem:[#allocation34_spill] sm:$0xff] }
 0xd9e   :  { %v7749_v37 = vld [vmem:[#allocation31_spill] sm:$0xff] }
 0xd9f   :  { %v1711_v38 = vadd.f32 %v7749_v37, %v6621_v41 }
 0xda4   :  { %v5193_v45 = vpop.eup %5192 }
 0xda5   :  { %v5195_v28 = vpop.eup %5194  ;;  %v2521_v30 = vadd.f32 1.0, %v5193_v45  ;;  %v1784_v45 = vadd.f32 %v7750_v39, %v6624_v55 }
 0xda6   :  { %v2527_v62 = vadd.f32 1.0, %v5195_v28  ;;  %v5197_v56 = vpop.eup %5196 }
 0xda7   :  { %5200 = vrcp.f32 %v2521_v30  ;;  %v5199_v57 = vpop.eup %5198  ;;  %v2534_v23 = vadd.f32 1.0, %v5197_v56 }
 0xda8   :  { %5202 = vrcp.f32 %v2527_v62 }
 0xda9   :  { %5204 = vrcp.f32 %v2534_v23 }
 0xdb1   :  { %v5201_v18 = vpop.eup %5200 }
 0xdb2   :  { %v5203_v59 = vpop.eup %5202  ;;  %v2538_v19 = vmul.f32 %v5201_v18, %v5199_v57 }
 0xdb3   :  { %v2537_v25 = vmul.f32 %v5203_v59, %v6784_v22  ;;  %v5205_v48 = vpop.eup %5204  ;;  %v6879_v22 = vld [vmem:[#allocation7 + $0x60] ss:$16 sps:$4 sm:$0xff]  }
 0xdb5   :  { %v6834_v15 = vadd.f32 %v2538_v19, %v2537_v25 }
 0xdb7   :  { %5206 = vtanh.f32 %v6834_v15 }
 0xdc1   :  { %v5207_v46 = vpop.eup %5206 }
 0xdc2   :  { %v6837_v58 = vmul.f32 %v5207_v46, %v5205_v48 }
 0xdc4   :  { %v2542_v26 = vpack.c.bf16 %v6837_v58, %v6837_v58 }
 0xdc6   :  { %2576 = vmatmul.mubr.bf16.vlgmr.msra.gmra.mrb[84].mxu0 %v2542_v26  ;;  %2617 = vmatmul.mubr.bf16.vlgmr.msra.gmra.mrb[84].mxu1 %v2542_v26 }
 0xdc7   :  { %2655 = vmatpush1.bf16.msra.mxu0 %v6841_v21  ;;  %2696 = vmatpush1.bf16.msra.mxu1 %v6844_v40 }
 0xdc8   :  { %2656 = vmatprep.subr.bf16.mxu0 %v6847_v24  ;;  %2697 = vmatprep.subr.bf16.mxu1 %v6850_v29 }
 0xdc9   :  { %2686 = vmatprep.mubr.bf16.mxu0 %v7687_v16  ;;  %2727 = vmatprep.mubr.bf16.mxu1 %v7687_v16 }
 0xdcb   :  { %2657 = vmatpush1.bf16.msra.mxu0 %v6855_v31  ;;  %2698 = vmatpush1.bf16.msra.mxu1 %v6858_v12 }
 0xdcc   :  { %2658 = vmatprep.subr.bf16.mxu0 %v6861_v44  ;;  %2699 = vmatprep.subr.bf16.mxu1 %v6864_v13 }
 0xdcf   :  { %2659 = vmatpush1.bf16.msra.mxu0 %v6867_v11  ;;  %2700 = vmatpush1.bf16.msra.mxu1 %v6870_v43 }
 0xdd0   :  { %2660 = vmatprep.subr.bf16.mxu0 %v6873_v17  ;;  %2701 = vmatprep.subr.bf16.mxu1 %v6876_v42 }
 0xdd3   :  { %2661 = vmatpush1.bf16.msra.mxu0 %v6879_v22  ;;  %2702 = vmatpush1.bf16.msra.mxu1 %v6882_v53 }
 0xdd4   :  { %2662 = vmatprep.subr.bf16.mxu0 %v6885_v9  ;;  %2703 = vmatprep.subr.bf16.mxu1 %v6888_v54 }
 0xdd7   :  { %2663 = vmatpush1.bf16.msra.mxu0 %v6891_v5  ;;  %2704 = vmatpush1.bf16.msra.mxu1 %v6894_v60 }
 0xdd8   :  { %2664 = vmatprep.subr.bf16.mxu0 %v6897_v49  ;;  %2705 = vmatprep.subr.bf16.mxu1 %v6900_v27 }
 0xddb   :  { %2665 = vmatpush1.bf16.msra.mxu0 %v6903_v61  ;;  %2706 = vmatpush1.bf16.msra.mxu1 %v6906_v63 }
 0xddc   :  { %2666 = vmatprep.subr.bf16.mxu0 %v6909_v4  ;;  %2707 = vmatprep.subr.bf16.mxu1 %v6912_v14 }
 0xddf   :  { %2667 = vmatpush1.bf16.msra.mxu0 %v6915_v0  ;;  %2708 = vmatpush1.bf16.msra.mxu1 %v6918_v3 }
 0xde0   :  { %2668 = vmatprep.subr.bf16.mxu0 %v6921_v6  ;;  %2709 = vmatprep.subr.bf16.mxu1 %v6924_v1 }
 0xde3   :  { %2669 = vmatpush1.bf16.msra.mxu0 %v6927_v7  ;;  %2710 = vmatpush1.bf16.msra.mxu1 %v6930_v2 }
 0xde4   :  { %2765 = vmatprep.subr.bf16.mxu0 %v5446_v10  ;;  %2806 = vmatprep.subr.bf16.mxu1 %v5447_v8 }
 0xe99   :  { %v2577_v28 = vpop.f32.mrb[84].mxu0  ;;  %v2618_v30 = vpop.f32.mrb[84].mxu1 }
 0xe9a   :  { %v2625_v62 = vadd.f32 %v2577_v28, %v1709_v33  ;;  %v2627_v56 = vadd.f32 %v2618_v30, %v1782_v36  ;;  %v2579_v57 = vpop.f32.mrb[85].mxu0  ;;  %v2620_v18 = vpop.f32.mrb[85].mxu1 }
 0xe9b   :  { %v2626_v59 = vadd.f32 %v2579_v57, %v1711_v38  ;;  %v2628_v19 = vadd.f32 %v2620_v18, %v1784_v45  ;;  %v2581_v23 = vpop.f32.mrb[86].mxu0  ;;  %v2622_v25 = vpop.f32.mrb[86].mxu1 }
 0xe9c   :  { %v4569_v48 = vmul.f32 -1.442695, %v2625_v62  ;;  %v2582_v46 = vpop.f32.mrb[87].mxu0  ;;  %v2623_v26 = vpop.f32.mrb[87].mxu1 }
 0xe9d   :  { %v4570_v10 = vmul.f32 -1.442695, %v2626_v59  ;;  %v4571_v8 = vmul.f32 -1.442695, %v2628_v19 }
 0xe9e   :  { %5208 = vpow2.f32 %v4569_v48 }
 0xe9f   :  { %5210 = vpow2.f32 %v4570_v10 }
 0xea0   :  { %5212 = vpow2.f32 %v4571_v8 }
 0xea1   :  { %5214 = vtanh.f32 %v2627_v56 }
 0xea8   :  { %v5209_v32 = vpop.eup %5208 }
 0xea9   :  { %v5211_v34 = vpop.eup %5210  ;;  %v2632_v37 = vadd.f32 1.0, %v5209_v32 }
 0xeaa   :  { %v2638_v33 = vadd.f32 1.0, %v5211_v34  ;;  %v5213_v36 = vpop.eup %5212 }
 0xeab   :  { %5216 = vrcp.f32 %v2632_v37  ;;  %v5215_v38 = vpop.eup %5214  ;;  %v2645_v30 = vadd.f32 1.0, %v5213_v36  ;;  %v4904_v37 = vld [vmem:[#allocation8] ss:$16 sps:$4 sm:$0xff]  }
 0xeac   :  { %5218 = vrcp.f32 %v2638_v33  ;;  %v4907_v33 = vld [vmem:[#allocation8 + $0x8] ss:$16 sps:$4 sm:$0xff]  }
 0xead   :  { %5220 = vrcp.f32 %v2645_v30  ;;  %v4918_v30 = vld [vmem:[#allocation8 + $0x44] ss:$16 sps:$4 sm:$0xff]  }
 0xeb5   :  { %v5217_v39 = vpop.eup %5216 }
 0xeb6   :  { %v5219_v45 = vpop.eup %5218  ;;  %v2649_v28 = vmul.f32 %v5217_v39, %v5215_v38  ;;  %v4912_v38 = vld [vmem:[#allocation8 + $0x24] ss:$16 sps:$4 sm:$0xff]   ;;  %v4915_v39 = vld [vmem:[#allocation8 + $0x2c] ss:$16 sps:$4 sm:$0xff]  }
 0xeb7   :  { %v2648_v62 = vmul.f32 %v5219_v45, %v6834_v15  ;;  %v5221_v18 = vpop.eup %5220  ;;  %v4906_v15 = vld [vmem:[#allocation8 + $0x4] ss:$16 sps:$4 sm:$0xff]   ;;  %v4910_v45 = vld [vmem:[#allocation8 + $0x20] ss:$16 sps:$4 sm:$0xff]  }
 0xeb9   :  { %v6942_v57 = vadd.f32 %v2649_v28, %v2648_v62  ;;  %v4913_v28 = vld [vmem:[#allocation8 + $0x28] ss:$16 sps:$4 sm:$0xff]   ;;  %v4921_v62 = vld [vmem:[#allocation8 + $0x4c] ss:$16 sps:$4 sm:$0xff]  }
 0xebb   :  { %5222 = vtanh.f32 %v6942_v57 }
 0xec5   :  { %v5223_v59 = vpop.eup %5222 }
 0xec6   :  { %v6945_v19 = vmul.f32 %v5223_v59, %v5221_v18  ;;  %v4919_v18 = vld [vmem:[#allocation8 + $0x48] ss:$16 sps:$4 sm:$0xff]   ;;  %v4924_v59 = vld [vmem:[#allocation8 + $0x64] ss:$16 sps:$4 sm:$0xff]  }
 0xec8   :  { %v2653_v56 = vpack.c.bf16 %v6945_v19, %v6945_v19 }
 0xeca   :  { %2687 = vmatmul.mubr.bf16.vlgmr.msra.gmra.mrb[88].mxu0 %v2653_v56  ;;  %2728 = vmatmul.mubr.bf16.vlgmr.msra.gmra.mrb[88].mxu1 %v2653_v56  ;;  %v4927_v56 = vld [vmem:[#allocation8 + $0x6c] ss:$16 sps:$4 sm:$0xff]  }
 0xecb   :  { %2766 = vmatpush1.bf16.msra.mxu0 %v6841_v21  ;;  %2807 = vmatpush1.bf16.msra.mxu1 %v6844_v40  ;;  %v4909_v21 = vld [vmem:[#allocation8 + $0xc] ss:$16 sps:$4 sm:$0xff]   ;;  %v7751_v40 = vld [vmem:[#allocation32_spill] sm:$0xff] }
 0xecc   :  { %2767 = vmatprep.subr.bf16.mxu0 %v6847_v24  ;;  %2808 = vmatprep.subr.bf16.mxu1 %v6850_v29  ;;  %v1715_v24 = vadd.f32 %v7751_v40, %v6611_v35  ;;  %v7752_v29 = vld [vmem:[#allocation36_spill] sm:$0xff] }
 0xecd   :  { %2797 = vmatprep.mubr.bf16.mxu0 %v7687_v16  ;;  %2838 = vmatprep.mubr.bf16.mxu1 %v7687_v16  ;;  %v4930_v40 = vld [vmem:[#allocation8 + $0x84] ss:$16 sps:$4 sm:$0xff]  }
 0xecf   :  { %2768 = vmatpush1.bf16.msra.mxu0 %v6855_v31  ;;  %2809 = vmatpush1.bf16.msra.mxu1 %v6858_v12  ;;  %v1788_v31 = vadd.f32 %v7752_v29, %v6614_v20  ;;  %v7753_v12 = vld [vmem:[#allocation33_spill] sm:$0xff]  ;;  %v4928_v29 = vld [vmem:[#allocation8 + $0x80] ss:$16 sps:$4 sm:$0xff]  }
 0xed0   :  { %2769 = vmatprep.subr.bf16.mxu0 %v6861_v44  ;;  %2810 = vmatprep.subr.bf16.mxu1 %v6864_v13  ;;  %v1717_v44 = vadd.f32 %v7753_v12, %v6621_v41  ;;  %v7754_v13 = vld [vmem:[#allocation37_spill] sm:$0xff]  ;;  %v4936_v12 = vld [vmem:[#allocation8 + $0xa4] ss:$16 sps:$4 sm:$0xff]  }
 0xed3   :  { %2770 = vmatpush1.bf16.msra.mxu0 %v6867_v11  ;;  %2811 = vmatpush1.bf16.msra.mxu1 %v6870_v43  ;;  %v1790_v11 = vadd.f32 %v7754_v13, %v6624_v55  ;;  %v4934_v13 = vld [vmem:[#allocation8 + $0xa0] ss:$16 sps:$4 sm:$0xff]  }
 0xed4   :  { %2771 = vmatprep.subr.bf16.mxu0 %v6873_v17  ;;  %2812 = vmatprep.subr.bf16.mxu1 %v6876_v42 }
 0xed7   :  { %2772 = vmatpush1.bf16.msra.mxu0 %v6879_v22  ;;  %2813 = vmatpush1.bf16.msra.mxu1 %v6882_v53 }
 0xed8   :  { %2773 = vmatprep.subr.bf16.mxu0 %v6885_v9  ;;  %2814 = vmatprep.subr.bf16.mxu1 %v6888_v54 }
 0xedb   :  { %2774 = vmatpush1.bf16.msra.mxu0 %v6891_v5  ;;  %2815 = vmatpush1.bf16.msra.mxu1 %v6894_v60 }
 0xedc   :  { %2775 = vmatprep.subr.bf16.mxu0 %v6897_v49  ;;  %2816 = vmatprep.subr.bf16.mxu1 %v6900_v27 }
 0xedf   :  { %2776 = vmatpush1.bf16.msra.mxu0 %v6903_v61  ;;  %2817 = vmatpush1.bf16.msra.mxu1 %v6906_v63 }
 0xee0   :  { %2777 = vmatprep.subr.bf16.mxu0 %v6909_v4  ;;  %2818 = vmatprep.subr.bf16.mxu1 %v6912_v14 }
 0xee3   :  { %2778 = vmatpush1.bf16.msra.mxu0 %v6915_v0  ;;  %2819 = vmatpush1.bf16.msra.mxu1 %v6918_v3 }
 0xee4   :  { %2779 = vmatprep.subr.bf16.mxu0 %v6921_v6  ;;  %2820 = vmatprep.subr.bf16.mxu1 %v6924_v1 }
 0xee7   :  { %2780 = vmatpush1.bf16.msra.mxu0 %v6927_v7  ;;  %2821 = vmatpush1.bf16.msra.mxu1 %v6930_v2 }
 0xee8   :  { %3093 = vmatprep.subr.bf16.mxu0 %v4906_v15  ;;  %3166 = vmatprep.subr.bf16.mxu1 %v4909_v21  ;;  %v4922_v15 = vld [vmem:[#allocation8 + $0x60] ss:$16 sps:$4 sm:$0xff]   ;;  %v4925_v21 = vld [vmem:[#allocation8 + $0x68] ss:$16 sps:$4 sm:$0xff]  }
 0xf9d   :  { %v2688_v43 = vpop.f32.mrb[88].mxu0  ;;  %v2729_v17 = vpop.f32.mrb[88].mxu1 }
 0xf9e   :  { %v2736_v42 = vadd.f32 %v2688_v43, %v1715_v24  ;;  %v2738_v22 = vadd.f32 %v2729_v17, %v1788_v31  ;;  %v2690_v53 = vpop.f32.mrb[89].mxu0  ;;  %v2731_v9 = vpop.f32.mrb[89].mxu1  ;;  %v4933_v24 = vld [vmem:[#allocation8 + $0x8c] ss:$16 sps:$4 sm:$0xff]   ;;  %v4931_v31 = vld [vmem:[#allocation8 + $0x88] ss:$16 sps:$4 sm:$0xff]  }
 0xf9f   :  { %v2737_v54 = vadd.f32 %v2690_v53, %v1717_v44  ;;  %v2739_v5 = vadd.f32 %v2731_v9, %v1790_v11  ;;  %v2692_v60 = vpop.f32.mrb[90].mxu0  ;;  %v2733_v49 = vpop.f32.mrb[90].mxu1  ;;  %v4939_v44 = vld [vmem:[#allocation8 + $0xac] ss:$16 sps:$4 sm:$0xff]   ;;  %v4937_v11 = vld [vmem:[#allocation8 + $0xa8] ss:$16 sps:$4 sm:$0xff]  }
 0xfa0   :  { %v4572_v27 = vmul.f32 -1.442695, %v2736_v42  ;;  %v2693_v61 = vpop.f32.mrb[91].mxu0  ;;  %v2734_v63 = vpop.f32.mrb[91].mxu1  ;;  %v4942_v43 = vld [vmem:[#allocation8 + $0xc4] ss:$16 sps:$4 sm:$0xff]   ;;  %v2875_v60 = vpack.c.bf16 %v6687_v52, %v6637_v51  ;;  %v2876_v49 = vpack.c.bf16 %v6787_v47, %v6737_v50 }
 0xfa1   :  { %v4573_v4 = vmul.f32 -1.442695, %v2737_v54  ;;  %v4574_v14 = vmul.f32 -1.442695, %v2739_v5  ;;  %v4945_v17 = vld [vmem:[#allocation8 + $0xcc] ss:$16 sps:$4 sm:$0xff]  }
 0xfa2   :  { %5224 = vpow2.f32 %v4572_v27  ;;  %v4940_v42 = vld [vmem:[#allocation8 + $0xc0] ss:$16 sps:$4 sm:$0xff]   ;;  %v4948_v53 = vld [vmem:[#allocation8 + $0xe4] ss:$16 sps:$4 sm:$0xff]   ;;  %v4951_v9 = vld [vmem:[#allocation8 + $0xec] ss:$16 sps:$4 sm:$0xff]   ;;  %v2877_v27 = vpack.c.bf16 %v6945_v19, %v6837_v58 }
 0xfa3   :  { %5226 = vpow2.f32 %v4573_v4  ;;  %v4946_v54 = vld [vmem:[#allocation8 + $0xe0] ss:$16 sps:$4 sm:$0xff]   ;;  %v4949_v5 = vld [vmem:[#allocation8 + $0xe8] ss:$16 sps:$4 sm:$0xff]   ;;  %v7011_v51 = vld [vmem:[#allocation10 + $0x4] ss:$16 sps:$4 sm:$0xff]  }
 0xfa4   :  { %5228 = vpow2.f32 %v4574_v14  ;;  %v7013_v52 = vld [vmem:[#allocation10 + $0xc] ss:$16 sps:$4 sm:$0xff]   ;;  %v7015_v50 = vld [vmem:[#allocation10] ss:$16 sps:$4 sm:$0xff]   ;;  %v7017_v47 = vld [vmem:[#allocation10 + $0x8] ss:$16 sps:$4 sm:$0xff]  }
 0xfa5   :  { %5230 = vtanh.f32 %v2738_v22  ;;  %v4943_v22 = vld [vmem:[#allocation8 + $0xc8] ss:$16 sps:$4 sm:$0xff]   ;;  %v7023_v58 = vld [vmem:[#allocation10 + $0x24] ss:$16 sps:$4 sm:$0xff]   ;;  %v7025_v19 = vld [vmem:[#allocation10 + $0x2c] ss:$16 sps:$4 sm:$0xff]  }
 0xfa6   :  { %v7027_v61 = vld [vmem:[#allocation10 + $0x20] ss:$16 sps:$4 sm:$0xff]   ;;  %v7029_v63 = vld [vmem:[#allocation10 + $0x28] ss:$16 sps:$4 sm:$0xff]   ;;  %v7035_v4 = vld [vmem:[#allocation10 + $0x44] ss:$16 sps:$4 sm:$0xff]  }
 0xfa7   :  { %v7037_v14 = vld [vmem:[#allocation10 + $0x4c] ss:$16 sps:$4 sm:$0xff]  }
 0xfac   :  { %v5225_v0 = vpop.eup %5224 }
 0xfad   :  { %v5227_v3 = vpop.eup %5226  ;;  %v2743_v6 = vadd.f32 1.0, %v5225_v0  ;;  %v7039_v0 = vld [vmem:[#allocation10 + $0x40] ss:$16 sps:$4 sm:$0xff]  }
 0xfae   :  { %v2749_v1 = vadd.f32 1.0, %v5227_v3  ;;  %v5229_v7 = vpop.eup %5228  ;;  %v7041_v3 = vld [vmem:[#allocation10 + $0x48] ss:$16 sps:$4 sm:$0xff]  }
 0xfaf   :  { %5232 = vrcp.f32 %v2743_v6  ;;  %v5231_v2 = vpop.eup %5230  ;;  %v2756_v46 = vadd.f32 1.0, %v5229_v7  ;;  %v7047_v6 = vld [vmem:[#allocation10 + $0x64] ss:$16 sps:$4 sm:$0xff]   ;;  %v7051_v7 = vld [vmem:[#allocation10 + $0x60] ss:$16 sps:$4 sm:$0xff]  }
 0xfb0   :  { %5234 = vrcp.f32 %v2749_v1  ;;  %v7049_v1 = vld [vmem:[#allocation10 + $0x6c] ss:$16 sps:$4 sm:$0xff]  }
 0xfb1   :  { %5236 = vrcp.f32 %v2756_v46  ;;  %v7065_v46 = vld [vmem:[#allocation10 + $0x88] ss:$16 sps:$4 sm:$0xff]  }
 0xfb9   :  { %v5233_v23 = vpop.eup %5232 }
 0xfba   :  { %v5235_v25 = vpop.eup %5234  ;;  %v2760_v48 = vmul.f32 %v5233_v23, %v5231_v2  ;;  %v7053_v2 = vld [vmem:[#allocation10 + $0x68] ss:$16 sps:$4 sm:$0xff]   ;;  %v7059_v23 = vld [vmem:[#allocation10 + $0x84] ss:$16 sps:$4 sm:$0xff]  }
 0xfbb   :  { %v2759_v26 = vmul.f32 %v5235_v25, %v6942_v57  ;;  %v5237_v8 = vpop.eup %5236  ;;  %v4916_v57 = vld [vmem:[#allocation8 + $0x40] ss:$16 sps:$4 sm:$0xff]   ;;  %v7061_v25 = vld [vmem:[#allocation10 + $0x8c] ss:$16 sps:$4 sm:$0xff]  }
 0xfbd   :  { %v6990_v10 = vadd.f32 %v2760_v48, %v2759_v26  ;;  %v7063_v48 = vld [vmem:[#allocation10 + $0x80] ss:$16 sps:$4 sm:$0xff]   ;;  %v7071_v26 = vld [vmem:[#allocation10 + $0xa4] ss:$16 sps:$4 sm:$0xff]  }
 0xfbf   :  { %5238 = vtanh.f32 %v6990_v10 }
 0xfc9   :  { %v5239_v32 = vpop.eup %5238 }
 0xfca   :  { %v6993_v34 = vmul.f32 %v5239_v32, %v5237_v8  ;;  %v7073_v8 = vld [vmem:[#allocation10 + $0xac] ss:$16 sps:$4 sm:$0xff]   ;;  %v7075_v32 = vld [vmem:[#allocation10 + $0xa0] ss:$16 sps:$4 sm:$0xff]  }
 0xfcc   :  { %v2764_v36 = vpack.c.bf16 %v6993_v34, %v6993_v34 }
 0xfce   :  { %2798 = vmatmul.mubr.bf16.vlgmr.msra.gmra.mrb[92].mxu0 %v2764_v36  ;;  %2839 = vmatmul.mubr.bf16.vlgmr.msra.gmra.mrb[92].mxu1 %v2764_v36  ;;  %v7085_v36 = vld [vmem:[#allocation10 + $0xcc] ss:$16 sps:$4 sm:$0xff]  }
 0xfcf   :  { %3094 = vmatpush1.bf16.msra.mxu0 %v4904_v37  ;;  %3167 = vmatpush1.bf16.msra.mxu1 %v4907_v33  ;;  %v7077_v37 = vld [vmem:[#allocation10 + $0xa8] ss:$16 sps:$4 sm:$0xff]   ;;  %v7083_v33 = vld [vmem:[#allocation10 + $0xc4] ss:$16 sps:$4 sm:$0xff]  }
 0xfd0   :  { %3095 = vmatprep.subr.bf16.mxu0 %v4912_v38  ;;  %3168 = vmatprep.subr.bf16.mxu1 %v4915_v39  ;;  %v7087_v38 = vld [vmem:[#allocation10 + $0xc0] ss:$16 sps:$4 sm:$0xff]   ;;  %v7089_v39 = vld [vmem:[#allocation10 + $0xc8] ss:$16 sps:$4 sm:$0xff]  }
 0xfd1   :  { %3125 = vmatprep.mubr.bf16.mxu0 %v7687_v16  ;;  %3198 = vmatprep.mubr.bf16.mxu1 %v7687_v16 }
 0xfd3   :  { %3096 = vmatpush1.bf16.msra.mxu0 %v4910_v45  ;;  %3169 = vmatpush1.bf16.msra.mxu1 %v4913_v28  ;;  %v7095_v45 = vld [vmem:[#allocation10 + $0xe4] ss:$16 sps:$4 sm:$0xff]   ;;  %v7097_v28 = vld [vmem:[#allocation10 + $0xec] ss:$16 sps:$4 sm:$0xff]  }
 0xfd4   :  { %3097 = vmatprep.subr.bf16.mxu0 %v4918_v30  ;;  %3170 = vmatprep.subr.bf16.mxu1 %v4921_v62  ;;  %v7099_v30 = vld [vmem:[#allocation10 + $0xe0] ss:$16 sps:$4 sm:$0xff]   ;;  %v7101_v62 = vld [vmem:[#allocation10 + $0xe8] ss:$16 sps:$4 sm:$0xff]  }
 0xfd7   :  { %3098 = vmatpush1.bf16.msra.mxu0 %v4916_v57  ;;  %3171 = vmatpush1.bf16.msra.mxu1 %v4919_v18  ;;  %v7755_v57 = vld [vmem:[#allocation35_spill] sm:$0xff] }
 0xfd8   :  { %3099 = vmatprep.subr.bf16.mxu0 %v4924_v59  ;;  %3172 = vmatprep.subr.bf16.mxu1 %v4927_v56  ;;  %v1719_v18 = vadd.f32 %v7755_v57, %v6611_v35  ;;  %v7756_v59 = vld [vmem:[#allocation38_spill] sm:$0xff] }
 0xfd9   :  { %v1792_v56 = vadd.f32 %v7756_v59, %v6614_v20 }
 0xfdb   :  { %3100 = vmatpush1.bf16.msra.mxu0 %v4922_v15  ;;  %3173 = vmatpush1.bf16.msra.mxu1 %v4925_v21  ;;  %v7757_v15 = vld [vmem:[#allocation39_spill] sm:$0xff] }
 0xfdc   :  { %3101 = vmatprep.subr.bf16.mxu0 %v4930_v40  ;;  %3174 = vmatprep.subr.bf16.mxu1 %v4933_v24  ;;  %v1721_v21 = vadd.f32 %v7757_v15, %v6621_v41  ;;  %v7758_v40 = vld [vmem:[#allocation40_spill] sm:$0xff] }
 0xfdd   :  { %v1794_v24 = vadd.f32 %v7758_v40, %v6624_v55 }
 0xfdf   :  { %3102 = vmatpush1.bf16.msra.mxu0 %v4928_v29  ;;  %3175 = vmatpush1.bf16.msra.mxu1 %v4931_v31 }
 0xfe0   :  { %3103 = vmatprep.subr.bf16.mxu0 %v4936_v12  ;;  %3176 = vmatprep.subr.bf16.mxu1 %v4939_v44 }
 0xfe3   :  { %3104 = vmatpush1.bf16.msra.mxu0 %v4934_v13  ;;  %3177 = vmatpush1.bf16.msra.mxu1 %v4937_v11 }
 0xfe4   :  { %3105 = vmatprep.subr.bf16.mxu0 %v4942_v43  ;;  %3178 = vmatprep.subr.bf16.mxu1 %v4945_v17 }
 0xfe7   :  { %3106 = vmatpush1.bf16.msra.mxu0 %v4940_v42  ;;  %3179 = vmatpush1.bf16.msra.mxu1 %v4943_v22 }
 0xfe8   :  { %3107 = vmatprep.subr.bf16.mxu0 %v4948_v53  ;;  %3180 = vmatprep.subr.bf16.mxu1 %v4951_v9 }
 0xfeb   :  { %3108 = vmatpush1.bf16.msra.mxu0 %v4946_v54  ;;  %3181 = vmatpush1.bf16.msra.mxu1 %v4949_v5 }
 0xfec   :  { %3431 = vmatprep.subr.bf16.mxu0 %v7011_v51  ;;  %3472 = vmatprep.subr.bf16.mxu1 %v7013_v52 }
 0xfee   :  { %3126 = vmatmul.mubr.bf16.vlgmr.msra.gmra.mrb[96].mxu0 %v2875_v60  ;;  %3199 = vmatmul.mubr.bf16.vlgmr.msra.gmra.mrb[96].mxu1 %v2875_v60 }
 0xfef   :  { %3135 = vmatprep.mubr.bf16.mxu0 %v7687_v16  ;;  %3208 = vmatprep.mubr.bf16.mxu1 %v7687_v16 }
 0xff0   :  { %3432 = vmatpush1.bf16.msra.mxu0 %v7015_v50  ;;  %3473 = vmatpush1.bf16.msra.mxu1 %v7017_v47 }
 0xff1   :  { %3433 = vmatprep.subr.bf16.mxu0 %v7023_v58  ;;  %3474 = vmatprep.subr.bf16.mxu1 %v7025_v19 }
 0xff4   :  { %3434 = vmatpush1.bf16.msra.mxu0 %v7027_v61  ;;  %3475 = vmatpush1.bf16.msra.mxu1 %v7029_v63 }
 0xff5   :  { %3435 = vmatprep.subr.bf16.mxu0 %v7035_v4  ;;  %3476 = vmatprep.subr.bf16.mxu1 %v7037_v14 }
 0xff6   :  { %3136 = vmatmul.mubr.bf16.gmra.mrb[100].mxu0 %v2876_v49  ;;  %3209 = vmatmul.mubr.bf16.gmra.mrb[100].mxu1 %v2876_v49 }
 0xff7   :  { %3145 = vmatprep.mubr.bf16.mxu0 %v7687_v16  ;;  %3218 = vmatprep.mubr.bf16.mxu1 %v7687_v16 }
 0xff8   :  { %3436 = vmatpush1.bf16.msra.mxu0 %v7039_v0  ;;  %3477 = vmatpush1.bf16.msra.mxu1 %v7041_v3 }
 0xff9   :  { %3437 = vmatprep.subr.bf16.mxu0 %v7047_v6  ;;  %3478 = vmatprep.subr.bf16.mxu1 %v7049_v1 }
 0xffc   :  { %3438 = vmatpush1.bf16.msra.mxu0 %v7051_v7  ;;  %3479 = vmatpush1.bf16.msra.mxu1 %v7053_v2 }
 0xffd   :  { %3439 = vmatprep.subr.bf16.mxu0 %v7059_v23  ;;  %3480 = vmatprep.subr.bf16.mxu1 %v7061_v25 }
 0xffe   :  { %3146 = vmatmul.mubr.bf16.gmra.mrb[104].mxu0 %v2877_v27  ;;  %3219 = vmatmul.mubr.bf16.gmra.mrb[104].mxu1 %v2877_v27 }
 0xfff   :  { %3155 = vmatprep.mubr.bf16.mxu0 %v7687_v16  ;;  %3228 = vmatprep.mubr.bf16.mxu1 %v7687_v16 }
0x1000   :  { %3440 = vmatpush1.bf16.msra.mxu0 %v7063_v48  ;;  %3481 = vmatpush1.bf16.msra.mxu1 %v7065_v46 }
0x1001   :  { %3441 = vmatprep.subr.bf16.mxu0 %v7071_v26  ;;  %3482 = vmatprep.subr.bf16.mxu1 %v7073_v8 }
0x1004   :  { %3442 = vmatpush1.bf16.msra.mxu0 %v7075_v32  ;;  %3483 = vmatpush1.bf16.msra.mxu1 %v7077_v37 }
0x1005   :  { %3443 = vmatprep.subr.bf16.mxu0 %v7083_v33  ;;  %3484 = vmatprep.subr.bf16.mxu1 %v7085_v36 }
0x1008   :  { %3444 = vmatpush1.bf16.msra.mxu0 %v7087_v38  ;;  %3485 = vmatpush1.bf16.msra.mxu1 %v7089_v39 }
0x1009   :  { %3445 = vmatprep.subr.bf16.mxu0 %v7095_v45  ;;  %3486 = vmatprep.subr.bf16.mxu1 %v7097_v28 }
0x100c   :  { %3446 = vmatpush1.bf16.msra.mxu0 %v7099_v30  ;;  %3487 = vmatpush1.bf16.msra.mxu1 %v7101_v62 }
0x100d   :  { %3542 = vmatprep.subr.bf16.mxu0 %v7011_v51  ;;  %3583 = vmatprep.subr.bf16.mxu1 %v7013_v52 }
0x10a1   :  { %v2799_v29 = vpop.f32.mrb[92].mxu0  ;;  %v2840_v31 = vpop.f32.mrb[92].mxu1 }
0x10a2   :  { %v2847_v12 = vadd.f32 %v2799_v29, %v1719_v18  ;;  %v2849_v44 = vadd.f32 %v2840_v31, %v1792_v56  ;;  %v2801_v13 = vpop.f32.mrb[93].mxu0  ;;  %v2842_v11 = vpop.f32.mrb[93].mxu1 }
0x10a3   :  { %v2848_v43 = vadd.f32 %v2801_v13, %v1721_v21  ;;  %v2850_v17 = vadd.f32 %v2842_v11, %v1794_v24  ;;  %v2803_v42 = vpop.f32.mrb[94].mxu0  ;;  %v2844_v22 = vpop.f32.mrb[94].mxu1 }
0x10a4   :  { %v4575_v35 = vmul.f32 -1.442695, %v2847_v12  ;;  %v2804_v53 = vpop.f32.mrb[95].mxu0  ;;  %v2845_v9 = vpop.f32.mrb[95].mxu1 }
0x10a5   :  { %v4576_v20 = vmul.f32 -1.442695, %v2848_v43  ;;  %v4577_v41 = vmul.f32 -1.442695, %v2850_v17 }
0x10a6   :  { %5240 = vpow2.f32 %v4575_v35 }
0x10a7   :  { %5242 = vpow2.f32 %v4576_v20 }
0x10a8   :  { %5244 = vpow2.f32 %v4577_v41 }
0x10a9   :  { %5246 = vtanh.f32 %v2849_v44 }
0x10b0   :  { %v5241_v54 = vpop.eup %5240 }
0x10b1   :  { %v5243_v5 = vpop.eup %5242  ;;  %v2854_v55 = vadd.f32 1.0, %v5241_v54 }
0x10b2   :  { %v2860_v60 = vadd.f32 1.0, %v5243_v5  ;;  %v5245_v49 = vpop.eup %5244 }
0x10b3   :  { %5248 = vrcp.f32 %v2854_v55  ;;  %v5247_v27 = vpop.eup %5246  ;;  %v2867_v56 = vadd.f32 1.0, %v5245_v49 }
0x10b4   :  { %5250 = vrcp.f32 %v2860_v60 }
0x10b5   :  { %5252 = vrcp.f32 %v2867_v56  ;;  %v2911_v56 = vld [vmem:[%s7648_s9] sm:$0xf] }
0x10bd   :  { %v5249_v57 = vpop.eup %5248 }
0x10be   :  { %v5251_v18 = vpop.eup %5250  ;;  %v2871_v59 = vmul.f32 %v5249_v57, %v5247_v27 }
0x10bf   :  { %v2870_v15 = vmul.f32 %v5251_v18, %v6990_v10  ;;  %v5253_v53 = vpop.eup %5252 }
0x10c1   :  { %v7118_v21 = vpop.f32.mrb[96].mxu0  ;;  %v7120_v40 = vpop.f32.mrb[96].mxu1  ;;  %v2872_v24 = vadd.f32 %v2871_v59, %v2870_v15 }
0x10c2   :  { %v7122_v29 = vpop.f32.mrb[97].mxu0  ;;  %v7124_v31 = vpop.f32.mrb[97].mxu1 }
0x10c3   :  { %v7126_v12 = vpop.f32.mrb[98].mxu0  ;;  %v7128_v44 = vpop.f32.mrb[98].mxu1  ;;  %5254 = vtanh.f32 %v2872_v24 }
0x10c4   :  { %v7130_v13 = vpop.f32.mrb[99].mxu0  ;;  %v7132_v11 = vpop.f32.mrb[99].mxu1 }
0x10c9   :  { %v7134_v10 = vpop.f32.mrb[100].mxu0  ;;  %v7136_v43 = vpop.f32.mrb[100].mxu1 }
0x10ca   :  { %7759 = vst [vmem:[#allocation20_spill] sm:$0xff] %v7136_v43  ;;  %v7138_v17 = vpop.f32.mrb[101].mxu0  ;;  %v7140_v42 = vpop.f32.mrb[101].mxu1 }
0x10cb   :  { %7760 = vst [vmem:[#allocation18_spill] sm:$0xff] %v7138_v17  ;;  %7761 = vst [vmem:[#allocation21_spill] sm:$0xff] %v7140_v42  ;;  %v7142_v22 = vpop.f32.mrb[102].mxu0  ;;  %v7144_v35 = vpop.f32.mrb[102].mxu1 }
0x10cc   :  { %7762 = vst [vmem:[#allocation19_spill] sm:$0xff] %v7142_v22  ;;  %7763 = vst [vmem:[#allocation22_spill] sm:$0xff] %v7144_v35  ;;  %v7146_v9 = vpop.f32.mrb[103].mxu0  ;;  %v7148_v20 = vpop.f32.mrb[103].mxu1 }
0x10cd   :  { %7764 = vst [vmem:[#allocation23_spill] sm:$0xff] %v7146_v9  ;;  %7765 = vst [vmem:[#allocation26_spill] sm:$0xff] %v7148_v20  ;;  %v5255_v41 = vpop.eup %5254 }
0x10ce   :  { %v2874_v54 = vmul.f32 %v5255_v41, %v5253_v53 }
0x10d0   :  { %v2878_v5 = vpack.c.bf16 %v2874_v54, %v6993_v34 }
0x10d1   :  { %v7151_v55 = vpop.f32.mrb[104].mxu0  ;;  %v7153_v60 = vpop.f32.mrb[104].mxu1 }
0x10d2   :  { %7766 = vst [vmem:[#allocation24_spill] sm:$0xff] %v7151_v55  ;;  %7767 = vst [vmem:[#allocation28_spill] sm:$0xff] %v7153_v60  ;;  %v7155_v49 = vpop.f32.mrb[105].mxu0  ;;  %v7157_v27 = vpop.f32.mrb[105].mxu1  ;;  %3156 = vmatmul.mubr.bf16.gmra.mrb[108].mxu0 %v2878_v5  ;;  %3229 = vmatmul.mubr.bf16.gmra.mrb[108].mxu1 %v2878_v5 }
0x10d3   :  { %7768 = vst [vmem:[#allocation25_spill] sm:$0xff] %v7155_v49  ;;  %7769 = vst [vmem:[#allocation29_spill] sm:$0xff] %v7157_v27  ;;  %v7159_v57 = vpop.f32.mrb[106].mxu0  ;;  %v7161_v18 = vpop.f32.mrb[106].mxu1  ;;  %3463 = vmatprep.mubr.bf16.mxu0 %v7687_v16  ;;  %3504 = vmatprep.mubr.bf16.mxu1 %v7687_v16 }
0x10d4   :  { %7770 = vst [vmem:[#allocation27_spill] sm:$0xff] %v7159_v57  ;;  %7771 = vst [vmem:[#allocation30_spill] sm:$0xff] %v7161_v18  ;;  %v7165_v59 = vpop.f32.mrb[107].mxu0  ;;  %v7167_v34 = vpop.f32.mrb[107].mxu1  ;;  %v7781_v18 = vld [vmem:[#allocation15_spill] sm:$0xff] }
0x10d5   :  { %7772 = vst [vmem:[#allocation31_spill] sm:$0xff] %v7165_v59  ;;  %7773 = vst [vmem:[#allocation34_spill] sm:$0xff] %v7167_v34  ;;  %v7780_v34 = vld [vmem:[#allocation14_spill] sm:$0xff]  ;;  %v7224_v57 = vrot.slane %v2911_v56, %v7781_v18 }
0x10d6   :  { %v7221_v59 = vrot.slane %v2911_v56, %v7780_v34 }
0x10d7   :  { %v3201_v34 = vadd.f32 %v7120_v40, %v7224_v57 }
0x10da   :  { %3464 = vmatmul.mubr.bf16.vlgmr.msra.gmra.mrb[112].mxu0 %v7687_v16  ;;  %3505 = vmatmul.mubr.bf16.vlgmr.msra.gmra.mrb[112].mxu1 %v7687_v16 }
0x10db   :  { %3543 = vmatpush1.bf16.msra.mxu0 %v7015_v50  ;;  %3584 = vmatpush1.bf16.msra.mxu1 %v7017_v47 }
0x10dc   :  { %3544 = vmatprep.subr.bf16.mxu0 %v7023_v58  ;;  %3585 = vmatprep.subr.bf16.mxu1 %v7025_v19 }
0x10dd   :  { %3574 = vmatprep.mubr.bf16.mxu0 %v7687_v16  ;;  %3615 = vmatprep.mubr.bf16.mxu1 %v7687_v16 }
0x10df   :  { %3545 = vmatpush1.bf16.msra.mxu0 %v7027_v61  ;;  %3586 = vmatpush1.bf16.msra.mxu1 %v7029_v63 }
0x10e0   :  { %3546 = vmatprep.subr.bf16.mxu0 %v7035_v4  ;;  %3587 = vmatprep.subr.bf16.mxu1 %v7037_v14 }
0x10e3   :  { %3547 = vmatpush1.bf16.msra.mxu0 %v7039_v0  ;;  %3588 = vmatpush1.bf16.msra.mxu1 %v7041_v3 }
0x10e4   :  { %3548 = vmatprep.subr.bf16.mxu0 %v7047_v6  ;;  %3589 = vmatprep.subr.bf16.mxu1 %v7049_v1 }
0x10e7   :  { %3549 = vmatpush1.bf16.msra.mxu0 %v7051_v7  ;;  %3590 = vmatpush1.bf16.msra.mxu1 %v7053_v2 }
0x10e8   :  { %3550 = vmatprep.subr.bf16.mxu0 %v7059_v23  ;;  %3591 = vmatprep.subr.bf16.mxu1 %v7061_v25 }
0x10eb   :  { %3551 = vmatpush1.bf16.msra.mxu0 %v7063_v48  ;;  %3592 = vmatpush1.bf16.msra.mxu1 %v7065_v46 }
0x10ec   :  { %3552 = vmatprep.subr.bf16.mxu0 %v7071_v26  ;;  %3593 = vmatprep.subr.bf16.mxu1 %v7073_v8 }
0x10ef   :  { %3553 = vmatpush1.bf16.msra.mxu0 %v7075_v32  ;;  %3594 = vmatpush1.bf16.msra.mxu1 %v7077_v37 }
0x10f0   :  { %3554 = vmatprep.subr.bf16.mxu0 %v7083_v33  ;;  %3595 = vmatprep.subr.bf16.mxu1 %v7085_v36 }
0x10f3   :  { %3555 = vmatpush1.bf16.msra.mxu0 %v7087_v38  ;;  %3596 = vmatpush1.bf16.msra.mxu1 %v7089_v39 }
0x10f4   :  { %3556 = vmatprep.subr.bf16.mxu0 %v7095_v45  ;;  %3597 = vmatprep.subr.bf16.mxu1 %v7097_v28 }
0x10f7   :  { %3557 = vmatpush1.bf16.msra.mxu0 %v7099_v30  ;;  %3598 = vmatpush1.bf16.msra.mxu1 %v7101_v62 }
0x10f8   :  { %3653 = vmatprep.subr.bf16.mxu0 %v7011_v51  ;;  %3694 = vmatprep.subr.bf16.mxu1 %v7013_v52 }
0x11a5   :  { %v7208_v15 = vpop.f32.mrb[108].mxu0  ;;  %v7210_v24 = vpop.f32.mrb[108].mxu1 }
0x11a6   :  { %7774 = vst [vmem:[#allocation32_spill] sm:$0xff] %v7208_v15  ;;  %7775 = vst [vmem:[#allocation36_spill] sm:$0xff] %v7210_v24  ;;  %v7212_v53 = vpop.f32.mrb[109].mxu0  ;;  %v7214_v41 = vpop.f32.mrb[109].mxu1  ;;  %v7784_v15 = vld [vmem:[#allocation16_spill] sm:$0xff] }
0x11a7   :  { %7776 = vst [vmem:[#allocation33_spill] sm:$0xff] %v7212_v53  ;;  %7777 = vst [vmem:[#allocation37_spill] sm:$0xff] %v7214_v41  ;;  %v7216_v54 = vpop.f32.mrb[110].mxu0  ;;  %v7218_v5 = vpop.f32.mrb[110].mxu1  ;;  %v7231_v24 = vrot.slane %v2911_v56, %v7784_v15  ;;  %v7785_v53 = vld [vmem:[#allocation17_spill] sm:$0xff] }
0x11a8   :  { %7778 = vst [vmem:[#allocation35_spill] sm:$0xff] %v7216_v54  ;;  %7779 = vst [vmem:[#allocation38_spill] sm:$0xff] %v7218_v5  ;;  %v7226_v27 = vpop.f32.mrb[111].mxu0  ;;  %v7228_v49 = vpop.f32.mrb[111].mxu1  ;;  %v7234_v60 = vrot.slane %v2911_v56, %v7785_v53  ;;  %v3128_v54 = vadd.f32 %v7118_v21, %v7221_v59 }
0x11a9   :  { %7782 = vst [vmem:[#allocation39_spill] sm:$0xff] %v7226_v27  ;;  %7783 = vst [vmem:[#allocation40_spill] sm:$0xff] %v7228_v49  ;;  %v3130_v18 = vadd.f32 %v7122_v29, %v7231_v24 }
0x11aa   :  { %v3203_v27 = vadd.f32 %v7124_v31, %v7234_v60 }
0x11ad   :  { %v3465_v5 = vpop.f32.mrb[112].mxu0  ;;  %v3506_v49 = vpop.f32.mrb[112].mxu1 }
0x11ae   :  { %v3513_v41 = vadd.f32 %v3465_v5, %v3128_v54  ;;  %v3515_v15 = vadd.f32 %v3506_v49, %v3201_v34  ;;  %v3467_v55 = vpop.f32.mrb[113].mxu0  ;;  %v3508_v20 = vpop.f32.mrb[113].mxu1 }
0x11af   :  { %v3514_v56 = vadd.f32 %v3467_v55, %v3130_v18  ;;  %v3516_v53 = vadd.f32 %v3508_v20, %v3203_v27  ;;  %v3469_v9 = vpop.f32.mrb[114].mxu0  ;;  %v3510_v35 = vpop.f32.mrb[114].mxu1  ;;  %v3205_v18 = vadd.f32 %v7128_v44, %v7224_v57 }
0x11b0   :  { %v4642_v21 = vmul.f32 -1.442695, %v3513_v41  ;;  %v3470_v22 = vpop.f32.mrb[115].mxu0  ;;  %v3511_v42 = vpop.f32.mrb[115].mxu1 }
0x11b1   :  { %v4643_v40 = vmul.f32 -1.442695, %v3514_v56  ;;  %v4644_v29 = vmul.f32 -1.442695, %v3516_v53  ;;  %v3207_v56 = vadd.f32 %v7132_v11, %v7234_v60 }
0x11b2   :  { %5256 = vpow2.f32 %v4642_v21 }
0x11b3   :  { %5258 = vpow2.f32 %v4643_v40 }
0x11b4   :  { %5260 = vpow2.f32 %v4644_v29 }
0x11b5   :  { %5262 = vtanh.f32 %v3515_v15  ;;  %v3134_v15 = vadd.f32 %v7130_v13, %v7231_v24 }
0x11bc   :  { %v5257_v17 = vpop.eup %5256 }
0x11bd   :  { %v5259_v43 = vpop.eup %5258  ;;  %v3520_v31 = vadd.f32 1.0, %v5257_v17 }
0x11be   :  { %v3526_v54 = vadd.f32 1.0, %v5259_v43  ;;  %v5261_v49 = vpop.eup %5260  ;;  %v3132_v43 = vadd.f32 %v7126_v12, %v7221_v59 }
0x11bf   :  { %5264 = vrcp.f32 %v3520_v31  ;;  %v5263_v55 = vpop.eup %5262  ;;  %v3533_v27 = vadd.f32 1.0, %v5261_v49 }
0x11c0   :  { %5266 = vrcp.f32 %v3526_v54 }
0x11c1   :  { %5268 = vrcp.f32 %v3533_v27 }
0x11c9   :  { %v5265_v20 = vpop.eup %5264 }
0x11ca   :  { %v5267_v9 = vpop.eup %5266  ;;  %v3537_v35 = vmul.f32 %v5265_v20, %v5263_v55 }
0x11cb   :  { %v3536_v22 = vmul.f32 0.0, %v5267_v9  ;;  %v5269_v41 = vpop.eup %5268 }
0x11cd   :  { %v7244_v42 = vadd.f32 %v3537_v35, %v3536_v22 }
0x11cf   :  { %5270 = vtanh.f32 %v7244_v42 }
0x11d9   :  { %v5271_v5 = vpop.eup %5270 }
0x11da   :  { %v3540_v17 = vmul.f32 %v5271_v5, %v5269_v41 }
0x11dc   :  { %v3541_v34 = vpack.c.bf16 %v3540_v17, %v3540_v17 }
0x11de   :  { %3575 = vmatmul.mubr.bf16.vlgmr.msra.gmra.mrb[116].mxu0 %v3541_v34  ;;  %3616 = vmatmul.mubr.bf16.vlgmr.msra.gmra.mrb[116].mxu1 %v3541_v34 }
0x11df   :  { %3654 = vmatpush1.bf16.msra.mxu0 %v7015_v50  ;;  %3695 = vmatpush1.bf16.msra.mxu1 %v7017_v47 }
0x11e0   :  { %3655 = vmatprep.subr.bf16.mxu0 %v7023_v58  ;;  %3696 = vmatprep.subr.bf16.mxu1 %v7025_v19 }
0x11e1   :  { %3685 = vmatprep.mubr.bf16.mxu0 %v7687_v16  ;;  %3726 = vmatprep.mubr.bf16.mxu1 %v7687_v16 }
0x11e3   :  { %3656 = vmatpush1.bf16.msra.mxu0 %v7027_v61  ;;  %3697 = vmatpush1.bf16.msra.mxu1 %v7029_v63 }
0x11e4   :  { %3657 = vmatprep.subr.bf16.mxu0 %v7035_v4  ;;  %3698 = vmatprep.subr.bf16.mxu1 %v7037_v14 }
0x11e7   :  { %3658 = vmatpush1.bf16.msra.mxu0 %v7039_v0  ;;  %3699 = vmatpush1.bf16.msra.mxu1 %v7041_v3 }
0x11e8   :  { %3659 = vmatprep.subr.bf16.mxu0 %v7047_v6  ;;  %3700 = vmatprep.subr.bf16.mxu1 %v7049_v1 }
0x11eb   :  { %3660 = vmatpush1.bf16.msra.mxu0 %v7051_v7  ;;  %3701 = vmatpush1.bf16.msra.mxu1 %v7053_v2 }
0x11ec   :  { %3661 = vmatprep.subr.bf16.mxu0 %v7059_v23  ;;  %3702 = vmatprep.subr.bf16.mxu1 %v7061_v25 }
0x11ef   :  { %3662 = vmatpush1.bf16.msra.mxu0 %v7063_v48  ;;  %3703 = vmatpush1.bf16.msra.mxu1 %v7065_v46 }
0x11f0   :  { %3663 = vmatprep.subr.bf16.mxu0 %v7071_v26  ;;  %3704 = vmatprep.subr.bf16.mxu1 %v7073_v8 }
0x11f3   :  { %3664 = vmatpush1.bf16.msra.mxu0 %v7075_v32  ;;  %3705 = vmatpush1.bf16.msra.mxu1 %v7077_v37 }
0x11f4   :  { %3665 = vmatprep.subr.bf16.mxu0 %v7083_v33  ;;  %3706 = vmatprep.subr.bf16.mxu1 %v7085_v36 }
0x11f7   :  { %3666 = vmatpush1.bf16.msra.mxu0 %v7087_v38  ;;  %3707 = vmatpush1.bf16.msra.mxu1 %v7089_v39 }
0x11f8   :  { %3667 = vmatprep.subr.bf16.mxu0 %v7095_v45  ;;  %3708 = vmatprep.subr.bf16.mxu1 %v7097_v28 }
0x11fb   :  { %3668 = vmatpush1.bf16.msra.mxu0 %v7099_v30  ;;  %3709 = vmatpush1.bf16.msra.mxu1 %v7101_v62 }
0x11fc   :  { %3764 = vmatprep.subr.bf16.mxu0 %v7011_v51  ;;  %3805 = vmatprep.subr.bf16.mxu1 %v7013_v52 }
0x12b1   :  { %v3576_v53 = vpop.f32.mrb[116].mxu0  ;;  %v3617_v21 = vpop.f32.mrb[116].mxu1 }
0x12b2   :  { %v3624_v40 = vadd.f32 %v3576_v53, %v3132_v43  ;;  %v3626_v29 = vadd.f32 %v3617_v21, %v3205_v18  ;;  %v3578_v31 = vpop.f32.mrb[117].mxu0  ;;  %v3619_v54 = vpop.f32.mrb[117].mxu1 }
0x12b3   :  { %v3625_v49 = vadd.f32 %v3578_v31, %v3134_v15  ;;  %v3627_v55 = vadd.f32 %v3619_v54, %v3207_v56  ;;  %v3580_v20 = vpop.f32.mrb[118].mxu0  ;;  %v3621_v9 = vpop.f32.mrb[118].mxu1 }
0x12b4   :  { %v4645_v12 = vmul.f32 -1.442695, %v3624_v40  ;;  %v3581_v35 = vpop.f32.mrb[119].mxu0  ;;  %v3622_v27 = vpop.f32.mrb[119].mxu1  ;;  %v7787_v20 = vld [vmem:[#allocation18_spill] sm:$0xff] }
0x12b5   :  { %v4646_v44 = vmul.f32 -1.442695, %v3625_v49  ;;  %v4647_v13 = vmul.f32 -1.442695, %v3627_v55  ;;  %v7786_v49 = vld [vmem:[#allocation20_spill] sm:$0xff]  ;;  %v3140_v9 = vadd.f32 %v7787_v20, %v7231_v24 }
0x12b6   :  { %5272 = vpow2.f32 %v4645_v12  ;;  %v3211_v55 = vadd.f32 %v7786_v49, %v7224_v57  ;;  %v7788_v12 = vld [vmem:[#allocation21_spill] sm:$0xff] }
0x12b7   :  { %5274 = vpow2.f32 %v4646_v44  ;;  %v3213_v35 = vadd.f32 %v7788_v12, %v7234_v60 }
0x12b8   :  { %5276 = vpow2.f32 %v4647_v13 }
0x12b9   :  { %5278 = vtanh.f32 %v3626_v29 }
0x12c0   :  { %v5273_v22 = vpop.eup %5272 }
0x12c1   :  { %v5275_v41 = vpop.eup %5274  ;;  %v3631_v11 = vadd.f32 1.0, %v5273_v22 }
0x12c2   :  { %v3637_v5 = vadd.f32 1.0, %v5275_v41  ;;  %v5277_v17 = vpop.eup %5276 }
0x12c3   :  { %5280 = vrcp.f32 %v3631_v11  ;;  %v5279_v34 = vpop.eup %5278  ;;  %v3644_v56 = vadd.f32 1.0, %v5277_v17 }
0x12c4   :  { %5282 = vrcp.f32 %v3637_v5 }
0x12c5   :  { %5284 = vrcp.f32 %v3644_v56 }
0x12cd   :  { %v5281_v43 = vpop.eup %5280 }
0x12ce   :  { %v5283_v18 = vpop.eup %5282  ;;  %v3648_v15 = vmul.f32 %v5281_v43, %v5279_v34 }
0x12cf   :  { %v3647_v53 = vmul.f32 %v5283_v18, %v7244_v42  ;;  %v5285_v40 = vpop.eup %5284  ;;  %v3138_v42 = vadd.f32 %v7134_v10, %v7221_v59 }
0x12d1   :  { %v7290_v21 = vadd.f32 %v3648_v15, %v3647_v53 }
0x12d3   :  { %5286 = vtanh.f32 %v7290_v21 }
0x12dd   :  { %v5287_v31 = vpop.eup %5286 }
0x12de   :  { %v3651_v54 = vmul.f32 %v5287_v31, %v5285_v40 }
0x12e0   :  { %v3652_v29 = vpack.c.bf16 %v3651_v54, %v3651_v54 }
0x12e2   :  { %3686 = vmatmul.mubr.bf16.vlgmr.msra.gmra.mrb[120].mxu0 %v3652_v29  ;;  %3727 = vmatmul.mubr.bf16.vlgmr.msra.gmra.mrb[120].mxu1 %v3652_v29 }
0x12e3   :  { %3765 = vmatpush1.bf16.msra.mxu0 %v7015_v50  ;;  %3806 = vmatpush1.bf16.msra.mxu1 %v7017_v47 }
0x12e4   :  { %3766 = vmatprep.subr.bf16.mxu0 %v7023_v58  ;;  %3807 = vmatprep.subr.bf16.mxu1 %v7025_v19 }
0x12e5   :  { %3796 = vmatprep.mubr.bf16.mxu0 %v7687_v16  ;;  %3837 = vmatprep.mubr.bf16.mxu1 %v7687_v16 }
0x12e7   :  { %3767 = vmatpush1.bf16.msra.mxu0 %v7027_v61  ;;  %3808 = vmatpush1.bf16.msra.mxu1 %v7029_v63 }
0x12e8   :  { %3768 = vmatprep.subr.bf16.mxu0 %v7035_v4  ;;  %3809 = vmatprep.subr.bf16.mxu1 %v7037_v14 }
0x12eb   :  { %3769 = vmatpush1.bf16.msra.mxu0 %v7039_v0  ;;  %3810 = vmatpush1.bf16.msra.mxu1 %v7041_v3 }
0x12ec   :  { %3770 = vmatprep.subr.bf16.mxu0 %v7047_v6  ;;  %3811 = vmatprep.subr.bf16.mxu1 %v7049_v1 }
0x12ef   :  { %3771 = vmatpush1.bf16.msra.mxu0 %v7051_v7  ;;  %3812 = vmatpush1.bf16.msra.mxu1 %v7053_v2 }
0x12f0   :  { %3772 = vmatprep.subr.bf16.mxu0 %v7059_v23  ;;  %3813 = vmatprep.subr.bf16.mxu1 %v7061_v25 }
0x12f3   :  { %3773 = vmatpush1.bf16.msra.mxu0 %v7063_v48  ;;  %3814 = vmatpush1.bf16.msra.mxu1 %v7065_v46 }
0x12f4   :  { %3774 = vmatprep.subr.bf16.mxu0 %v7071_v26  ;;  %3815 = vmatprep.subr.bf16.mxu1 %v7073_v8 }
0x12f7   :  { %3775 = vmatpush1.bf16.msra.mxu0 %v7075_v32  ;;  %3816 = vmatpush1.bf16.msra.mxu1 %v7077_v37 }
0x12f8   :  { %3776 = vmatprep.subr.bf16.mxu0 %v7083_v33  ;;  %3817 = vmatprep.subr.bf16.mxu1 %v7085_v36 }
0x12fb   :  { %3777 = vmatpush1.bf16.msra.mxu0 %v7087_v38  ;;  %3818 = vmatpush1.bf16.msra.mxu1 %v7089_v39 }
0x12fc   :  { %3778 = vmatprep.subr.bf16.mxu0 %v7095_v45  ;;  %3819 = vmatprep.subr.bf16.mxu1 %v7097_v28 }
0x12ff   :  { %3779 = vmatpush1.bf16.msra.mxu0 %v7099_v30  ;;  %3820 = vmatpush1.bf16.msra.mxu1 %v7101_v62 }
0x1300   :  { %3875 = vmatprep.subr.bf16.mxu0 %v7011_v51  ;;  %3916 = vmatprep.subr.bf16.mxu1 %v7013_v52 }
0x13b5   :  { %v3687_v27 = vpop.f32.mrb[120].mxu0  ;;  %v3728_v44 = vpop.f32.mrb[120].mxu1 }
0x13b6   :  { %v3735_v13 = vadd.f32 %v3687_v27, %v3138_v42  ;;  %v3737_v22 = vadd.f32 %v3728_v44, %v3211_v55  ;;  %v3689_v41 = vpop.f32.mrb[121].mxu0  ;;  %v3730_v11 = vpop.f32.mrb[121].mxu1 }
0x13b7   :  { %v3736_v5 = vadd.f32 %v3689_v41, %v3140_v9  ;;  %v3738_v17 = vadd.f32 %v3730_v11, %v3213_v35  ;;  %v3691_v34 = vpop.f32.mrb[122].mxu0  ;;  %v3732_v43 = vpop.f32.mrb[122].mxu1 }
0x13b8   :  { %v4648_v10 = vmul.f32 -1.442695, %v3735_v13  ;;  %v3692_v18 = vpop.f32.mrb[123].mxu0  ;;  %v3733_v15 = vpop.f32.mrb[123].mxu1  ;;  %v7791_v34 = vld [vmem:[#allocation23_spill] sm:$0xff] }
0x13b9   :  { %v4649_v56 = vmul.f32 -1.442695, %v3736_v5  ;;  %v4650_v53 = vmul.f32 -1.442695, %v3738_v17  ;;  %v7790_v5 = vld [vmem:[#allocation22_spill] sm:$0xff]  ;;  %v3144_v43 = vadd.f32 %v7791_v34, %v7231_v24 }
0x13ba   :  { %5288 = vpow2.f32 %v4648_v10  ;;  %v3215_v17 = vadd.f32 %v7790_v5, %v7224_v57  ;;  %v7792_v10 = vld [vmem:[#allocation26_spill] sm:$0xff] }
0x13bb   :  { %5290 = vpow2.f32 %v4649_v56  ;;  %v3217_v18 = vadd.f32 %v7792_v10, %v7234_v60 }
0x13bc   :  { %5292 = vpow2.f32 %v4650_v53 }
0x13bd   :  { %5294 = vtanh.f32 %v3737_v22 }
0x13c4   :  { %v5289_v40 = vpop.eup %5288 }
0x13c5   :  { %v5291_v31 = vpop.eup %5290  ;;  %v3742_v54 = vadd.f32 1.0, %v5289_v40 }
0x13c6   :  { %v3748_v29 = vadd.f32 1.0, %v5291_v31  ;;  %v5293_v42 = vpop.eup %5292 }
0x13c7   :  { %5296 = vrcp.f32 %v3742_v54  ;;  %v5295_v49 = vpop.eup %5294  ;;  %v3755_v12 = vadd.f32 1.0, %v5293_v42 }
0x13c8   :  { %5298 = vrcp.f32 %v3748_v29 }
0x13c9   :  { %5300 = vrcp.f32 %v3755_v12 }
0x13d1   :  { %v5297_v55 = vpop.eup %5296 }
0x13d2   :  { %v5299_v20 = vpop.eup %5298  ;;  %v3759_v9 = vmul.f32 %v5297_v55, %v5295_v49 }
0x13d3   :  { %v3758_v35 = vmul.f32 %v5299_v20, %v7290_v21  ;;  %v5301_v44 = vpop.eup %5300  ;;  %v7789_v21 = vld [vmem:[#allocation19_spill] sm:$0xff] }
0x13d4   :  { %v3142_v11 = vadd.f32 %v7789_v21, %v7221_v59 }
0x13d5   :  { %v7336_v27 = vadd.f32 %v3759_v9, %v3758_v35 }
0x13d7   :  { %5302 = vtanh.f32 %v7336_v27 }
0x13e1   :  { %v5303_v13 = vpop.eup %5302 }
0x13e2   :  { %v3762_v41 = vmul.f32 %v5303_v13, %v5301_v44 }
0x13e4   :  { %v3763_v22 = vpack.c.bf16 %v3762_v41, %v3762_v41 }
0x13e6   :  { %3797 = vmatmul.mubr.bf16.vlgmr.msra.gmra.mrb[124].mxu0 %v3763_v22  ;;  %3838 = vmatmul.mubr.bf16.vlgmr.msra.gmra.mrb[124].mxu1 %v3763_v22 }
0x13e7   :  { %3876 = vmatpush1.bf16.msra.mxu0 %v7015_v50  ;;  %3917 = vmatpush1.bf16.msra.mxu1 %v7017_v47 }
0x13e8   :  { %3877 = vmatprep.subr.bf16.mxu0 %v7023_v58  ;;  %3918 = vmatprep.subr.bf16.mxu1 %v7025_v19 }
0x13e9   :  { %3907 = vmatprep.mubr.bf16.mxu0 %v7687_v16  ;;  %3948 = vmatprep.mubr.bf16.mxu1 %v7687_v16 }
0x13eb   :  { %3878 = vmatpush1.bf16.msra.mxu0 %v7027_v61  ;;  %3919 = vmatpush1.bf16.msra.mxu1 %v7029_v63 }
0x13ec   :  { %3879 = vmatprep.subr.bf16.mxu0 %v7035_v4  ;;  %3920 = vmatprep.subr.bf16.mxu1 %v7037_v14 }
0x13ef   :  { %3880 = vmatpush1.bf16.msra.mxu0 %v7039_v0  ;;  %3921 = vmatpush1.bf16.msra.mxu1 %v7041_v3 }
0x13f0   :  { %3881 = vmatprep.subr.bf16.mxu0 %v7047_v6  ;;  %3922 = vmatprep.subr.bf16.mxu1 %v7049_v1 }
0x13f3   :  { %3882 = vmatpush1.bf16.msra.mxu0 %v7051_v7  ;;  %3923 = vmatpush1.bf16.msra.mxu1 %v7053_v2 }
0x13f4   :  { %3883 = vmatprep.subr.bf16.mxu0 %v7059_v23  ;;  %3924 = vmatprep.subr.bf16.mxu1 %v7061_v25 }
0x13f7   :  { %3884 = vmatpush1.bf16.msra.mxu0 %v7063_v48  ;;  %3925 = vmatpush1.bf16.msra.mxu1 %v7065_v46 }
0x13f8   :  { %3885 = vmatprep.subr.bf16.mxu0 %v7071_v26  ;;  %3926 = vmatprep.subr.bf16.mxu1 %v7073_v8 }
0x13fb   :  { %3886 = vmatpush1.bf16.msra.mxu0 %v7075_v32  ;;  %3927 = vmatpush1.bf16.msra.mxu1 %v7077_v37 }
0x13fc   :  { %3887 = vmatprep.subr.bf16.mxu0 %v7083_v33  ;;  %3928 = vmatprep.subr.bf16.mxu1 %v7085_v36 }
0x13ff   :  { %3888 = vmatpush1.bf16.msra.mxu0 %v7087_v38  ;;  %3929 = vmatpush1.bf16.msra.mxu1 %v7089_v39 }
0x1400   :  { %3889 = vmatprep.subr.bf16.mxu0 %v7095_v45  ;;  %3930 = vmatprep.subr.bf16.mxu1 %v7097_v28 }
0x1403   :  { %3890 = vmatpush1.bf16.msra.mxu0 %v7099_v30  ;;  %3931 = vmatpush1.bf16.msra.mxu1 %v7101_v62 }
0x1404   :  { %3986 = vmatprep.subr.bf16.mxu0 %v7011_v51  ;;  %4027 = vmatprep.subr.bf16.mxu1 %v7013_v52 }
0x14b9   :  { %v3798_v15 = vpop.f32.mrb[124].mxu0  ;;  %v3839_v56 = vpop.f32.mrb[124].mxu1 }
0x14ba   :  { %v3846_v53 = vadd.f32 %v3798_v15, %v3142_v11  ;;  %v3848_v40 = vadd.f32 %v3839_v56, %v3215_v17  ;;  %v3800_v31 = vpop.f32.mrb[125].mxu0  ;;  %v3841_v54 = vpop.f32.mrb[125].mxu1 }
0x14bb   :  { %v3847_v29 = vadd.f32 %v3800_v31, %v3144_v43  ;;  %v3849_v42 = vadd.f32 %v3841_v54, %v3217_v18  ;;  %v3802_v49 = vpop.f32.mrb[126].mxu0  ;;  %v3843_v55 = vpop.f32.mrb[126].mxu1 }
0x14bc   :  { %v4651_v20 = vmul.f32 -1.442695, %v3846_v53  ;;  %v3803_v9 = vpop.f32.mrb[127].mxu0  ;;  %v3844_v12 = vpop.f32.mrb[127].mxu1 }
0x14bd   :  { %v4652_v35 = vmul.f32 -1.442695, %v3847_v29  ;;  %v4653_v44 = vmul.f32 -1.442695, %v3849_v42  ;;  %v7431_v9 = vld [vmem:[#allocation10] ss:$16 sps:$4 sm:$0xff]  }
0x14be   :  { %5304 = vpow2.f32 %v4651_v20  ;;  %v7434_v12 = vld [vmem:[#allocation10 + $0x8] ss:$16 sps:$4 sm:$0xff]  }
0x14bf   :  { %5306 = vpow2.f32 %v4652_v35  ;;  %v7437_v35 = vld [vmem:[#allocation10 + $0x24] ss:$16 sps:$4 sm:$0xff]  }
0x14c0   :  { %5308 = vpow2.f32 %v4653_v44  ;;  %v7440_v44 = vld [vmem:[#allocation10 + $0x2c] ss:$16 sps:$4 sm:$0xff]  }
0x14c1   :  { %5310 = vtanh.f32 %v3848_v40 }
0x14c8   :  { %v5305_v13 = vpop.eup %5304 }
0x14c9   :  { %v5307_v41 = vpop.eup %5306  ;;  %v3853_v22 = vadd.f32 1.0, %v5305_v13  ;;  %v7445_v13 = vld [vmem:[#allocation10 + $0x20] ss:$16 sps:$4 sm:$0xff]  }
0x14ca   :  { %v3859_v21 = vadd.f32 1.0, %v5307_v41  ;;  %v5309_v11 = vpop.eup %5308  ;;  %v7448_v41 = vld [vmem:[#allocation10 + $0x28] ss:$16 sps:$4 sm:$0xff]  }
0x14cb   :  { %5312 = vrcp.f32 %v3853_v22  ;;  %v5311_v5 = vpop.eup %5310  ;;  %v3866_v10 = vadd.f32 1.0, %v5309_v11  ;;  %v7451_v22 = vld [vmem:[#allocation10 + $0x44] ss:$16 sps:$4 sm:$0xff]   ;;  %v7457_v11 = vld [vmem:[#allocation10 + $0x40] ss:$16 sps:$4 sm:$0xff]  }
0x14cc   :  { %5314 = vrcp.f32 %v3859_v21  ;;  %v7454_v21 = vld [vmem:[#allocation10 + $0x4c] ss:$16 sps:$4 sm:$0xff]  }
0x14cd   :  { %5316 = vrcp.f32 %v3866_v10  ;;  %v7472_v10 = vld [vmem:[#allocation10 + $0x68] ss:$16 sps:$4 sm:$0xff]  }
0x14d5   :  { %v5313_v17 = vpop.eup %5312 }
0x14d6   :  { %v5315_v34 = vpop.eup %5314  ;;  %v3870_v43 = vmul.f32 %v5313_v17, %v5311_v5  ;;  %v7460_v5 = vld [vmem:[#allocation10 + $0x48] ss:$16 sps:$4 sm:$0xff]   ;;  %v7463_v17 = vld [vmem:[#allocation10 + $0x64] ss:$16 sps:$4 sm:$0xff]  }
0x14d7   :  { %v3869_v18 = vmul.f32 %v5315_v34, %v7336_v27  ;;  %v5317_v56 = vpop.eup %5316  ;;  %v7466_v34 = vld [vmem:[#allocation10 + $0x6c] ss:$16 sps:$4 sm:$0xff]  }
0x14d9   :  { %v7382_v15 = vadd.f32 %v3870_v43, %v3869_v18  ;;  %v7469_v43 = vld [vmem:[#allocation10 + $0x60] ss:$16 sps:$4 sm:$0xff]   ;;  %v7475_v18 = vld [vmem:[#allocation10 + $0x84] ss:$16 sps:$4 sm:$0xff]  }
0x14db   :  { %5318 = vtanh.f32 %v7382_v15 }
0x14e5   :  { %v5319_v53 = vpop.eup %5318 }
0x14e6   :  { %v3873_v31 = vmul.f32 %v5319_v53, %v5317_v56  ;;  %v7481_v56 = vld [vmem:[#allocation10 + $0x80] ss:$16 sps:$4 sm:$0xff]   ;;  %v7484_v53 = vld [vmem:[#allocation10 + $0x88] ss:$16 sps:$4 sm:$0xff]  }
0x14e8   :  { %v3874_v40 = vpack.c.bf16 %v3873_v31, %v3873_v31  ;;  %v7487_v31 = vld [vmem:[#allocation10 + $0xa4] ss:$16 sps:$4 sm:$0xff]  }
0x14ea   :  { %3908 = vmatmul.mubr.bf16.vlgmr.msra.gmra.mrb[128].mxu0 %v3874_v40  ;;  %3949 = vmatmul.mubr.bf16.vlgmr.msra.gmra.mrb[128].mxu1 %v3874_v40  ;;  %v7490_v40 = vld [vmem:[#allocation10 + $0xac] ss:$16 sps:$4 sm:$0xff]  }
0x14eb   :  { %3987 = vmatpush1.bf16.msra.mxu0 %v7015_v50  ;;  %4028 = vmatpush1.bf16.msra.mxu1 %v7017_v47  ;;  %v7793_v50 = vld [vmem:[#allocation24_spill] sm:$0xff] }
0x14ec   :  { %3988 = vmatprep.subr.bf16.mxu0 %v7023_v58  ;;  %4029 = vmatprep.subr.bf16.mxu1 %v7025_v19  ;;  %v3148_v47 = vadd.f32 %v7793_v50, %v7221_v59  ;;  %v7794_v58 = vld [vmem:[#allocation28_spill] sm:$0xff] }
0x14ed   :  { %4018 = vmatprep.mubr.bf16.mxu0 %v7687_v16  ;;  %4059 = vmatprep.mubr.bf16.mxu1 %v7687_v16  ;;  %v3221_v19 = vadd.f32 %v7794_v58, %v7224_v57  ;;  %v7493_v50 = vld [vmem:[#allocation10 + $0xa0] ss:$16 sps:$4 sm:$0xff]   ;;  %v7499_v58 = vld [vmem:[#allocation10 + $0xc4] ss:$16 sps:$4 sm:$0xff]  }
0x14ef   :  { %3989 = vmatpush1.bf16.msra.mxu0 %v7027_v61  ;;  %4030 = vmatpush1.bf16.msra.mxu1 %v7029_v63  ;;  %v7795_v61 = vld [vmem:[#allocation25_spill] sm:$0xff] }
0x14f0   :  { %3990 = vmatprep.subr.bf16.mxu0 %v7035_v4  ;;  %4031 = vmatprep.subr.bf16.mxu1 %v7037_v14  ;;  %v3150_v63 = vadd.f32 %v7795_v61, %v7231_v24  ;;  %v7796_v4 = vld [vmem:[#allocation29_spill] sm:$0xff]  ;;  %v7505_v61 = vld [vmem:[#allocation10 + $0xc0] ss:$16 sps:$4 sm:$0xff]  }
0x14f1   :  { %v3223_v14 = vadd.f32 %v7796_v4, %v7234_v60  ;;  %v7511_v4 = vld [vmem:[#allocation10 + $0xe4] ss:$16 sps:$4 sm:$0xff]  }
0x14f3   :  { %3991 = vmatpush1.bf16.msra.mxu0 %v7039_v0  ;;  %4032 = vmatpush1.bf16.msra.mxu1 %v7041_v3 }
0x14f4   :  { %3992 = vmatprep.subr.bf16.mxu0 %v7047_v6  ;;  %4033 = vmatprep.subr.bf16.mxu1 %v7049_v1 }
0x14f7   :  { %3993 = vmatpush1.bf16.msra.mxu0 %v7051_v7  ;;  %4034 = vmatpush1.bf16.msra.mxu1 %v7053_v2 }
0x14f8   :  { %3994 = vmatprep.subr.bf16.mxu0 %v7059_v23  ;;  %4035 = vmatprep.subr.bf16.mxu1 %v7061_v25 }
0x14fb   :  { %3995 = vmatpush1.bf16.msra.mxu0 %v7063_v48  ;;  %4036 = vmatpush1.bf16.msra.mxu1 %v7065_v46 }
0x14fc   :  { %3996 = vmatprep.subr.bf16.mxu0 %v7071_v26  ;;  %4037 = vmatprep.subr.bf16.mxu1 %v7073_v8 }
0x14ff   :  { %3997 = vmatpush1.bf16.msra.mxu0 %v7075_v32  ;;  %4038 = vmatpush1.bf16.msra.mxu1 %v7077_v37 }
0x1500   :  { %3998 = vmatprep.subr.bf16.mxu0 %v7083_v33  ;;  %4039 = vmatprep.subr.bf16.mxu1 %v7085_v36 }
0x1503   :  { %3999 = vmatpush1.bf16.msra.mxu0 %v7087_v38  ;;  %4040 = vmatpush1.bf16.msra.mxu1 %v7089_v39 }
0x1504   :  { %4000 = vmatprep.subr.bf16.mxu0 %v7095_v45  ;;  %4041 = vmatprep.subr.bf16.mxu1 %v7097_v28 }
0x1507   :  { %4001 = vmatpush1.bf16.msra.mxu0 %v7099_v30  ;;  %4042 = vmatpush1.bf16.msra.mxu1 %v7101_v62 }
0x1508   :  { %4097 = vmatprep.subr.bf16.mxu0 %v7011_v51  ;;  %4138 = vmatprep.subr.bf16.mxu1 %v7013_v52 }
0x15bd   :  { %v3909_v0 = vpop.f32.mrb[128].mxu0  ;;  %v3950_v3 = vpop.f32.mrb[128].mxu1 }
0x15be   :  { %v3957_v6 = vadd.f32 %v3909_v0, %v3148_v47  ;;  %v3959_v1 = vadd.f32 %v3950_v3, %v3221_v19  ;;  %v3911_v7 = vpop.f32.mrb[129].mxu0  ;;  %v3952_v51 = vpop.f32.mrb[129].mxu1  ;;  %v7496_v47 = vld [vmem:[#allocation10 + $0xa8] ss:$16 sps:$4 sm:$0xff]   ;;  %v7502_v19 = vld [vmem:[#allocation10 + $0xcc] ss:$16 sps:$4 sm:$0xff]  }
0x15bf   :  { %v3958_v2 = vadd.f32 %v3911_v7, %v3150_v63  ;;  %v3960_v52 = vadd.f32 %v3952_v51, %v3223_v14  ;;  %v3913_v23 = vpop.f32.mrb[130].mxu0  ;;  %v3954_v25 = vpop.f32.mrb[130].mxu1  ;;  %v7508_v63 = vld [vmem:[#allocation10 + $0xc8] ss:$16 sps:$4 sm:$0xff]   ;;  %v7514_v14 = vld [vmem:[#allocation10 + $0xec] ss:$16 sps:$4 sm:$0xff]  }
0x15c0   :  { %v4654_v48 = vmul.f32 -1.442695, %v3957_v6  ;;  %v3914_v46 = vpop.f32.mrb[131].mxu0  ;;  %v3955_v26 = vpop.f32.mrb[131].mxu1  ;;  %v7517_v0 = vld [vmem:[#allocation10 + $0xe0] ss:$16 sps:$4 sm:$0xff]  }
0x15c1   :  { %v4655_v8 = vmul.f32 -1.442695, %v3958_v2  ;;  %v4656_v32 = vmul.f32 -1.442695, %v3960_v52  ;;  %v7520_v3 = vld [vmem:[#allocation10 + $0xe8] ss:$16 sps:$4 sm:$0xff]  }
0x15c2   :  { %5320 = vpow2.f32 %v4654_v48  ;;  %v5478_v6 = vld [vmem:[#allocation10 + $0x4] ss:$16 sps:$4 sm:$0xff]   ;;  %v7797_v7 = vld [vmem:[#allocation27_spill] sm:$0xff] }
0x15c3   :  { %5322 = vpow2.f32 %v4655_v8  ;;  %v3152_v51 = vadd.f32 %v7797_v7, %v7221_v59  ;;  %v7798_v2 = vld [vmem:[#allocation30_spill] sm:$0xff]  ;;  %v7799_v23 = vld [vmem:[#allocation31_spill] sm:$0xff] }
0x15c4   :  { %5324 = vpow2.f32 %v4656_v32  ;;  %v3225_v52 = vadd.f32 %v7798_v2, %v7224_v57  ;;  %v3154_v25 = vadd.f32 %v7799_v23, %v7231_v24  ;;  %v7800_v48 = vld [vmem:[#allocation34_spill] sm:$0xff] }
0x15c5   :  { %5326 = vtanh.f32 %v3959_v1  ;;  %v5479_v1 = vld [vmem:[#allocation10 + $0xc] ss:$16 sps:$4 sm:$0xff]   ;;  %v3227_v46 = vadd.f32 %v7800_v48, %v7234_v60 }
0x15cc   :  { %v5321_v37 = vpop.eup %5320 }
0x15cd   :  { %v5323_v33 = vpop.eup %5322  ;;  %v3964_v36 = vadd.f32 1.0, %v5321_v37 }
0x15ce   :  { %v3970_v38 = vadd.f32 1.0, %v5323_v33  ;;  %v5325_v39 = vpop.eup %5324 }
0x15cf   :  { %5328 = vrcp.f32 %v3964_v36  ;;  %v5327_v45 = vpop.eup %5326  ;;  %v3977_v27 = vadd.f32 1.0, %v5325_v39 }
0x15d0   :  { %5330 = vrcp.f32 %v3970_v38 }
0x15d1   :  { %5332 = vrcp.f32 %v3977_v27 }
0x15d9   :  { %v5329_v28 = vpop.eup %5328 }
0x15da   :  { %v5331_v30 = vpop.eup %5330  ;;  %v3981_v62 = vmul.f32 %v5329_v28, %v5327_v45 }
0x15db   :  { %v3980_v54 = vmul.f32 %v5331_v30, %v7382_v15  ;;  %v5333_v42 = vpop.eup %5332  ;;  %v7478_v15 = vld [vmem:[#allocation10 + $0x8c] ss:$16 sps:$4 sm:$0xff]  }
0x15dd   :  { %v7428_v29 = vadd.f32 %v3981_v62, %v3980_v54 }
0x15df   :  { %5334 = vtanh.f32 %v7428_v29 }
0x15e9   :  { %v5335_v49 = vpop.eup %5334 }
0x15ea   :  { %v3984_v55 = vmul.f32 %v5335_v49, %v5333_v42 }
0x15ec   :  { %v3985_v20 = vpack.c.bf16 %v3984_v55, %v3984_v55 }
0x15ee   :  { %4019 = vmatmul.mubr.bf16.vlgmr.msra.gmra.mrb[132].mxu0 %v3985_v20  ;;  %4060 = vmatmul.mubr.bf16.vlgmr.msra.gmra.mrb[132].mxu1 %v3985_v20 }
0x15ef   :  { %4098 = vmatpush1.bf16.msra.mxu0 %v7431_v9  ;;  %4139 = vmatpush1.bf16.msra.mxu1 %v7434_v12 }
0x15f0   :  { %4099 = vmatprep.subr.bf16.mxu0 %v7437_v35  ;;  %4140 = vmatprep.subr.bf16.mxu1 %v7440_v44 }
0x15f1   :  { %4129 = vmatprep.mubr.bf16.mxu0 %v7687_v16  ;;  %4170 = vmatprep.mubr.bf16.mxu1 %v7687_v16 }
0x15f3   :  { %4100 = vmatpush1.bf16.msra.mxu0 %v7445_v13  ;;  %4141 = vmatpush1.bf16.msra.mxu1 %v7448_v41 }
0x15f4   :  { %4101 = vmatprep.subr.bf16.mxu0 %v7451_v22  ;;  %4142 = vmatprep.subr.bf16.mxu1 %v7454_v21 }
0x15f7   :  { %4102 = vmatpush1.bf16.msra.mxu0 %v7457_v11  ;;  %4143 = vmatpush1.bf16.msra.mxu1 %v7460_v5 }
0x15f8   :  { %4103 = vmatprep.subr.bf16.mxu0 %v7463_v17  ;;  %4144 = vmatprep.subr.bf16.mxu1 %v7466_v34 }
0x15fb   :  { %4104 = vmatpush1.bf16.msra.mxu0 %v7469_v43  ;;  %4145 = vmatpush1.bf16.msra.mxu1 %v7472_v10 }
0x15fc   :  { %4105 = vmatprep.subr.bf16.mxu0 %v7475_v18  ;;  %4146 = vmatprep.subr.bf16.mxu1 %v7478_v15 }
0x15ff   :  { %4106 = vmatpush1.bf16.msra.mxu0 %v7481_v56  ;;  %4147 = vmatpush1.bf16.msra.mxu1 %v7484_v53 }
0x1600   :  { %4107 = vmatprep.subr.bf16.mxu0 %v7487_v31  ;;  %4148 = vmatprep.subr.bf16.mxu1 %v7490_v40 }
0x1603   :  { %4108 = vmatpush1.bf16.msra.mxu0 %v7493_v50  ;;  %4149 = vmatpush1.bf16.msra.mxu1 %v7496_v47 }
0x1604   :  { %4109 = vmatprep.subr.bf16.mxu0 %v7499_v58  ;;  %4150 = vmatprep.subr.bf16.mxu1 %v7502_v19 }
0x1607   :  { %4110 = vmatpush1.bf16.msra.mxu0 %v7505_v61  ;;  %4151 = vmatpush1.bf16.msra.mxu1 %v7508_v63 }
0x1608   :  { %4111 = vmatprep.subr.bf16.mxu0 %v7511_v4  ;;  %4152 = vmatprep.subr.bf16.mxu1 %v7514_v14 }
0x160b   :  { %4112 = vmatpush1.bf16.msra.mxu0 %v7517_v0  ;;  %4153 = vmatpush1.bf16.msra.mxu1 %v7520_v3 }
0x160c   :  { %4208 = vmatprep.subr.bf16.mxu0 %v5478_v6  ;;  %4249 = vmatprep.subr.bf16.mxu1 %v5479_v1 }
0x16c1   :  { %v4020_v26 = vpop.f32.mrb[132].mxu0  ;;  %v4061_v8 = vpop.f32.mrb[132].mxu1 }
0x16c2   :  { %v4068_v32 = vadd.f32 %v4020_v26, %v3152_v51  ;;  %v4070_v37 = vadd.f32 %v4061_v8, %v3225_v52  ;;  %v4022_v33 = vpop.f32.mrb[133].mxu0  ;;  %v4063_v36 = vpop.f32.mrb[133].mxu1 }
0x16c3   :  { %v4069_v38 = vadd.f32 %v4022_v33, %v3154_v25  ;;  %v4071_v39 = vadd.f32 %v4063_v36, %v3227_v46  ;;  %v4024_v45 = vpop.f32.mrb[134].mxu0  ;;  %v4065_v28 = vpop.f32.mrb[134].mxu1 }
0x16c4   :  { %v4657_v30 = vmul.f32 -1.442695, %v4068_v32  ;;  %v4025_v62 = vpop.f32.mrb[135].mxu0  ;;  %v4066_v27 = vpop.f32.mrb[135].mxu1 }
0x16c5   :  { %v4658_v54 = vmul.f32 -1.442695, %v4069_v38  ;;  %v4659_v42 = vmul.f32 -1.442695, %v4071_v39  ;;  %v4319_v62 = vld [vmem:[%s7649_s10 + $0x8] sm:$0xff] }
0x16c6   :  { %5336 = vpow2.f32 %v4657_v30  ;;  %v4318_v30 = vld [vmem:[%s7649_s10] sm:$0xff] }
0x16c7   :  { %5338 = vpow2.f32 %v4658_v54  ;;  %v4720_v27 = vpack.c.bf16 %v4319_v62, %v4318_v30  ;;  %v5605_v54 = vmov 0.0|0.0   ;;  %v4666_v62 = vld [vmem:[#allocation2] ss:$0 sm:$0xff] }
0x16c8   :  { %5340 = vpow2.f32 %v4659_v42  ;;  %v4320_v42 = vld [vmem:[%s7649_s10 + $0x10] sm:$0xff] }
0x16c9   :  { %5342 = vtanh.f32 %v4070_v37 }
0x16d0   :  { %v5337_v49 = vpop.eup %5336 }
0x16d1   :  { %v5339_v55 = vpop.eup %5338  ;;  %v4075_v20 = vadd.f32 1.0, %v5337_v49  ;;  %v4321_v49 = vld [vmem:[%s7649_s10 + $0x18] sm:$0xff] }
0x16d2   :  { %v4081_v6 = vadd.f32 1.0, %v5339_v55  ;;  %v5341_v1 = vpop.eup %5340  ;;  %v4723_v55 = vpack.c.bf16 %v4321_v49, %v4320_v42 }
0x16d3   :  { %5344 = vrcp.f32 %v4075_v20  ;;  %v5343_v7 = vpop.eup %5342  ;;  %v4088_v23 = vadd.f32 1.0, %v5341_v1  ;;  %v4322_v20 = vld [vmem:[%s7649_s10 + $0x20] sm:$0xff] }
0x16d4   :  { %5346 = vrcp.f32 %v4081_v6  ;;  %v4323_v6 = vld [vmem:[%s7649_s10 + $0x28] sm:$0xff] }
0x16d5   :  { %5348 = vrcp.f32 %v4088_v23  ;;  %v4726_v1 = vpack.c.bf16 %v4323_v6, %v4322_v20  ;;  %v4327_v23 = vld [vmem:[%s7649_s10 + $0x48] sm:$0xff] }
0x16dd   :  { %v5345_v51 = vpop.eup %5344 }
0x16de   :  { %v5347_v2 = vpop.eup %5346  ;;  %v4092_v52 = vmul.f32 %v5345_v51, %v5343_v7  ;;  %v4324_v7 = vld [vmem:[%s7649_s10 + $0x30] sm:$0xff]  ;;  %v4325_v51 = vld [vmem:[%s7649_s10 + $0x38] sm:$0xff] }
0x16df   :  { %v4091_v25 = vmul.f32 %v5347_v2, %v7428_v29  ;;  %v5349_v46 = vpop.eup %5348  ;;  %v4729_v2 = vpack.c.bf16 %v4325_v51, %v4324_v7 }
0x16e1   :  { %v7532_v48 = vadd.f32 %v4092_v52, %v4091_v25  ;;  %v4326_v52 = vld [vmem:[%s7649_s10 + $0x40] sm:$0xff] }
0x16e2   :  { %v4732_v25 = vpack.c.bf16 %v4327_v23, %v4326_v52 }
0x16e3   :  { %5350 = vtanh.f32 %v7532_v48 }
0x16ed   :  { %v5351_v26 = vpop.eup %5350 }
0x16ee   :  { %v4095_v8 = vmul.f32 %v5351_v26, %v5349_v46  ;;  %v4329_v46 = vld [vmem:[%s7649_s10 + $0x58] sm:$0xff] }
0x16f0   :  { %v4096_v32 = vpack.c.bf16 %v4095_v8, %v4095_v8  ;;  %v4330_v8 = vld [vmem:[%s7649_s10 + $0x60] sm:$0xff] }
0x16f2   :  { %4130 = vmatmul.mubr.bf16.vlgmr.msra.gmra.mrb[136].mxu0 %v4096_v32  ;;  %4171 = vmatmul.mubr.bf16.vlgmr.msra.gmra.mrb[136].mxu1 %v4096_v32  ;;  %v4331_v32 = vld [vmem:[%s7649_s10 + $0x68] sm:$0xff] }
0x16f3   :  { %4209 = vmatpush1.bf16.msra.mxu0 %v7431_v9  ;;  %4250 = vmatpush1.bf16.msra.mxu1 %v7434_v12  ;;  %v7802_v9 = vld [vmem:[#allocation36_spill] sm:$0xff] }
0x16f4   :  { %4210 = vmatprep.subr.bf16.mxu0 %v7437_v35  ;;  %4251 = vmatprep.subr.bf16.mxu1 %v7440_v44  ;;  %v3231_v12 = vadd.f32 %v7802_v9, %v7224_v57  ;;  %v7803_v35 = vld [vmem:[#allocation33_spill] sm:$0xff]  ;;  %v4332_v9 = vld [vmem:[%s7649_s10 + $0x70] sm:$0xff] }
0x16f5   :  { %4240 = vmatprep.mubr.bf16.mxu0 %v7687_v16  ;;  %4281 = vmatprep.mubr.bf16.mxu1 %v7687_v16  ;;  %v7801_v16 = vld [vmem:[#allocation32_spill] sm:$0xff]  ;;  %v3160_v44 = vadd.f32 %v7803_v35, %v7231_v24 }
0x16f6   :  { %v3158_v29 = vadd.f32 %v7801_v16, %v7221_v59  ;;  %v5607_v16 = vmov 0.0  }
0x16f7   :  { %4211 = vmatpush1.bf16.msra.mxu0 %v7445_v13  ;;  %4252 = vmatpush1.bf16.msra.mxu1 %v7448_v41  ;;  %v7804_v13 = vld [vmem:[#allocation37_spill] sm:$0xff] }
0x16f8   :  { %4212 = vmatprep.subr.bf16.mxu0 %v7451_v22  ;;  %4253 = vmatprep.subr.bf16.mxu1 %v7454_v21  ;;  %v3233_v41 = vadd.f32 %v7804_v13, %v7234_v60 }
0x16fb   :  { %4213 = vmatpush1.bf16.msra.mxu0 %v7457_v11  ;;  %4254 = vmatpush1.bf16.msra.mxu1 %v7460_v5 }
0x16fc   :  { %4214 = vmatprep.subr.bf16.mxu0 %v7463_v17  ;;  %4255 = vmatprep.subr.bf16.mxu1 %v7466_v34 }
0x16ff   :  { %4215 = vmatpush1.bf16.msra.mxu0 %v7469_v43  ;;  %4256 = vmatpush1.bf16.msra.mxu1 %v7472_v10 }
0x1700   :  { %4216 = vmatprep.subr.bf16.mxu0 %v7475_v18  ;;  %4257 = vmatprep.subr.bf16.mxu1 %v7478_v15 }
0x1703   :  { %4217 = vmatpush1.bf16.msra.mxu0 %v7481_v56  ;;  %4258 = vmatpush1.bf16.msra.mxu1 %v7484_v53 }
0x1704   :  { %4218 = vmatprep.subr.bf16.mxu0 %v7487_v31  ;;  %4259 = vmatprep.subr.bf16.mxu1 %v7490_v40 }
0x1707   :  { %4219 = vmatpush1.bf16.msra.mxu0 %v7493_v50  ;;  %4260 = vmatpush1.bf16.msra.mxu1 %v7496_v47 }
0x1708   :  { %4220 = vmatprep.subr.bf16.mxu0 %v7499_v58  ;;  %4261 = vmatprep.subr.bf16.mxu1 %v7502_v19 }
0x170b   :  { %4221 = vmatpush1.bf16.msra.mxu0 %v7505_v61  ;;  %4262 = vmatpush1.bf16.msra.mxu1 %v7508_v63 }
0x170c   :  { %4222 = vmatprep.subr.bf16.mxu0 %v7511_v4  ;;  %4263 = vmatprep.subr.bf16.mxu1 %v7514_v14 }
0x170f   :  { %4223 = vmatpush1.bf16.msra.mxu0 %v7517_v0  ;;  %4264 = vmatpush1.bf16.msra.mxu1 %v7520_v3 }
0x1710   :  { %4719 = vmatprep.subr.bf16.mxu0 %v5605_v54 }
0x17c5   :  { %v4131_v22 = vpop.f32.mrb[136].mxu0  ;;  %v4172_v21 = vpop.f32.mrb[136].mxu1 }
0x17c6   :  { %v4179_v11 = vadd.f32 %v4131_v22, %v3158_v29  ;;  %v4181_v5 = vadd.f32 %v4172_v21, %v3231_v12  ;;  %v4133_v17 = vpop.f32.mrb[137].mxu0  ;;  %v4174_v34 = vpop.f32.mrb[137].mxu1  ;;  %v4738_v29 = vpack.c.bf16 %v4331_v32, %v4330_v8  ;;  %v4333_v12 = vld [vmem:[%s7649_s10 + $0x78] sm:$0xff]  ;;  %v7807_v21 = vld [vmem:[#allocation39_spill] sm:$0xff] }
0x17c7   :  { %v4180_v43 = vadd.f32 %v4133_v17, %v3160_v44  ;;  %v4182_v10 = vadd.f32 %v4174_v34, %v3233_v41  ;;  %v4135_v18 = vpop.f32.mrb[138].mxu0  ;;  %v4176_v15 = vpop.f32.mrb[138].mxu1  ;;  %v4741_v35 = vpack.c.bf16 %v4333_v12, %v4332_v9  ;;  %v7805_v44 = vld [vmem:[#allocation35_spill] sm:$0xff]  ;;  %v7806_v41 = vld [vmem:[#allocation38_spill] sm:$0xff] }
0x17c8   :  { %v4660_v56 = vmul.f32 -1.442695, %v4179_v11  ;;  %v4136_v53 = vpop.f32.mrb[139].mxu0  ;;  %v4177_v31 = vpop.f32.mrb[139].mxu1  ;;  %v3162_v13 = vadd.f32 %v7805_v44, %v7221_v59  ;;  %v3235_v22 = vadd.f32 %v7806_v41, %v7224_v57  ;;  %v3164_v11 = vadd.f32 %v7807_v21, %v7231_v24 }
0x17c9   :  { %v4661_v40 = vmul.f32 -1.442695, %v4180_v43  ;;  %v4662_v50 = vmul.f32 -1.442695, %v4182_v10 }
0x17ca   :  { %5352 = vpow2.f32 %v4660_v56 }
0x17cb   :  { %5354 = vpow2.f32 %v4661_v40 }
0x17cc   :  { %5356 = vpow2.f32 %v4662_v50 }
0x17cd   :  { %5358 = vtanh.f32 %v4181_v5  ;;  %v7808_v5 = vld [vmem:[#allocation40_spill] sm:$0xff] }
0x17ce   :  { %v3237_v17 = vadd.f32 %v7808_v5, %v7234_v60 }
0x17d4   :  { %v5353_v47 = vpop.eup %5352 }
0x17d5   :  { %v5355_v58 = vpop.eup %5354  ;;  %v4186_v19 = vadd.f32 1.0, %v5353_v47 }
0x17d6   :  { %v4192_v61 = vadd.f32 1.0, %v5355_v58  ;;  %v5357_v63 = vpop.eup %5356 }
0x17d7   :  { %5360 = vrcp.f32 %v4186_v19  ;;  %v5359_v4 = vpop.eup %5358  ;;  %v4199_v37 = vadd.f32 1.0, %v5357_v63 }
0x17d8   :  { %5362 = vrcp.f32 %v4192_v61 }
0x17d9   :  { %5364 = vrcp.f32 %v4199_v37 }
0x17e1   :  { %v5361_v14 = vpop.eup %5360 }
0x17e2   :  { %v5363_v0 = vpop.eup %5362  ;;  %v4203_v3 = vmul.f32 %v5361_v14, %v5359_v4 }
0x17e3   :  { %v4202_v33 = vmul.f32 %v5363_v0, %v7532_v48  ;;  %v5365_v38 = vpop.eup %5364  ;;  %v4328_v48 = vld [vmem:[%s7649_s10 + $0x50] sm:$0xff] }
0x17e4   :  { %v4735_v26 = vpack.c.bf16 %v4329_v46, %v4328_v48 }
0x17e5   :  { %v7576_v36 = vadd.f32 %v4203_v3, %v4202_v33 }
0x17e7   :  { %5366 = vtanh.f32 %v7576_v36 }
0x17f1   :  { %v5367_v39 = vpop.eup %5366 }
0x17f2   :  { %v4206_v45 = vmul.f32 %v5367_v39, %v5365_v38 }
0x17f4   :  { %v4207_v28 = vpack.c.bf16 %v4206_v45, %v4206_v45 }
0x17f6   :  { %4241 = vmatmul.mubr.bf16.vlgmr.msra.gmra.mrb[140].mxu0 %v4207_v28  ;;  %4282 = vmatmul.mubr.bf16.vlgmr.msra.gmra.mrb[140].mxu1 %v4207_v28 }
0x17f7   :  { %4721 = vmatpush3.bf16.msra.mxu0 %v4720_v27  ;;  %4716 = vmatprep.mubr.msk.f32.mxu0 %vm5606_vm2, %v5607_v16 }
0x17f8   :  { %4722 = vmatprep.subr.bf16.mxu0 %v5605_v54 }
0x17fb   :  { %4724 = vmatpush3.bf16.msra.mxu0 %v4723_v55 }
0x17fc   :  { %4725 = vmatprep.subr.bf16.mxu0 %v5605_v54 }
0x17ff   :  { %4727 = vmatpush3.bf16.msra.mxu0 %v4726_v1 }
0x1800   :  { %4728 = vmatprep.subr.bf16.mxu0 %v5605_v54 }
0x1803   :  { %4730 = vmatpush3.bf16.msra.mxu0 %v4729_v2 }
0x1804   :  { %4731 = vmatprep.subr.bf16.mxu0 %v5605_v54 }
0x1807   :  { %4733 = vmatpush3.bf16.msra.mxu0 %v4732_v25 }
0x1808   :  { %4734 = vmatprep.subr.bf16.mxu0 %v5605_v54 }
0x180b   :  { %4736 = vmatpush3.bf16.msra.mxu0 %v4735_v26 }
0x180c   :  { %4737 = vmatprep.subr.bf16.mxu0 %v5605_v54 }
0x180f   :  { %4739 = vmatpush3.bf16.msra.mxu0 %v4738_v29 }
0x1810   :  { %4740 = vmatprep.subr.bf16.mxu0 %v5605_v54 }
0x1813   :  { %4742 = vmatpush3.bf16.msra.mxu0 %v4741_v35 }
0x18c9   :  { %v4242_v34 = vpop.f32.mrb[140].mxu0  ;;  %v4283_v43 = vpop.f32.mrb[140].mxu1 }
0x18ca   :  { %v4290_v10 = vadd.f32 %v4242_v34, %v3162_v13  ;;  %v4292_v18 = vadd.f32 %v4283_v43, %v3235_v22  ;;  %v4244_v15 = vpop.f32.mrb[141].mxu0  ;;  %v4285_v56 = vpop.f32.mrb[141].mxu1 }
0x18cb   :  { %v4291_v53 = vadd.f32 %v4244_v15, %v3164_v11  ;;  %v4293_v31 = vadd.f32 %v4285_v56, %v3237_v17  ;;  %v4246_v40 = vpop.f32.mrb[142].mxu0  ;;  %v4287_v50 = vpop.f32.mrb[142].mxu1 }
0x18cc   :  { %v4663_v59 = vmul.f32 -1.442695, %v4290_v10  ;;  %v4247_v47 = vpop.f32.mrb[143].mxu0  ;;  %v4288_v58 = vpop.f32.mrb[143].mxu1 }
0x18cd   :  { %v4664_v57 = vmul.f32 -1.442695, %v4291_v53  ;;  %v4665_v24 = vmul.f32 -1.442695, %v4293_v31 }
0x18ce   :  { %5368 = vpow2.f32 %v4663_v59 }
0x18cf   :  { %5370 = vpow2.f32 %v4664_v57 }
0x18d0   :  { %5372 = vpow2.f32 %v4665_v24 }
0x18d1   :  { %5374 = vtanh.f32 %v4292_v18 }
0x18d8   :  { %v5369_v19 = vpop.eup %5368 }
0x18d9   :  { %v5371_v61 = vpop.eup %5370  ;;  %v4297_v60 = vadd.f32 1.0, %v5369_v19 }
0x18da   :  { %v4303_v63 = vadd.f32 1.0, %v5371_v61  ;;  %v5373_v4 = vpop.eup %5372 }
0x18db   :  { %5376 = vrcp.f32 %v4297_v60  ;;  %v5375_v14 = vpop.eup %5374  ;;  %v4310_v33 = vadd.f32 1.0, %v5373_v4 }
0x18dc   :  { %5378 = vrcp.f32 %v4303_v63 }
0x18dd   :  { %5380 = vrcp.f32 %v4310_v33 }
0x18e5   :  { %v5377_v0 = vpop.eup %5376 }
0x18e6   :  { %v5379_v3 = vpop.eup %5378  ;;  %v4314_v37 = vmul.f32 %v5377_v0, %v5375_v14 }
0x18e7   :  { %v4313_v38 = vmul.f32 %v5379_v3, %v7576_v36  ;;  %v5381_v45 = vpop.eup %5380 }
0x18e9   :  { %v4315_v39 = vadd.f32 %v4314_v37, %v4313_v38 }
0x18eb   :  { %5382 = vtanh.f32 %v4315_v39 }
0x18f5   :  { %v5383_v28 = vpop.eup %5382 }
0x18f6   :  { %v4317_v30 = vmul.f32 %v5383_v28, %v5381_v45 }
0x18f8   :  { %4717 = vmatmul.mubr.f32.vlgmr.msra.gmra.mrb[144].mxu0 %v4317_v30 }
0x19cb   :  { %v4407_v27 = vpop.f32.mrb[144].mxu0 }
0x19cc   :  { %v4408_v54 = vadd.f32 %v4666_v62, %v4407_v27  ;;  %v4718_v42 = vpop.f32.mrb[145].mxu0 }
0x19ce   :  { %4412 = vst.msk [vmem:[%s7651_s12] sm:$0xff] %vm4411_vm3, %v4408_v54 }
0x19cf   :  { %4417 = vsyncpa [#allocation4], 1 }
0x19d0   :  { %4418 = vsyncpa [#allocation6], 1 }
0x19d1   :  { %4419 = vsyncpa [#allocation9], 1 }

</bundles_post_ra>
